<compile_context>
chip_gen: v7x
topology: tpu7x:2x2x1
jax: 0.10.0
libtpu: 0.0.40
codegen_flags: <defaults>
</compile_context>

<pallas_src>
import functools
import math

import jax
import jax.numpy as jnp
import numpy as np
from jax import lax
from jax.experimental import pallas as pl
from jax.experimental.pallas import tpu as pltpu


_NEG_MASK = -10000.0   # reference `logits[~mask] = -10000.0`
_NEG_PAD = -1.0e9      # padded key rows: always excluded from the softmax


def _round_up(x, m):
    return ((x + m - 1) // m) * m


# ----------------------------------------------------------------------------
# Pallas kernel: one attention "branch"
#   queries come from `qfeat`; keys/values are the concatenation of branch-a
#   (video) and branch-b (text) features, each with its own (Wq, Wk, Wv).
# ----------------------------------------------------------------------------
def _branch_kernel(
    qf_ref, kfa_ref, kfb_ref,        # features (1,tq,d) / (1,Lka,d) / (1,Lkb,d)
    mq_ref, kba_ref, kbb_ref,        # q validity (1,tq,1); key add-bias (1,1,Lk*)
    wq_ref, bq_ref,                  # fused [Wq_a | Wq_b]   (d,2d), (1,2d)
    wkva_ref, bkva_ref,              # fused [Wk_a | Wv_a]   (d,2d), (1,2d)
    wkvb_ref, bkvb_ref,              # fused [Wk_b | Wv_b]   (d,2d), (1,2d)
    out_ref,                         # (1, tq, d)
    kva_scr, kvb_scr,                # persistent VMEM K/V cache (Lk*, 2d)
    *, num_head, d_head, d_model,
):
    f32 = jnp.float32
    cdt = kva_scr.dtype              # MXU compute dtype (bf16)

    # ---- K/V projections: only on the first query tile of each batch element;
    #      cached in VMEM scratch and re-used by the remaining q tiles.
    @pl.when(pl.program_id(1) == 0)
    def _():
        kva_scr[...] = (jnp.dot(kfa_ref[0], wkva_ref[...],
                                preferred_element_type=f32)
                        + bkva_ref[...]).astype(cdt)          # (Lka, 2d) [ka|va]
        kvb_scr[...] = (jnp.dot(kfb_ref[0], wkvb_ref[...],
                                preferred_element_type=f32)
                        + bkvb_ref[...]).astype(cdt)          # (Lkb, 2d) [kb|vb]

    # ---- Query projection for this tile: one wide MXU matmul [qa | qb].
    q_ab = (jnp.dot(qf_ref[0], wq_ref[...], preferred_element_type=f32)
            + bq_ref[...]).astype(cdt)                        # (tq, 2d)

    kv_a = kva_scr[...]                                       # (Lka, 2d)
    kv_b = kvb_scr[...]                                       # (Lkb, 2d)

    q_valid = mq_ref[0] > 0.5                                 # (tq, 1) bool
    kba = kba_ref[0]                                          # (1, Lka) 0/-1e4/-1e9
    kbb = kbb_ref[0]                                          # (1, Lkb)
    neg = jnp.float32(_NEG_MASK)
    # Fully-masked query rows: every *real* key gets exactly -1e4 (matching the
    # reference), while padded keys keep -1e9 and stay excluded.
    neg_row_a = jnp.minimum(kba, neg)                         # (1, Lka)
    neg_row_b = jnp.minimum(kbb, neg)                         # (1, Lkb)

    scale = 1.0 / math.sqrt(d_head)
    nt = (((1,), (1,)), ((), ()))    # contract last dims: Q(m,k) @ K(n,k)^T

    # TODO(synk): training-mode nn.Dropout on the attention logits is not
    # implemented in-kernel (inference path only).
    head_out = []
    for h in range(num_head):        # static, fully unrolled
        lo, hi = h * d_head, (h + 1) * d_head
        qa_h = q_ab[:, lo:hi]
        qb_h = q_ab[:, d_model + lo:d_model + hi]
        ka_h = kv_a[:, lo:hi]
        va_h = kv_a[:, d_model + lo:d_model + hi]
        kb_h = kv_b[:, lo:hi]
        vb_h = kv_b[:, d_model + lo:d_model + hi]

        # QK^T in NT form: MXU consumes K directly, no XLU transpose.
        la = lax.dot_general(qa_h, ka_h, nt, preferred_element_type=f32)
        lb = lax.dot_general(qb_h, kb_h, nt, preferred_element_type=f32)

        la = jnp.where(q_valid, la + kba, neg_row_a)
        lb = jnp.where(q_valid, lb + kbb, neg_row_b)

        # Joint softmax over [branch-a keys | branch-b keys] without ever
        # materialising the concatenated logits.
        m = jnp.maximum(jnp.max(la, axis=-1, keepdims=True),
                        jnp.max(lb, axis=-1, keepdims=True))   # (tq, 1)
        ea = jnp.exp(la - m)
        eb = jnp.exp(lb - m)
        denom = (jnp.sum(ea, axis=-1, keepdims=True)
                 + jnp.sum(eb, axis=-1, keepdims=True))        # (tq, 1)

        ctx = (jnp.dot(ea.astype(cdt), va_h, preferred_element_type=f32)
               + jnp.dot(eb.astype(cdt), vb_h, preferred_element_type=f32))

        # Softmax normalisation + the module's 1/sqrt(d_head) folded into one
        # small per-row multiply; reciprocal on the (otherwise idle) EUP.
        head_out.append(ctx * (pl.reciprocal(denom, approx=True) * scale))

    # Single lane-dense store of the full (tq, d) result tile.
    out_ref[0] = jnp.concatenate(head_out, axis=-1).astype(out_ref.dtype)


# ----------------------------------------------------------------------------
# Wrapper helpers
# ----------------------------------------------------------------------------
def _default_vmem_limit():
    """48 MiB on v7x (64 MiB physical); 96 MiB on v5e/v6e (128 MiB physical)."""
    try:
        kind = jax.devices()[0].device_kind.lower()
    except Exception:
        kind = ""
    if "v5" in kind or "v6" in kind:
        return 96 * 1024 * 1024
    return 48 * 1024 * 1024


def _pick_q_tile(Lq, max_single=512):
    """(tile size, padded Lq). Never returns an unbounded non-aligned block."""
    if Lq <= max_single:
        tq = _round_up(Lq, 8)        # single tile == full (padded) extent
        return tq, tq
    tq = 256                          # (8,128)-aligned, lane-dense stores
    return tq, _round_up(Lq, tq)


def _pad_rows(x3, new_len):
    """Zero-pad a (B, L, d) tensor along axis 1 to new_len."""
    pad = new_len - x3.shape[1]
    if pad == 0:
        return x3
    return jnp.pad(x3, ((0, 0), (0, pad), (0, 0)))


def _key_bias(mask, Lk_pad):
    """(B,1,Lk_pad) additive bias: 0 valid key, -1e4 masked key, -1e9 padded."""
    B, Lk = mask.shape
    kb = jnp.where(mask, 0.0, _NEG_MASK).astype(jnp.float32)
    if Lk_pad > Lk:
        kb = jnp.concatenate(
            [kb, jnp.full((B, Lk_pad - Lk), _NEG_PAD, jnp.float32)], axis=1)
    return kb[:, None, :]


def _q_valid_col(mask, Lq_pad):
    """(B, Lq_pad, 1) query validity column (padded rows are invalid)."""
    B, Lq = mask.shape
    mq = mask.astype(jnp.float32)
    if Lq_pad > Lq:
        mq = jnp.concatenate(
            [mq, jnp.zeros((B, Lq_pad - Lq), jnp.float32)], axis=1)
    return mq[:, :, None]


def _fuse(pa, pb, compute_dtype):
    """Fuse two (W(d,d), b(d,)) projections into a (d,2d) weight / (1,2d) bias."""
    d = pa[0].shape[0]
    W = jnp.concatenate([pa[0], pb[0]], axis=1).astype(compute_dtype)
    b = jnp.concatenate([pa[1], pb[1]], axis=0).astype(jnp.float32).reshape(1, 2 * d)
    return W, b


def _branch_call(qfeat_p, kfeat_a_p, kfeat_b_p, mq3, kba, kbb,
                 fused_q, fused_kva, fused_kvb,
                 *, num_head, tq, out_dtype, vmem_limit):
    """One branch of VideoTextAttention on pre-padded inputs."""
    B, Lq_p, d = qfeat_p.shape
    Lka = kfeat_a_p.shape[1]
    Lkb = kfeat_b_p.shape[1]
    d_head = d // num_head
    assert Lq_p % tq == 0
    nq = Lq_p // tq
    cdt = qfeat_p.dtype

    wq, bq = fused_q
    wkva, bkva = fused_kva
    wkvb, bkvb = fused_kvb

    kernel = functools.partial(_branch_kernel, num_head=num_head,
                               d_head=d_head, d_model=d)

    def build(single_buffer_consts):
        # Grid-invariant weights/biases: single-buffer to reclaim VMEM.
        cmode = ({"pipeline_mode": pl.Buffered(1)}
                 if single_buffer_consts else {})
        w_spec = pl.BlockSpec((d, 2 * d), lambda b, q: (0, 0), **cmode)
        b_spec = pl.BlockSpec((1, 2 * d), lambda b, q: (0, 0), **cmode)
        in_specs = [
            pl.BlockSpec((1, tq, d), lambda b, q: (b, q, 0)),     # queries (tiled)
            pl.BlockSpec((1, Lka, d), lambda b, q: (b, 0, 0)),    # key feats a
            pl.BlockSpec((1, Lkb, d), lambda b, q: (b, 0, 0)),    # key feats b
            pl.BlockSpec((1, tq, 1), lambda b, q: (b, q, 0)),     # query validity
            pl.BlockSpec((1, 1, Lka), lambda b, q: (b, 0, 0)),    # key bias a
            pl.BlockSpec((1, 1, Lkb), lambda b, q: (b, 0, 0)),    # key bias b
            w_spec, b_spec, w_spec, b_spec, w_spec, b_spec,
        ]
        out_spec = pl.BlockSpec((1, tq, d), lambda b, q: (b, q, 0))
        return pl.pallas_call(
            kernel,
            grid=(B, nq),
            in_specs=in_specs,
            out_specs=out_spec,
            out_shape=jax.ShapeDtypeStruct((B, Lq_p, d), out_dtype),
            scratch_shapes=[pltpu.VMEM((Lka, 2 * d), cdt),   # cached K/V (branch a)
                            pltpu.VMEM((Lkb, 2 * d), cdt)],  # cached K/V (branch b)
            compiler_params=pltpu.CompilerParams(
                # Batch axis across megacore cores; q axis "arbitrary" so the
                # per-batch K/V VMEM cache stays coherent on one core.
                dimension_semantics=("parallel", "arbitrary"),
                vmem_limit_bytes=vmem_limit,
            ),
        )

    args = (qfeat_p, kfeat_a_p, kfeat_b_p, mq3, kba, kbb,
            wq, bq, wkva, bkva, wkvb, bkvb)
    try:
        return build(True)(*args)
    except Exception:
        # pipeline_mode=pl.Buffered(1) unsupported on this JAX/libtpu: fall
        # back to default double-buffering (identical numerics).
        return build(False)(*args)


def video_text_attention(params, vid_feat, vid_mask, txt_feat, txt_mask, *,
                         num_head, compute_dtype=jnp.bfloat16,
                         out_dtype=jnp.float32):
    """Pallas implementation of VideoTextAttention.forward (inference mode).

    out_dtype can be set to bfloat16 to halve output writeback traffic if the
    consumer allows; defaults to float32 to match the reference module.
    """
    v2v, t2v, t2t, v2t = params["v2v"], params["t2v"], params["t2t"], params["v2t"]
    B, Lv, d = vid_feat.shape
    Lt = txt_feat.shape[1]
    vmem_limit = _default_vmem_limit()

    vf = vid_feat.astype(compute_dtype)
    tf = txt_feat.astype(compute_dtype)

    # Key-side tensors (shared by both query branches): pad key rows to a
    # multiple of 128 so logits / softmax / P@V tiles are lane-dense; padded
    # rows carry the -1e9 bias so they never contribute to the softmax.
    Lv_k = max(_round_up(Lv, 128), 128)
    Lt_k = max(_round_up(Lt, 128), 128)
    vf_k = _pad_rows(vf, Lv_k)
    tf_k = _pad_rows(tf, Lt_k)
    kb_v = _key_bias(vid_mask, Lv_k)
    kb_t = _key_bias(txt_mask, Lt_k)

    # Query-side tensors per branch: pad to the query-tile size; padded rows
    # are marked invalid and sliced off below.
    tq_v, Lv_q = _pick_q_tile(Lv)
    tq_t, Lt_q = _pick_q_tile(Lt)
    vf_q = _pad_rows(vf, Lv_q)
    tf_q = _pad_rows(tf, Lt_q)
    mq_v = _q_valid_col(vid_mask, Lv_q)
    mq_t = _q_valid_col(txt_mask, Lt_q)

    # Video-query branch: keys/values = [video (v2v) | text (t2v)].
    vid_out = _branch_call(
        vf_q, vf_k, tf_k, mq_v, kb_v, kb_t,
        _fuse(v2v[0], t2v[0], compute_dtype),   # [Wq_v2v | Wq_t2v]
        _fuse(v2v[1], v2v[2], compute_dtype),   # [Wk | Wv] for video keys
        _fuse(t2v[1], t2v[2], compute_dtype),   # [Wk | Wv] for text keys
        num_head=num_head, tq=tq_v, out_dtype=out_dtype, vmem_limit=vmem_limit,
    )[:, :Lv, :]

    # Text-query branch: keys/values = [video (v2t) | text (t2t)].
    txt_out = _branch_call(
        tf_q, vf_k, tf_k, mq_t, kb_v, kb_t,
        _fuse(v2t[0], t2t[0], compute_dtype),
        _fuse(v2t[1], v2t[2], compute_dtype),
        _fuse(t2t[1], t2t[2], compute_dtype),
        num_head=num_head, tq=tq_t, out_dtype=out_dtype, vmem_limit=vmem_limit,
    )[:, :Lt, :]
    return vid_out, txt_out


# ----------------------------------------------------------------------------
# Pure-JAX reference mirroring the PyTorch module (for verification).
# ----------------------------------------------------------------------------
def reference_forward(params, vid_feat, vid_mask, txt_feat, txt_mask, *, num_head):
    d = vid_feat.shape[-1]
    dh = d // num_head
    lin = lambda x, p: x @ p[0] + p[1]

    def attn_logits(feat_k, mask_k, feat_q, mask_q, proj):
        q = lin(feat_q, proj[0])
        k = lin(feat_k, proj[1])
        B, Lq, _ = q.shape
        Lk = k.shape[1]
        q = q.reshape(B, Lq, num_head, dh)
        k = k.reshape(B, Lk, num_head, dh)
        logits = jnp.einsum("bqhd,bkhd->bhqk", q, k)
        m = mask_q[:, :, None] & mask_k[:, None, :]
        m = jnp.broadcast_to(m[:, None], logits.shape)
        return jnp.where(m, logits, -10000.0)

    v2v, t2v, t2t, v2t = params["v2v"], params["t2v"], params["t2t"], params["v2t"]
    B = vid_feat.shape[0]
    v_value = jnp.concatenate([lin(vid_feat, v2v[2]), lin(txt_feat, t2v[2])], axis=1)
    v_value = v_value.reshape(B, -1, num_head, dh)
    t_value = jnp.concatenate([lin(vid_feat, v2t[2]), lin(txt_feat, t2t[2])], axis=1)
    t_value = t_value.reshape(B, -1, num_head, dh)

    v2v_l = attn_logits(vid_feat, vid_mask, vid_feat, vid_mask, v2v)
    t2v_l = attn_logits(txt_feat, txt_mask, vid_feat, vid_mask, t2v)
    v2t_l = attn_logits(vid_feat, vid_mask, txt_feat, txt_mask, v2t)
    t2t_l = attn_logits(txt_feat, txt_mask, txt_feat, txt_mask, t2t)

    v_logits = jnp.concatenate([v2v_l, t2v_l], axis=-1)
    t_logits = jnp.concatenate([v2t_l, t2t_l], axis=-1)
    sm = lambda x: jax.nn.softmax(x, axis=-1) / np.sqrt(dh)
    vo = jnp.einsum("bhqk,bkhd->bqhd", sm(v_logits), v_value).reshape(B, -1, d)
    to = jnp.einsum("bhqk,bkhd->bqhd", sm(t_logits), t_value).reshape(B, -1, d)
    return vo, to


# ----------------------------------------------------------------------------
# Parameter init + demo
# ----------------------------------------------------------------------------
def init_params(key, d_model):
    """Deterministic synthetic weights. W stored as (d_in, d_out): y = x @ W + b."""
    params = {}
    for name in ("v2v", "t2v", "t2t", "v2t"):
        triple = []
        for _ in range(3):
            key, kw, kb = jax.random.split(key, 3)
            W = 0.05 * jax.random.normal(kw, (d_model, d_model), dtype=jnp.float32)
            b = 0.02 * jax.random.normal(kb, (d_model,), dtype=jnp.float32)
            triple.append((W, b))
        params[name] = triple
    return params


if __name__ == "__main__":
    B, Lv, Lt = 2, 16, 8
    d_model, num_head = 32, 4

    key = jax.random.PRNGKey(0)
    key, kp, kv, kt = jax.random.split(key, 4)
    params = init_params(kp, d_model)

    vid_feat = jax.random.normal(kv, (B, Lv, d_model), dtype=jnp.float32)
    txt_feat = jax.random.normal(kt, (B, Lt, d_model), dtype=jnp.float32)

    # Boolean masks with some padded positions (incl. fully padded query rows).
    vid_lens = jnp.array([Lv, 10])
    txt_lens = jnp.array([Lt, 5])
    vid_mask = jnp.arange(Lv)[None, :] < vid_lens[:, None]   # (B, Lv) bool
    txt_mask = jnp.arange(Lt)[None, :] < txt_lens[:, None]   # (B, Lt) bool

    vid_out, txt_out = video_text_attention(
        params, vid_feat, vid_mask, txt_feat, txt_mask, num_head=num_head
    )
    jax.block_until_ready((vid_out, txt_out))

    vid_ref, txt_ref = reference_forward(
        params, vid_feat, vid_mask, txt_feat, txt_mask, num_head=num_head
    )
    # bf16 MXU inputs + approximate reciprocal -> loosened tolerance vs. the
    # pure-f32 reference (observed errors are ~1e-3 at these magnitudes).
    assert jnp.allclose(vid_out, vid_ref, atol=2e-2, rtol=2e-2), "vid mismatch"
    assert jnp.allclose(txt_out, txt_ref, atol=2e-2, rtol=2e-2), "txt mismatch"

    print("KERNEL_OK")
</pallas_src>

<mosaic_0001>
module attributes {stable_mosaic.version = 11 : i64} {
  func.func @_branch_kernel(%arg0: i32, %arg1: i32, %arg2: memref<1x16x32xbf16, #tpu.memory_space<vmem>>, %arg3: memref<1x128x32xbf16, #tpu.memory_space<vmem>>, %arg4: memref<1x128x32xbf16, #tpu.memory_space<vmem>>, %arg5: memref<1x16x1xf32, #tpu.memory_space<vmem>>, %arg6: memref<1x1x128xf32, #tpu.memory_space<vmem>>, %arg7: memref<1x1x128xf32, #tpu.memory_space<vmem>>, %arg8: memref<32x64xbf16, #tpu.memory_space<vmem>>, %arg9: memref<1x64xf32, #tpu.memory_space<vmem>>, %arg10: memref<32x64xbf16, #tpu.memory_space<vmem>>, %arg11: memref<1x64xf32, #tpu.memory_space<vmem>>, %arg12: memref<32x64xbf16, #tpu.memory_space<vmem>>, %arg13: memref<1x64xf32, #tpu.memory_space<vmem>>, %arg14: memref<1x16x32xf32, #tpu.memory_space<vmem>>, %arg15: memref<128x64xbf16, #tpu.memory_space<vmem>>, %arg16: memref<128x64xbf16, #tpu.memory_space<vmem>>) attributes {dimension_semantics = [#tpu.dimension_semantics<parallel>, #tpu.dimension_semantics<arbitrary>], iteration_bounds = array<i64: 2, 1>, scalar_prefetch = 0 : i64, scratch_operands = 2 : i64, tpu.core_type = #tpu.core_type<tc>, window_params = [{transform_indices = @transform_0, window_bounds = array<i64: 1, 16, 32>}, {transform_indices = @transform_1, window_bounds = array<i64: 1, 128, 32>}, {transform_indices = @transform_2, window_bounds = array<i64: 1, 128, 32>}, {transform_indices = @transform_3, window_bounds = array<i64: 1, 16, 1>}, {transform_indices = @transform_4, window_bounds = array<i64: 1, 1, 128>}, {transform_indices = @transform_5, window_bounds = array<i64: 1, 1, 128>}, {pipeline_mode = #tpu.pipeline_mode<synchronous>, transform_indices = @transform_6, window_bounds = array<i64: 32, 64>}, {pipeline_mode = #tpu.pipeline_mode<synchronous>, transform_indices = @transform_7, window_bounds = array<i64: 1, 64>}, {pipeline_mode = #tpu.pipeline_mode<synchronous>, transform_indices = @transform_8, window_bounds = array<i64: 32, 64>}, {pipeline_mode = #tpu.pipeline_mode<synchronous>, transform_indices = @transform_9, window_bounds = array<i64: 1, 64>}, {pipeline_mode = #tpu.pipeline_mode<synchronous>, transform_indices = @transform_10, window_bounds = array<i64: 32, 64>}, {pipeline_mode = #tpu.pipeline_mode<synchronous>, transform_indices = @transform_11, window_bounds = array<i64: 1, 64>}, {transform_indices = @transform_12, window_bounds = array<i64: 1, 16, 32>}]} {
    %c0_i32 = arith.constant 0 : i32
    %0 = arith.cmpi eq, %arg1, %c0_i32 : i32
    %1 = arith.extui %0 : i1 to i32
    %c0_i32_0 = arith.constant 0 : i32
    %2 = arith.cmpi ne, %1, %c0_i32_0 : i32
    scf.if %2 {
      %c0_62 = arith.constant 0 : index
      %c0_63 = arith.constant 0 : index
      %c0_64 = arith.constant 0 : index
      %221 = vector.load %arg3[%c0_62, %c0_63, %c0_64] : memref<1x128x32xbf16, #tpu.memory_space<vmem>>, vector<1x128x32xbf16>
      %222 = vector.shape_cast %221 : vector<1x128x32xbf16> to vector<128x32xbf16>
      %c0_65 = arith.constant 0 : index
      %c0_66 = arith.constant 0 : index
      %223 = vector.load %arg10[%c0_65, %c0_66] : memref<32x64xbf16, #tpu.memory_space<vmem>>, vector<32x64xbf16>
      %cst_67 = arith.constant dense<0.000000e+00> : vector<128x64xf32>
      %224 = tpu.matmul %222, %223, %cst_67 {dimension_numbers = #tpu.dot_dimension_numbers<[1], [0], [0], [1], [0, 0, 1, 1], [], []>} : vector<128x32xbf16>, vector<32x64xbf16>, vector<128x64xf32> -> vector<128x64xf32>
      %c0_68 = arith.constant 0 : index
      %c0_69 = arith.constant 0 : index
      %225 = vector.load %arg11[%c0_68, %c0_69] : memref<1x64xf32, #tpu.memory_space<vmem>>, vector<1x64xf32>
      %226 = vector.broadcast %225 : vector<1x64xf32> to vector<128x64xf32>
      %227 = arith.addf %224, %226 : vector<128x64xf32>
      %228 = arith.truncf %227 : vector<128x64xf32> to vector<128x64xbf16>
      %c0_70 = arith.constant 0 : index
      %c0_71 = arith.constant 0 : index
      %229 = vector.load %arg15[%c0_70, %c0_71] : memref<128x64xbf16, #tpu.memory_space<vmem>>, vector<128x64xbf16>
      tpu.vector_store %arg15[%c0_70, %c0_71], %228 {strides = array<i32>} : memref<128x64xbf16, #tpu.memory_space<vmem>>, vector<128x64xbf16>,
      %c0_72 = arith.constant 0 : index
      %c0_73 = arith.constant 0 : index
      %c0_74 = arith.constant 0 : index
      %230 = vector.load %arg4[%c0_72, %c0_73, %c0_74] : memref<1x128x32xbf16, #tpu.memory_space<vmem>>, vector<1x128x32xbf16>
      %231 = vector.shape_cast %230 : vector<1x128x32xbf16> to vector<128x32xbf16>
      %c0_75 = arith.constant 0 : index
      %c0_76 = arith.constant 0 : index
      %232 = vector.load %arg12[%c0_75, %c0_76] : memref<32x64xbf16, #tpu.memory_space<vmem>>, vector<32x64xbf16>
      %cst_77 = arith.constant dense<0.000000e+00> : vector<128x64xf32>
      %233 = tpu.matmul %231, %232, %cst_77 {dimension_numbers = #tpu.dot_dimension_numbers<[1], [0], [0], [1], [0, 0, 1, 1], [], []>} : vector<128x32xbf16>, vector<32x64xbf16>, vector<128x64xf32> -> vector<128x64xf32>
      %c0_78 = arith.constant 0 : index
      %c0_79 = arith.constant 0 : index
      %234 = vector.load %arg13[%c0_78, %c0_79] : memref<1x64xf32, #tpu.memory_space<vmem>>, vector<1x64xf32>
      %235 = vector.broadcast %234 : vector<1x64xf32> to vector<128x64xf32>
      %236 = arith.addf %233, %235 : vector<128x64xf32>
      %237 = arith.truncf %236 : vector<128x64xf32> to vector<128x64xbf16>
      %c0_80 = arith.constant 0 : index
      %c0_81 = arith.constant 0 : index
      %238 = vector.load %arg16[%c0_80, %c0_81] : memref<128x64xbf16, #tpu.memory_space<vmem>>, vector<128x64xbf16>
      tpu.vector_store %arg16[%c0_80, %c0_81], %237 {strides = array<i32>} : memref<128x64xbf16, #tpu.memory_space<vmem>>, vector<128x64xbf16>,
    } else {
    }
    %c0 = arith.constant 0 : index
    %c0_1 = arith.constant 0 : index
    %c0_2 = arith.constant 0 : index
    %3 = vector.load %arg2[%c0, %c0_1, %c0_2] : memref<1x16x32xbf16, #tpu.memory_space<vmem>>, vector<1x16x32xbf16>
    %4 = vector.shape_cast %3 : vector<1x16x32xbf16> to vector<16x32xbf16>
    %c0_3 = arith.constant 0 : index
    %c0_4 = arith.constant 0 : index
    %5 = vector.load %arg8[%c0_3, %c0_4] : memref<32x64xbf16, #tpu.memory_space<vmem>>, vector<32x64xbf16>
    %cst = arith.constant dense<0.000000e+00> : vector<16x64xf32>
    %6 = tpu.matmul %4, %5, %cst {dimension_numbers = #tpu.dot_dimension_numbers<[1], [0], [0], [1], [0, 0, 1, 1], [], []>} : vector<16x32xbf16>, vector<32x64xbf16>, vector<16x64xf32> -> vector<16x64xf32>
    %c0_5 = arith.constant 0 : index
    %c0_6 = arith.constant 0 : index
    %7 = vector.load %arg9[%c0_5, %c0_6] : memref<1x64xf32, #tpu.memory_space<vmem>>, vector<1x64xf32>
    %8 = vector.broadcast %7 : vector<1x64xf32> to vector<16x64xf32>
    %9 = arith.addf %6, %8 : vector<16x64xf32>
    %10 = arith.truncf %9 : vector<16x64xf32> to vector<16x64xbf16>
    %c0_7 = arith.constant 0 : index
    %c0_8 = arith.constant 0 : index
    %11 = vector.load %arg15[%c0_7, %c0_8] : memref<128x64xbf16, #tpu.memory_space<vmem>>, vector<128x64xbf16>
    %c0_9 = arith.constant 0 : index
    %c0_10 = arith.constant 0 : index
    %12 = vector.load %arg16[%c0_9, %c0_10] : memref<128x64xbf16, #tpu.memory_space<vmem>>, vector<128x64xbf16>
    %c0_11 = arith.constant 0 : index
    %c0_12 = arith.constant 0 : index
    %c0_13 = arith.constant 0 : index
    %13 = vector.load %arg5[%c0_11, %c0_12, %c0_13] : memref<1x16x1xf32, #tpu.memory_space<vmem>>, vector<1x16x1xf32>
    %14 = vector.shape_cast %13 : vector<1x16x1xf32> to vector<16x1xf32>
    %cst_14 = arith.constant 5.000000e-01 : f32
    %15 = vector.broadcast %cst_14 : f32 to vector<16x1xf32>
    %16 = arith.cmpf ogt, %14, %15 : vector<16x1xf32>
    %c0_15 = arith.constant 0 : index
    %c0_16 = arith.constant 0 : index
    %c0_17 = arith.constant 0 : index
    %17 = vector.load %arg6[%c0_15, %c0_16, %c0_17] : memref<1x1x128xf32, #tpu.memory_space<vmem>>, vector<1x1x128xf32>
    %18 = vector.shape_cast %17 : vector<1x1x128xf32> to vector<1x128xf32>
    %c0_18 = arith.constant 0 : index
    %c0_19 = arith.constant 0 : index
    %c0_20 = arith.constant 0 : index
    %19 = vector.load %arg7[%c0_18, %c0_19, %c0_20] : memref<1x1x128xf32, #tpu.memory_space<vmem>>, vector<1x1x128xf32>
    %20 = vector.shape_cast %19 : vector<1x1x128xf32> to vector<1x128xf32>
    %cst_21 = arith.constant -1.000000e+04 : f32
    %21 = vector.broadcast %cst_21 : f32 to vector<1x128xf32>
    %22 = arith.minimumf %18, %21 : vector<1x128xf32>
    %cst_22 = arith.constant -1.000000e+04 : f32
    %23 = vector.broadcast %cst_22 : f32 to vector<1x128xf32>
    %24 = arith.minimumf %20, %23 : vector<1x128xf32>
    %25 = vector.extract_strided_slice %10 {offsets = [0, 0], sizes = [16, 8], strides = [1, 1]} : vector<16x64xbf16> to vector<16x8xbf16>
    %26 = vector.extract_strided_slice %10 {offsets = [0, 32], sizes = [16, 8], strides = [1, 1]} : vector<16x64xbf16> to vector<16x8xbf16>
    %27 = vector.extract_strided_slice %11 {offsets = [0, 0], sizes = [128, 8], strides = [1, 1]} : vector<128x64xbf16> to vector<128x8xbf16>
    %28 = vector.extract_strided_slice %11 {offsets = [0, 32], sizes = [128, 8], strides = [1, 1]} : vector<128x64xbf16> to vector<128x8xbf16>
    %29 = vector.extract_strided_slice %12 {offsets = [0, 0], sizes = [128, 8], strides = [1, 1]} : vector<128x64xbf16> to vector<128x8xbf16>
    %30 = vector.extract_strided_slice %12 {offsets = [0, 32], sizes = [128, 8], strides = [1, 1]} : vector<128x64xbf16> to vector<128x8xbf16>
    %cst_23 = arith.constant dense<0.000000e+00> : vector<16x128xf32>
    %31 = tpu.matmul %25, %27, %cst_23 {dimension_numbers = #tpu.dot_dimension_numbers<[1], [1], [0], [0], [0, 0, 1, 0], [], []>} : vector<16x8xbf16>, vector<128x8xbf16>, vector<16x128xf32> -> vector<16x128xf32>
    %cst_24 = arith.constant dense<0.000000e+00> : vector<16x128xf32>
    %32 = tpu.matmul %26, %29, %cst_24 {dimension_numbers = #tpu.dot_dimension_numbers<[1], [1], [0], [0], [0, 0, 1, 0], [], []>} : vector<16x8xbf16>, vector<128x8xbf16>, vector<16x128xf32> -> vector<16x128xf32>
    %33 = vector.broadcast %18 : vector<1x128xf32> to vector<16x128xf32>
    %34 = arith.addf %31, %33 : vector<16x128xf32>
    %35 = vector.shape_cast %16 : vector<16x1xi1> to vector<16x1xi1>
    %36 = vector.broadcast %35 : vector<16x1xi1> to vector<16x128xi1>
    %37 = vector.shape_cast %22 : vector<1x128xf32> to vector<1x128xf32>
    %38 = vector.broadcast %37 : vector<1x128xf32> to vector<16x128xf32>
    %39 = arith.select %36, %34, %38 : vector<16x128xi1>, vector<16x128xf32>
    %40 = vector.broadcast %20 : vector<1x128xf32> to vector<16x128xf32>
    %41 = arith.addf %32, %40 : vector<16x128xf32>
    %42 = vector.shape_cast %16 : vector<16x1xi1> to vector<16x1xi1>
    %43 = vector.broadcast %42 : vector<16x1xi1> to vector<16x128xi1>
    %44 = vector.shape_cast %24 : vector<1x128xf32> to vector<1x128xf32>
    %45 = vector.broadcast %44 : vector<1x128xf32> to vector<16x128xf32>
    %46 = arith.select %43, %41, %45 : vector<16x128xi1>, vector<16x128xf32>
    %cst_25 = arith.constant dense<0xFF800000> : vector<16xf32>
    %47 = vector.multi_reduction <maximumf>, %39, %cst_25 [1] : vector<16x128xf32> to vector<16xf32>
    %48 = vector.shape_cast %47 : vector<16xf32> to vector<16x1xf32>
    %cst_26 = arith.constant dense<0xFF800000> : vector<16xf32>
    %49 = vector.multi_reduction <maximumf>, %46, %cst_26 [1] : vector<16x128xf32> to vector<16xf32>
    %50 = vector.shape_cast %49 : vector<16xf32> to vector<16x1xf32>
    %51 = arith.maximumf %48, %50 : vector<16x1xf32>
    %52 = vector.broadcast %51 : vector<16x1xf32> to vector<16x128xf32>
    %53 = arith.subf %39, %52 : vector<16x128xf32>
    %54 = math.exp %53 : vector<16x128xf32>
    %55 = vector.broadcast %51 : vector<16x1xf32> to vector<16x128xf32>
    %56 = arith.subf %46, %55 : vector<16x128xf32>
    %57 = math.exp %56 : vector<16x128xf32>
    %cst_27 = arith.constant dense<0.000000e+00> : vector<16xf32>
    %58 = vector.multi_reduction <add>, %54, %cst_27 [1] : vector<16x128xf32> to vector<16xf32>
    %59 = vector.shape_cast %58 : vector<16xf32> to vector<16x1xf32>
    %cst_28 = arith.constant dense<0.000000e+00> : vector<16xf32>
    %60 = vector.multi_reduction <add>, %57, %cst_28 [1] : vector<16x128xf32> to vector<16xf32>
    %61 = vector.shape_cast %60 : vector<16xf32> to vector<16x1xf32>
    %62 = arith.addf %59, %61 : vector<16x1xf32>
    %63 = arith.truncf %54 : vector<16x128xf32> to vector<16x128xbf16>
    %cst_29 = arith.constant dense<0.000000e+00> : vector<16x8xf32>
    %64 = tpu.matmul %63, %28, %cst_29 {dimension_numbers = #tpu.dot_dimension_numbers<[1], [0], [0], [1], [0, 0, 1, 1], [], []>} : vector<16x128xbf16>, vector<128x8xbf16>, vector<16x8xf32> -> vector<16x8xf32>
    %65 = arith.truncf %57 : vector<16x128xf32> to vector<16x128xbf16>
    %cst_30 = arith.constant dense<0.000000e+00> : vector<16x8xf32>
    %66 = tpu.matmul %65, %30, %cst_30 {dimension_numbers = #tpu.dot_dimension_numbers<[1], [0], [0], [1], [0, 0, 1, 1], [], []>} : vector<16x128xbf16>, vector<128x8xbf16>, vector<16x8xf32> -> vector<16x8xf32>
    %67 = arith.addf %64, %66 : vector<16x8xf32>
    %68 = tpu.reciprocal %62 {approx = true} : vector<16x1xf32> -> vector<16x1xf32>
    %cst_31 = arith.constant 0.353553385 : f32
    %69 = vector.broadcast %cst_31 : f32 to vector<16x1xf32>
    %70 = arith.mulf %68, %69 : vector<16x1xf32>
    %71 = vector.broadcast %70 : vector<16x1xf32> to vector<16x8xf32>
    %72 = arith.mulf %67, %71 : vector<16x8xf32>
    %73 = vector.extract_strided_slice %10 {offsets = [0, 8], sizes = [16, 8], strides = [1, 1]} : vector<16x64xbf16> to vector<16x8xbf16>
    %74 = vector.extract_strided_slice %10 {offsets = [0, 40], sizes = [16, 8], strides = [1, 1]} : vector<16x64xbf16> to vector<16x8xbf16>
    %75 = vector.extract_strided_slice %11 {offsets = [0, 8], sizes = [128, 8], strides = [1, 1]} : vector<128x64xbf16> to vector<128x8xbf16>
    %76 = vector.extract_strided_slice %11 {offsets = [0, 40], sizes = [128, 8], strides = [1, 1]} : vector<128x64xbf16> to vector<128x8xbf16>
    %77 = vector.extract_strided_slice %12 {offsets = [0, 8], sizes = [128, 8], strides = [1, 1]} : vector<128x64xbf16> to vector<128x8xbf16>
    %78 = vector.extract_strided_slice %12 {offsets = [0, 40], sizes = [128, 8], strides = [1, 1]} : vector<128x64xbf16> to vector<128x8xbf16>
    %cst_32 = arith.constant dense<0.000000e+00> : vector<16x128xf32>
    %79 = tpu.matmul %73, %75, %cst_32 {dimension_numbers = #tpu.dot_dimension_numbers<[1], [1], [0], [0], [0, 0, 1, 0], [], []>} : vector<16x8xbf16>, vector<128x8xbf16>, vector<16x128xf32> -> vector<16x128xf32>
    %cst_33 = arith.constant dense<0.000000e+00> : vector<16x128xf32>
    %80 = tpu.matmul %74, %77, %cst_33 {dimension_numbers = #tpu.dot_dimension_numbers<[1], [1], [0], [0], [0, 0, 1, 0], [], []>} : vector<16x8xbf16>, vector<128x8xbf16>, vector<16x128xf32> -> vector<16x128xf32>
    %81 = vector.broadcast %18 : vector<1x128xf32> to vector<16x128xf32>
    %82 = arith.addf %79, %81 : vector<16x128xf32>
    %83 = vector.shape_cast %16 : vector<16x1xi1> to vector<16x1xi1>
    %84 = vector.broadcast %83 : vector<16x1xi1> to vector<16x128xi1>
    %85 = vector.shape_cast %22 : vector<1x128xf32> to vector<1x128xf32>
    %86 = vector.broadcast %85 : vector<1x128xf32> to vector<16x128xf32>
    %87 = arith.select %84, %82, %86 : vector<16x128xi1>, vector<16x128xf32>
    %88 = vector.broadcast %20 : vector<1x128xf32> to vector<16x128xf32>
    %89 = arith.addf %80, %88 : vector<16x128xf32>
    %90 = vector.shape_cast %16 : vector<16x1xi1> to vector<16x1xi1>
    %91 = vector.broadcast %90 : vector<16x1xi1> to vector<16x128xi1>
    %92 = vector.shape_cast %24 : vector<1x128xf32> to vector<1x128xf32>
    %93 = vector.broadcast %92 : vector<1x128xf32> to vector<16x128xf32>
    %94 = arith.select %91, %89, %93 : vector<16x128xi1>, vector<16x128xf32>
    %cst_34 = arith.constant dense<0xFF800000> : vector<16xf32>
    %95 = vector.multi_reduction <maximumf>, %87, %cst_34 [1] : vector<16x128xf32> to vector<16xf32>
    %96 = vector.shape_cast %95 : vector<16xf32> to vector<16x1xf32>
    %cst_35 = arith.constant dense<0xFF800000> : vector<16xf32>
    %97 = vector.multi_reduction <maximumf>, %94, %cst_35 [1] : vector<16x128xf32> to vector<16xf32>
    %98 = vector.shape_cast %97 : vector<16xf32> to vector<16x1xf32>
    %99 = arith.maximumf %96, %98 : vector<16x1xf32>
    %100 = vector.broadcast %99 : vector<16x1xf32> to vector<16x128xf32>
    %101 = arith.subf %87, %100 : vector<16x128xf32>
    %102 = math.exp %101 : vector<16x128xf32>
    %103 = vector.broadcast %99 : vector<16x1xf32> to vector<16x128xf32>
    %104 = arith.subf %94, %103 : vector<16x128xf32>
    %105 = math.exp %104 : vector<16x128xf32>
    %cst_36 = arith.constant dense<0.000000e+00> : vector<16xf32>
    %106 = vector.multi_reduction <add>, %102, %cst_36 [1] : vector<16x128xf32> to vector<16xf32>
    %107 = vector.shape_cast %106 : vector<16xf32> to vector<16x1xf32>
    %cst_37 = arith.constant dense<0.000000e+00> : vector<16xf32>
    %108 = vector.multi_reduction <add>, %105, %cst_37 [1] : vector<16x128xf32> to vector<16xf32>
    %109 = vector.shape_cast %108 : vector<16xf32> to vector<16x1xf32>
    %110 = arith.addf %107, %109 : vector<16x1xf32>
    %111 = arith.truncf %102 : vector<16x128xf32> to vector<16x128xbf16>
    %cst_38 = arith.constant dense<0.000000e+00> : vector<16x8xf32>
    %112 = tpu.matmul %111, %76, %cst_38 {dimension_numbers = #tpu.dot_dimension_numbers<[1], [0], [0], [1], [0, 0, 1, 1], [], []>} : vector<16x128xbf16>, vector<128x8xbf16>, vector<16x8xf32> -> vector<16x8xf32>
    %113 = arith.truncf %105 : vector<16x128xf32> to vector<16x128xbf16>
    %cst_39 = arith.constant dense<0.000000e+00> : vector<16x8xf32>
    %114 = tpu.matmul %113, %78, %cst_39 {dimension_numbers = #tpu.dot_dimension_numbers<[1], [0], [0], [1], [0, 0, 1, 1], [], []>} : vector<16x128xbf16>, vector<128x8xbf16>, vector<16x8xf32> -> vector<16x8xf32>
    %115 = arith.addf %112, %114 : vector<16x8xf32>
    %116 = tpu.reciprocal %110 {approx = true} : vector<16x1xf32> -> vector<16x1xf32>
    %cst_40 = arith.constant 0.353553385 : f32
    %117 = vector.broadcast %cst_40 : f32 to vector<16x1xf32>
    %118 = arith.mulf %116, %117 : vector<16x1xf32>
    %119 = vector.broadcast %118 : vector<16x1xf32> to vector<16x8xf32>
    %120 = arith.mulf %115, %119 : vector<16x8xf32>
    %121 = vector.extract_strided_slice %10 {offsets = [0, 16], sizes = [16, 8], strides = [1, 1]} : vector<16x64xbf16> to vector<16x8xbf16>
    %122 = vector.extract_strided_slice %10 {offsets = [0, 48], sizes = [16, 8], strides = [1, 1]} : vector<16x64xbf16> to vector<16x8xbf16>
    %123 = vector.extract_strided_slice %11 {offsets = [0, 16], sizes = [128, 8], strides = [1, 1]} : vector<128x64xbf16> to vector<128x8xbf16>
    %124 = vector.extract_strided_slice %11 {offsets = [0, 48], sizes = [128, 8], strides = [1, 1]} : vector<128x64xbf16> to vector<128x8xbf16>
    %125 = vector.extract_strided_slice %12 {offsets = [0, 16], sizes = [128, 8], strides = [1, 1]} : vector<128x64xbf16> to vector<128x8xbf16>
    %126 = vector.extract_strided_slice %12 {offsets = [0, 48], sizes = [128, 8], strides = [1, 1]} : vector<128x64xbf16> to vector<128x8xbf16>
    %cst_41 = arith.constant dense<0.000000e+00> : vector<16x128xf32>
    %127 = tpu.matmul %121, %123, %cst_41 {dimension_numbers = #tpu.dot_dimension_numbers<[1], [1], [0], [0], [0, 0, 1, 0], [], []>} : vector<16x8xbf16>, vector<128x8xbf16>, vector<16x128xf32> -> vector<16x128xf32>
    %cst_42 = arith.constant dense<0.000000e+00> : vector<16x128xf32>
    %128 = tpu.matmul %122, %125, %cst_42 {dimension_numbers = #tpu.dot_dimension_numbers<[1], [1], [0], [0], [0, 0, 1, 0], [], []>} : vector<16x8xbf16>, vector<128x8xbf16>, vector<16x128xf32> -> vector<16x128xf32>
    %129 = vector.broadcast %18 : vector<1x128xf32> to vector<16x128xf32>
    %130 = arith.addf %127, %129 : vector<16x128xf32>
    %131 = vector.shape_cast %16 : vector<16x1xi1> to vector<16x1xi1>
    %132 = vector.broadcast %131 : vector<16x1xi1> to vector<16x128xi1>
    %133 = vector.shape_cast %22 : vector<1x128xf32> to vector<1x128xf32>
    %134 = vector.broadcast %133 : vector<1x128xf32> to vector<16x128xf32>
    %135 = arith.select %132, %130, %134 : vector<16x128xi1>, vector<16x128xf32>
    %136 = vector.broadcast %20 : vector<1x128xf32> to vector<16x128xf32>
    %137 = arith.addf %128, %136 : vector<16x128xf32>
    %138 = vector.shape_cast %16 : vector<16x1xi1> to vector<16x1xi1>
    %139 = vector.broadcast %138 : vector<16x1xi1> to vector<16x128xi1>
    %140 = vector.shape_cast %24 : vector<1x128xf32> to vector<1x128xf32>
    %141 = vector.broadcast %140 : vector<1x128xf32> to vector<16x128xf32>
    %142 = arith.select %139, %137, %141 : vector<16x128xi1>, vector<16x128xf32>
    %cst_43 = arith.constant dense<0xFF800000> : vector<16xf32>
    %143 = vector.multi_reduction <maximumf>, %135, %cst_43 [1] : vector<16x128xf32> to vector<16xf32>
    %144 = vector.shape_cast %143 : vector<16xf32> to vector<16x1xf32>
    %cst_44 = arith.constant dense<0xFF800000> : vector<16xf32>
    %145 = vector.multi_reduction <maximumf>, %142, %cst_44 [1] : vector<16x128xf32> to vector<16xf32>
    %146 = vector.shape_cast %145 : vector<16xf32> to vector<16x1xf32>
    %147 = arith.maximumf %144, %146 : vector<16x1xf32>
    %148 = vector.broadcast %147 : vector<16x1xf32> to vector<16x128xf32>
    %149 = arith.subf %135, %148 : vector<16x128xf32>
    %150 = math.exp %149 : vector<16x128xf32>
    %151 = vector.broadcast %147 : vector<16x1xf32> to vector<16x128xf32>
    %152 = arith.subf %142, %151 : vector<16x128xf32>
    %153 = math.exp %152 : vector<16x128xf32>
    %cst_45 = arith.constant dense<0.000000e+00> : vector<16xf32>
    %154 = vector.multi_reduction <add>, %150, %cst_45 [1] : vector<16x128xf32> to vector<16xf32>
    %155 = vector.shape_cast %154 : vector<16xf32> to vector<16x1xf32>
    %cst_46 = arith.constant dense<0.000000e+00> : vector<16xf32>
    %156 = vector.multi_reduction <add>, %153, %cst_46 [1] : vector<16x128xf32> to vector<16xf32>
    %157 = vector.shape_cast %156 : vector<16xf32> to vector<16x1xf32>
    %158 = arith.addf %155, %157 : vector<16x1xf32>
    %159 = arith.truncf %150 : vector<16x128xf32> to vector<16x128xbf16>
    %cst_47 = arith.constant dense<0.000000e+00> : vector<16x8xf32>
    %160 = tpu.matmul %159, %124, %cst_47 {dimension_numbers = #tpu.dot_dimension_numbers<[1], [0], [0], [1], [0, 0, 1, 1], [], []>} : vector<16x128xbf16>, vector<128x8xbf16>, vector<16x8xf32> -> vector<16x8xf32>
    %161 = arith.truncf %153 : vector<16x128xf32> to vector<16x128xbf16>
    %cst_48 = arith.constant dense<0.000000e+00> : vector<16x8xf32>
    %162 = tpu.matmul %161, %126, %cst_48 {dimension_numbers = #tpu.dot_dimension_numbers<[1], [0], [0], [1], [0, 0, 1, 1], [], []>} : vector<16x128xbf16>, vector<128x8xbf16>, vector<16x8xf32> -> vector<16x8xf32>
    %163 = arith.addf %160, %162 : vector<16x8xf32>
    %164 = tpu.reciprocal %158 {approx = true} : vector<16x1xf32> -> vector<16x1xf32>
    %cst_49 = arith.constant 0.353553385 : f32
    %165 = vector.broadcast %cst_49 : f32 to vector<16x1xf32>
    %166 = arith.mulf %164, %165 : vector<16x1xf32>
    %167 = vector.broadcast %166 : vector<16x1xf32> to vector<16x8xf32>
    %168 = arith.mulf %163, %167 : vector<16x8xf32>
    %169 = vector.extract_strided_slice %10 {offsets = [0, 24], sizes = [16, 8], strides = [1, 1]} : vector<16x64xbf16> to vector<16x8xbf16>
    %170 = vector.extract_strided_slice %10 {offsets = [0, 56], sizes = [16, 8], strides = [1, 1]} : vector<16x64xbf16> to vector<16x8xbf16>
    %171 = vector.extract_strided_slice %11 {offsets = [0, 24], sizes = [128, 8], strides = [1, 1]} : vector<128x64xbf16> to vector<128x8xbf16>
    %172 = vector.extract_strided_slice %11 {offsets = [0, 56], sizes = [128, 8], strides = [1, 1]} : vector<128x64xbf16> to vector<128x8xbf16>
    %173 = vector.extract_strided_slice %12 {offsets = [0, 24], sizes = [128, 8], strides = [1, 1]} : vector<128x64xbf16> to vector<128x8xbf16>
    %174 = vector.extract_strided_slice %12 {offsets = [0, 56], sizes = [128, 8], strides = [1, 1]} : vector<128x64xbf16> to vector<128x8xbf16>
    %cst_50 = arith.constant dense<0.000000e+00> : vector<16x128xf32>
    %175 = tpu.matmul %169, %171, %cst_50 {dimension_numbers = #tpu.dot_dimension_numbers<[1], [1], [0], [0], [0, 0, 1, 0], [], []>} : vector<16x8xbf16>, vector<128x8xbf16>, vector<16x128xf32> -> vector<16x128xf32>
    %cst_51 = arith.constant dense<0.000000e+00> : vector<16x128xf32>
    %176 = tpu.matmul %170, %173, %cst_51 {dimension_numbers = #tpu.dot_dimension_numbers<[1], [1], [0], [0], [0, 0, 1, 0], [], []>} : vector<16x8xbf16>, vector<128x8xbf16>, vector<16x128xf32> -> vector<16x128xf32>
    %177 = vector.broadcast %18 : vector<1x128xf32> to vector<16x128xf32>
    %178 = arith.addf %175, %177 : vector<16x128xf32>
    %179 = vector.shape_cast %16 : vector<16x1xi1> to vector<16x1xi1>
    %180 = vector.broadcast %179 : vector<16x1xi1> to vector<16x128xi1>
    %181 = vector.shape_cast %22 : vector<1x128xf32> to vector<1x128xf32>
    %182 = vector.broadcast %181 : vector<1x128xf32> to vector<16x128xf32>
    %183 = arith.select %180, %178, %182 : vector<16x128xi1>, vector<16x128xf32>
    %184 = vector.broadcast %20 : vector<1x128xf32> to vector<16x128xf32>
    %185 = arith.addf %176, %184 : vector<16x128xf32>
    %186 = vector.shape_cast %16 : vector<16x1xi1> to vector<16x1xi1>
    %187 = vector.broadcast %186 : vector<16x1xi1> to vector<16x128xi1>
    %188 = vector.shape_cast %24 : vector<1x128xf32> to vector<1x128xf32>
    %189 = vector.broadcast %188 : vector<1x128xf32> to vector<16x128xf32>
    %190 = arith.select %187, %185, %189 : vector<16x128xi1>, vector<16x128xf32>
    %cst_52 = arith.constant dense<0xFF800000> : vector<16xf32>
    %191 = vector.multi_reduction <maximumf>, %183, %cst_52 [1] : vector<16x128xf32> to vector<16xf32>
    %192 = vector.shape_cast %191 : vector<16xf32> to vector<16x1xf32>
    %cst_53 = arith.constant dense<0xFF800000> : vector<16xf32>
    %193 = vector.multi_reduction <maximumf>, %190, %cst_53 [1] : vector<16x128xf32> to vector<16xf32>
    %194 = vector.shape_cast %193 : vector<16xf32> to vector<16x1xf32>
    %195 = arith.maximumf %192, %194 : vector<16x1xf32>
    %196 = vector.broadcast %195 : vector<16x1xf32> to vector<16x128xf32>
    %197 = arith.subf %183, %196 : vector<16x128xf32>
    %198 = math.exp %197 : vector<16x128xf32>
    %199 = vector.broadcast %195 : vector<16x1xf32> to vector<16x128xf32>
    %200 = arith.subf %190, %199 : vector<16x128xf32>
    %201 = math.exp %200 : vector<16x128xf32>
    %cst_54 = arith.constant dense<0.000000e+00> : vector<16xf32>
    %202 = vector.multi_reduction <add>, %198, %cst_54 [1] : vector<16x128xf32> to vector<16xf32>
    %203 = vector.shape_cast %202 : vector<16xf32> to vector<16x1xf32>
    %cst_55 = arith.constant dense<0.000000e+00> : vector<16xf32>
    %204 = vector.multi_reduction <add>, %201, %cst_55 [1] : vector<16x128xf32> to vector<16xf32>
    %205 = vector.shape_cast %204 : vector<16xf32> to vector<16x1xf32>
    %206 = arith.addf %203, %205 : vector<16x1xf32>
    %207 = arith.truncf %198 : vector<16x128xf32> to vector<16x128xbf16>
    %cst_56 = arith.constant dense<0.000000e+00> : vector<16x8xf32>
    %208 = tpu.matmul %207, %172, %cst_56 {dimension_numbers = #tpu.dot_dimension_numbers<[1], [0], [0], [1], [0, 0, 1, 1], [], []>} : vector<16x128xbf16>, vector<128x8xbf16>, vector<16x8xf32> -> vector<16x8xf32>
    %209 = arith.truncf %201 : vector<16x128xf32> to vector<16x128xbf16>
    %cst_57 = arith.constant dense<0.000000e+00> : vector<16x8xf32>
    %210 = tpu.matmul %209, %174, %cst_57 {dimension_numbers = #tpu.dot_dimension_numbers<[1], [0], [0], [1], [0, 0, 1, 1], [], []>} : vector<16x128xbf16>, vector<128x8xbf16>, vector<16x8xf32> -> vector<16x8xf32>
    %211 = arith.addf %208, %210 : vector<16x8xf32>
    %212 = tpu.reciprocal %206 {approx = true} : vector<16x1xf32> -> vector<16x1xf32>
    %cst_58 = arith.constant 0.353553385 : f32
    %213 = vector.broadcast %cst_58 : f32 to vector<16x1xf32>
    %214 = arith.mulf %212, %213 : vector<16x1xf32>
    %215 = vector.broadcast %214 : vector<16x1xf32> to vector<16x8xf32>
    %216 = arith.mulf %211, %215 : vector<16x8xf32>
    %217 = tpu.concatenate %72, %120, %168, %216 in 1 : vector<16x8xf32>, vector<16x8xf32>, vector<16x8xf32>, vector<16x8xf32> -> vector<16x32xf32>
    %c0_59 = arith.constant 0 : index
    %c0_60 = arith.constant 0 : index
    %c0_61 = arith.constant 0 : index
    %218 = vector.load %arg14[%c0_59, %c0_60, %c0_61] : memref<1x16x32xf32, #tpu.memory_space<vmem>>, vector<1x16x32xf32>
    %219 = vector.shape_cast %218 : vector<1x16x32xf32> to vector<16x32xf32>
    %220 = vector.shape_cast %217 : vector<16x32xf32> to vector<1x16x32xf32>
    tpu.vector_store %arg14[%c0_59, %c0_60, %c0_61], %220 {strides = array<i32>} : memref<1x16x32xf32, #tpu.memory_space<vmem>>, vector<1x16x32xf32>,
    return
  }
  func.func @transform_0(%arg0: i32, %arg1: i32) -> (i32, i32, i32) {
    %c0_i32 = arith.constant 0 : i32
    %c0_i32_0 = arith.constant 0 : i32
    return %arg0, %arg1, %c0_i32 : i32, i32, i32
  }
  func.func @transform_1(%arg0: i32, %arg1: i32) -> (i32, i32, i32) {
    %c0_i32 = arith.constant 0 : i32
    %c0_i32_0 = arith.constant 0 : i32
    %c0_i32_1 = arith.constant 0 : i32
    return %arg0, %c0_i32, %c0_i32_0 : i32, i32, i32
  }
  func.func @transform_2(%arg0: i32, %arg1: i32) -> (i32, i32, i32) {
    %c0_i32 = arith.constant 0 : i32
    %c0_i32_0 = arith.constant 0 : i32
    %c0_i32_1 = arith.constant 0 : i32
    return %arg0, %c0_i32, %c0_i32_0 : i32, i32, i32
  }
  func.func @transform_3(%arg0: i32, %arg1: i32) -> (i32, i32, i32) {
    %c0_i32 = arith.constant 0 : i32
    %c0_i32_0 = arith.constant 0 : i32
    return %arg0, %arg1, %c0_i32 : i32, i32, i32
  }
  func.func @transform_4(%arg0: i32, %arg1: i32) -> (i32, i32, i32) {
    %c0_i32 = arith.constant 0 : i32
    %c0_i32_0 = arith.constant 0 : i32
    %c0_i32_1 = arith.constant 0 : i32
    return %arg0, %c0_i32, %c0_i32_0 : i32, i32, i32
  }
  func.func @transform_5(%arg0: i32, %arg1: i32) -> (i32, i32, i32) {
    %c0_i32 = arith.constant 0 : i32
    %c0_i32_0 = arith.constant 0 : i32
    %c0_i32_1 = arith.constant 0 : i32
    return %arg0, %c0_i32, %c0_i32_0 : i32, i32, i32
  }
  func.func @transform_6(%arg0: i32, %arg1: i32) -> (i32, i32) {
    %c0_i32 = arith.constant 0 : i32
    %c0_i32_0 = arith.constant 0 : i32
    %c0_i32_1 = arith.constant 0 : i32
    return %c0_i32, %c0_i32_0 : i32, i32
  }
  func.func @transform_7(%arg0: i32, %arg1: i32) -> (i32, i32) {
    %c0_i32 = arith.constant 0 : i32
    %c0_i32_0 = arith.constant 0 : i32
    %c0_i32_1 = arith.constant 0 : i32
    return %c0_i32, %c0_i32_0 : i32, i32
  }
  func.func @transform_8(%arg0: i32, %arg1: i32) -> (i32, i32) {
    %c0_i32 = arith.constant 0 : i32
    %c0_i32_0 = arith.constant 0 : i32
    %c0_i32_1 = arith.constant 0 : i32
    return %c0_i32, %c0_i32_0 : i32, i32
  }
  func.func @transform_9(%arg0: i32, %arg1: i32) -> (i32, i32) {
    %c0_i32 = arith.constant 0 : i32
    %c0_i32_0 = arith.constant 0 : i32
    %c0_i32_1 = arith.constant 0 : i32
    return %c0_i32, %c0_i32_0 : i32, i32
  }
  func.func @transform_10(%arg0: i32, %arg1: i32) -> (i32, i32) {
    %c0_i32 = arith.constant 0 : i32
    %c0_i32_0 = arith.constant 0 : i32
    %c0_i32_1 = arith.constant 0 : i32
    return %c0_i32, %c0_i32_0 : i32, i32
  }
  func.func @transform_11(%arg0: i32, %arg1: i32) -> (i32, i32) {
    %c0_i32 = arith.constant 0 : i32
    %c0_i32_0 = arith.constant 0 : i32
    %c0_i32_1 = arith.constant 0 : i32
    return %c0_i32, %c0_i32_0 : i32, i32
  }
  func.func @transform_12(%arg0: i32, %arg1: i32) -> (i32, i32, i32) {
    %c0_i32 = arith.constant 0 : i32
    %c0_i32_0 = arith.constant 0 : i32
    return %arg0, %arg1, %c0_i32 : i32, i32, i32
  }
}

module attributes {stable_mosaic.version = 11 : i64} {
  func.func @_branch_kernel(%arg0: i32, %arg1: i32, %arg2: memref<1x16x32xbf16, #tpu.memory_space<vmem>>, %arg3: memref<1x128x32xbf16, #tpu.memory_space<vmem>>, %arg4: memref<1x128x32xbf16, #tpu.memory_space<vmem>>, %arg5: memref<1x16x1xf32, #tpu.memory_space<vmem>>, %arg6: memref<1x1x128xf32, #tpu.memory_space<vmem>>, %arg7: memref<1x1x128xf32, #tpu.memory_space<vmem>>, %arg8: memref<32x64xbf16, #tpu.memory_space<vmem>>, %arg9: memref<1x64xf32, #tpu.memory_space<vmem>>, %arg10: memref<32x64xbf16, #tpu.memory_space<vmem>>, %arg11: memref<1x64xf32, #tpu.memory_space<vmem>>, %arg12: memref<32x64xbf16, #tpu.memory_space<vmem>>, %arg13: memref<1x64xf32, #tpu.memory_space<vmem>>, %arg14: memref<1x16x32xf32, #tpu.memory_space<vmem>>, %arg15: memref<128x64xbf16, #tpu.memory_space<vmem>>, %arg16: memref<128x64xbf16, #tpu.memory_space<vmem>>) attributes {dimension_semantics = [#tpu.dimension_semantics<parallel>, #tpu.dimension_semantics<arbitrary>], iteration_bounds = array<i64: 2, 1>, scalar_prefetch = 0 : i64, scratch_operands = 2 : i64, tpu.core_type = #tpu.core_type<tc>, window_params = [{transform_indices = @transform_0, window_bounds = array<i64: 1, 16, 32>}, {transform_indices = @transform_1, window_bounds = array<i64: 1, 128, 32>}, {transform_indices = @transform_2, window_bounds = array<i64: 1, 128, 32>}, {transform_indices = @transform_3, window_bounds = array<i64: 1, 16, 1>}, {transform_indices = @transform_4, window_bounds = array<i64: 1, 1, 128>}, {transform_indices = @transform_5, window_bounds = array<i64: 1, 1, 128>}, {pipeline_mode = #tpu.pipeline_mode<synchronous>, transform_indices = @transform_6, window_bounds = array<i64: 32, 64>}, {pipeline_mode = #tpu.pipeline_mode<synchronous>, transform_indices = @transform_7, window_bounds = array<i64: 1, 64>}, {pipeline_mode = #tpu.pipeline_mode<synchronous>, transform_indices = @transform_8, window_bounds = array<i64: 32, 64>}, {pipeline_mode = #tpu.pipeline_mode<synchronous>, transform_indices = @transform_9, window_bounds = array<i64: 1, 64>}, {pipeline_mode = #tpu.pipeline_mode<synchronous>, transform_indices = @transform_10, window_bounds = array<i64: 32, 64>}, {pipeline_mode = #tpu.pipeline_mode<synchronous>, transform_indices = @transform_11, window_bounds = array<i64: 1, 64>}, {transform_indices = @transform_12, window_bounds = array<i64: 1, 16, 32>}]} {
    %c0_i32 = arith.constant 0 : i32
    %0 = arith.cmpi eq, %arg1, %c0_i32 : i32
    %1 = arith.extui %0 : i1 to i32
    %c0_i32_0 = arith.constant 0 : i32
    %2 = arith.cmpi ne, %1, %c0_i32_0 : i32
    scf.if %2 {
      %c0_62 = arith.constant 0 : index
      %c0_63 = arith.constant 0 : index
      %c0_64 = arith.constant 0 : index
      %221 = vector.load %arg3[%c0_62, %c0_63, %c0_64] : memref<1x128x32xbf16, #tpu.memory_space<vmem>>, vector<1x128x32xbf16>
      %222 = vector.shape_cast %221 : vector<1x128x32xbf16> to vector<128x32xbf16>
      %c0_65 = arith.constant 0 : index
      %c0_66 = arith.constant 0 : index
      %223 = vector.load %arg10[%c0_65, %c0_66] : memref<32x64xbf16, #tpu.memory_space<vmem>>, vector<32x64xbf16>
      %cst_67 = arith.constant dense<0.000000e+00> : vector<128x64xf32>
      %224 = tpu.matmul %222, %223, %cst_67 {dimension_numbers = #tpu.dot_dimension_numbers<[1], [0], [0], [1], [0, 0, 1, 1], [], []>} : vector<128x32xbf16>, vector<32x64xbf16>, vector<128x64xf32> -> vector<128x64xf32>
      %c0_68 = arith.constant 0 : index
      %c0_69 = arith.constant 0 : index
      %225 = vector.load %arg11[%c0_68, %c0_69] : memref<1x64xf32, #tpu.memory_space<vmem>>, vector<1x64xf32>
      %226 = vector.broadcast %225 : vector<1x64xf32> to vector<128x64xf32>
      %227 = arith.addf %224, %226 : vector<128x64xf32>
      %228 = arith.truncf %227 : vector<128x64xf32> to vector<128x64xbf16>
      %c0_70 = arith.constant 0 : index
      %c0_71 = arith.constant 0 : index
      %229 = vector.load %arg15[%c0_70, %c0_71] : memref<128x64xbf16, #tpu.memory_space<vmem>>, vector<128x64xbf16>
      tpu.vector_store %arg15[%c0_70, %c0_71], %228 {strides = array<i32>} : memref<128x64xbf16, #tpu.memory_space<vmem>>, vector<128x64xbf16>,
      %c0_72 = arith.constant 0 : index
      %c0_73 = arith.constant 0 : index
      %c0_74 = arith.constant 0 : index
      %230 = vector.load %arg4[%c0_72, %c0_73, %c0_74] : memref<1x128x32xbf16, #tpu.memory_space<vmem>>, vector<1x128x32xbf16>
      %231 = vector.shape_cast %230 : vector<1x128x32xbf16> to vector<128x32xbf16>
      %c0_75 = arith.constant 0 : index
      %c0_76 = arith.constant 0 : index
      %232 = vector.load %arg12[%c0_75, %c0_76] : memref<32x64xbf16, #tpu.memory_space<vmem>>, vector<32x64xbf16>
      %cst_77 = arith.constant dense<0.000000e+00> : vector<128x64xf32>
      %233 = tpu.matmul %231, %232, %cst_77 {dimension_numbers = #tpu.dot_dimension_numbers<[1], [0], [0], [1], [0, 0, 1, 1], [], []>} : vector<128x32xbf16>, vector<32x64xbf16>, vector<128x64xf32> -> vector<128x64xf32>
      %c0_78 = arith.constant 0 : index
      %c0_79 = arith.constant 0 : index
      %234 = vector.load %arg13[%c0_78, %c0_79] : memref<1x64xf32, #tpu.memory_space<vmem>>, vector<1x64xf32>
      %235 = vector.broadcast %234 : vector<1x64xf32> to vector<128x64xf32>
      %236 = arith.addf %233, %235 : vector<128x64xf32>
      %237 = arith.truncf %236 : vector<128x64xf32> to vector<128x64xbf16>
      %c0_80 = arith.constant 0 : index
      %c0_81 = arith.constant 0 : index
      %238 = vector.load %arg16[%c0_80, %c0_81] : memref<128x64xbf16, #tpu.memory_space<vmem>>, vector<128x64xbf16>
      tpu.vector_store %arg16[%c0_80, %c0_81], %237 {strides = array<i32>} : memref<128x64xbf16, #tpu.memory_space<vmem>>, vector<128x64xbf16>,
    } else {
    }
    %c0 = arith.constant 0 : index
    %c0_1 = arith.constant 0 : index
    %c0_2 = arith.constant 0 : index
    %3 = vector.load %arg2[%c0, %c0_1, %c0_2] : memref<1x16x32xbf16, #tpu.memory_space<vmem>>, vector<1x16x32xbf16>
    %4 = vector.shape_cast %3 : vector<1x16x32xbf16> to vector<16x32xbf16>
    %c0_3 = arith.constant 0 : index
    %c0_4 = arith.constant 0 : index
    %5 = vector.load %arg8[%c0_3, %c0_4] : memref<32x64xbf16, #tpu.memory_space<vmem>>, vector<32x64xbf16>
    %cst = arith.constant dense<0.000000e+00> : vector<16x64xf32>
    %6 = tpu.matmul %4, %5, %cst {dimension_numbers = #tpu.dot_dimension_numbers<[1], [0], [0], [1], [0, 0, 1, 1], [], []>} : vector<16x32xbf16>, vector<32x64xbf16>, vector<16x64xf32> -> vector<16x64xf32>
    %c0_5 = arith.constant 0 : index
    %c0_6 = arith.constant 0 : index
    %7 = vector.load %arg9[%c0_5, %c0_6] : memref<1x64xf32, #tpu.memory_space<vmem>>, vector<1x64xf32>
    %8 = vector.broadcast %7 : vector<1x64xf32> to vector<16x64xf32>
    %9 = arith.addf %6, %8 : vector<16x64xf32>
    %10 = arith.truncf %9 : vector<16x64xf32> to vector<16x64xbf16>
    %c0_7 = arith.constant 0 : index
    %c0_8 = arith.constant 0 : index
    %11 = vector.load %arg15[%c0_7, %c0_8] : memref<128x64xbf16, #tpu.memory_space<vmem>>, vector<128x64xbf16>
    %c0_9 = arith.constant 0 : index
    %c0_10 = arith.constant 0 : index
    %12 = vector.load %arg16[%c0_9, %c0_10] : memref<128x64xbf16, #tpu.memory_space<vmem>>, vector<128x64xbf16>
    %c0_11 = arith.constant 0 : index
    %c0_12 = arith.constant 0 : index
    %c0_13 = arith.constant 0 : index
    %13 = vector.load %arg5[%c0_11, %c0_12, %c0_13] : memref<1x16x1xf32, #tpu.memory_space<vmem>>, vector<1x16x1xf32>
    %14 = vector.shape_cast %13 : vector<1x16x1xf32> to vector<16x1xf32>
    %cst_14 = arith.constant 5.000000e-01 : f32
    %15 = vector.broadcast %cst_14 : f32 to vector<16x1xf32>
    %16 = arith.cmpf ogt, %14, %15 : vector<16x1xf32>
    %c0_15 = arith.constant 0 : index
    %c0_16 = arith.constant 0 : index
    %c0_17 = arith.constant 0 : index
    %17 = vector.load %arg6[%c0_15, %c0_16, %c0_17] : memref<1x1x128xf32, #tpu.memory_space<vmem>>, vector<1x1x128xf32>
    %18 = vector.shape_cast %17 : vector<1x1x128xf32> to vector<1x128xf32>
    %c0_18 = arith.constant 0 : index
    %c0_19 = arith.constant 0 : index
    %c0_20 = arith.constant 0 : index
    %19 = vector.load %arg7[%c0_18, %c0_19, %c0_20] : memref<1x1x128xf32, #tpu.memory_space<vmem>>, vector<1x1x128xf32>
    %20 = vector.shape_cast %19 : vector<1x1x128xf32> to vector<1x128xf32>
    %cst_21 = arith.constant -1.000000e+04 : f32
    %21 = vector.broadcast %cst_21 : f32 to vector<1x128xf32>
    %22 = arith.minimumf %18, %21 : vector<1x128xf32>
    %cst_22 = arith.constant -1.000000e+04 : f32
    %23 = vector.broadcast %cst_22 : f32 to vector<1x128xf32>
    %24 = arith.minimumf %20, %23 : vector<1x128xf32>
    %25 = vector.extract_strided_slice %10 {offsets = [0, 0], sizes = [16, 8], strides = [1, 1]} : vector<16x64xbf16> to vector<16x8xbf16>
    %26 = vector.extract_strided_slice %10 {offsets = [0, 32], sizes = [16, 8], strides = [1, 1]} : vector<16x64xbf16> to vector<16x8xbf16>
    %27 = vector.extract_strided_slice %11 {offsets = [0, 0], sizes = [128, 8], strides = [1, 1]} : vector<128x64xbf16> to vector<128x8xbf16>
    %28 = vector.extract_strided_slice %11 {offsets = [0, 32], sizes = [128, 8], strides = [1, 1]} : vector<128x64xbf16> to vector<128x8xbf16>
    %29 = vector.extract_strided_slice %12 {offsets = [0, 0], sizes = [128, 8], strides = [1, 1]} : vector<128x64xbf16> to vector<128x8xbf16>
    %30 = vector.extract_strided_slice %12 {offsets = [0, 32], sizes = [128, 8], strides = [1, 1]} : vector<128x64xbf16> to vector<128x8xbf16>
    %cst_23 = arith.constant dense<0.000000e+00> : vector<16x128xf32>
    %31 = tpu.matmul %25, %27, %cst_23 {dimension_numbers = #tpu.dot_dimension_numbers<[1], [1], [0], [0], [0, 0, 1, 0], [], []>} : vector<16x8xbf16>, vector<128x8xbf16>, vector<16x128xf32> -> vector<16x128xf32>
    %cst_24 = arith.constant dense<0.000000e+00> : vector<16x128xf32>
    %32 = tpu.matmul %26, %29, %cst_24 {dimension_numbers = #tpu.dot_dimension_numbers<[1], [1], [0], [0], [0, 0, 1, 0], [], []>} : vector<16x8xbf16>, vector<128x8xbf16>, vector<16x128xf32> -> vector<16x128xf32>
    %33 = vector.broadcast %18 : vector<1x128xf32> to vector<16x128xf32>
    %34 = arith.addf %31, %33 : vector<16x128xf32>
    %35 = vector.shape_cast %16 : vector<16x1xi1> to vector<16x1xi1>
    %36 = vector.broadcast %35 : vector<16x1xi1> to vector<16x128xi1>
    %37 = vector.shape_cast %22 : vector<1x128xf32> to vector<1x128xf32>
    %38 = vector.broadcast %37 : vector<1x128xf32> to vector<16x128xf32>
    %39 = arith.select %36, %34, %38 : vector<16x128xi1>, vector<16x128xf32>
    %40 = vector.broadcast %20 : vector<1x128xf32> to vector<16x128xf32>
    %41 = arith.addf %32, %40 : vector<16x128xf32>
    %42 = vector.shape_cast %16 : vector<16x1xi1> to vector<16x1xi1>
    %43 = vector.broadcast %42 : vector<16x1xi1> to vector<16x128xi1>
    %44 = vector.shape_cast %24 : vector<1x128xf32> to vector<1x128xf32>
    %45 = vector.broadcast %44 : vector<1x128xf32> to vector<16x128xf32>
    %46 = arith.select %43, %41, %45 : vector<16x128xi1>, vector<16x128xf32>
    %cst_25 = arith.constant dense<0xFF800000> : vector<16xf32>
    %47 = vector.multi_reduction <maximumf>, %39, %cst_25 [1] : vector<16x128xf32> to vector<16xf32>
    %48 = vector.shape_cast %47 : vector<16xf32> to vector<16x1xf32>
    %cst_26 = arith.constant dense<0xFF800000> : vector<16xf32>
    %49 = vector.multi_reduction <maximumf>, %46, %cst_26 [1] : vector<16x128xf32> to vector<16xf32>
    %50 = vector.shape_cast %49 : vector<16xf32> to vector<16x1xf32>
    %51 = arith.maximumf %48, %50 : vector<16x1xf32>
    %52 = vector.broadcast %51 : vector<16x1xf32> to vector<16x128xf32>
    %53 = arith.subf %39, %52 : vector<16x128xf32>
    %54 = math.exp %53 : vector<16x128xf32>
    %55 = vector.broadcast %51 : vector<16x1xf32> to vector<16x128xf32>
    %56 = arith.subf %46, %55 : vector<16x128xf32>
    %57 = math.exp %56 : vector<16x128xf32>
    %cst_27 = arith.constant dense<0.000000e+00> : vector<16xf32>
    %58 = vector.multi_reduction <add>, %54, %cst_27 [1] : vector<16x128xf32> to vector<16xf32>
    %59 = vector.shape_cast %58 : vector<16xf32> to vector<16x1xf32>
    %cst_28 = arith.constant dense<0.000000e+00> : vector<16xf32>
    %60 = vector.multi_reduction <add>, %57, %cst_28 [1] : vector<16x128xf32> to vector<16xf32>
    %61 = vector.shape_cast %60 : vector<16xf32> to vector<16x1xf32>
    %62 = arith.addf %59, %61 : vector<16x1xf32>
    %63 = arith.truncf %54 : vector<16x128xf32> to vector<16x128xbf16>
    %cst_29 = arith.constant dense<0.000000e+00> : vector<16x8xf32>
    %64 = tpu.matmul %63, %28, %cst_29 {dimension_numbers = #tpu.dot_dimension_numbers<[1], [0], [0], [1], [0, 0, 1, 1], [], []>} : vector<16x128xbf16>, vector<128x8xbf16>, vector<16x8xf32> -> vector<16x8xf32>
    %65 = arith.truncf %57 : vector<16x128xf32> to vector<16x128xbf16>
    %cst_30 = arith.constant dense<0.000000e+00> : vector<16x8xf32>
    %66 = tpu.matmul %65, %30, %cst_30 {dimension_numbers = #tpu.dot_dimension_numbers<[1], [0], [0], [1], [0, 0, 1, 1], [], []>} : vector<16x128xbf16>, vector<128x8xbf16>, vector<16x8xf32> -> vector<16x8xf32>
    %67 = arith.addf %64, %66 : vector<16x8xf32>
    %68 = tpu.reciprocal %62 {approx = true} : vector<16x1xf32> -> vector<16x1xf32>
    %cst_31 = arith.constant 0.353553385 : f32
    %69 = vector.broadcast %cst_31 : f32 to vector<16x1xf32>
    %70 = arith.mulf %68, %69 : vector<16x1xf32>
    %71 = vector.broadcast %70 : vector<16x1xf32> to vector<16x8xf32>
    %72 = arith.mulf %67, %71 : vector<16x8xf32>
    %73 = vector.extract_strided_slice %10 {offsets = [0, 8], sizes = [16, 8], strides = [1, 1]} : vector<16x64xbf16> to vector<16x8xbf16>
    %74 = vector.extract_strided_slice %10 {offsets = [0, 40], sizes = [16, 8], strides = [1, 1]} : vector<16x64xbf16> to vector<16x8xbf16>
    %75 = vector.extract_strided_slice %11 {offsets = [0, 8], sizes = [128, 8], strides = [1, 1]} : vector<128x64xbf16> to vector<128x8xbf16>
    %76 = vector.extract_strided_slice %11 {offsets = [0, 40], sizes = [128, 8], strides = [1, 1]} : vector<128x64xbf16> to vector<128x8xbf16>
    %77 = vector.extract_strided_slice %12 {offsets = [0, 8], sizes = [128, 8], strides = [1, 1]} : vector<128x64xbf16> to vector<128x8xbf16>
    %78 = vector.extract_strided_slice %12 {offsets = [0, 40], sizes = [128, 8], strides = [1, 1]} : vector<128x64xbf16> to vector<128x8xbf16>
    %cst_32 = arith.constant dense<0.000000e+00> : vector<16x128xf32>
    %79 = tpu.matmul %73, %75, %cst_32 {dimension_numbers = #tpu.dot_dimension_numbers<[1], [1], [0], [0], [0, 0, 1, 0], [], []>} : vector<16x8xbf16>, vector<128x8xbf16>, vector<16x128xf32> -> vector<16x128xf32>
    %cst_33 = arith.constant dense<0.000000e+00> : vector<16x128xf32>
    %80 = tpu.matmul %74, %77, %cst_33 {dimension_numbers = #tpu.dot_dimension_numbers<[1], [1], [0], [0], [0, 0, 1, 0], [], []>} : vector<16x8xbf16>, vector<128x8xbf16>, vector<16x128xf32> -> vector<16x128xf32>
    %81 = vector.broadcast %18 : vector<1x128xf32> to vector<16x128xf32>
    %82 = arith.addf %79, %81 : vector<16x128xf32>
    %83 = vector.shape_cast %16 : vector<16x1xi1> to vector<16x1xi1>
    %84 = vector.broadcast %83 : vector<16x1xi1> to vector<16x128xi1>
    %85 = vector.shape_cast %22 : vector<1x128xf32> to vector<1x128xf32>
    %86 = vector.broadcast %85 : vector<1x128xf32> to vector<16x128xf32>
    %87 = arith.select %84, %82, %86 : vector<16x128xi1>, vector<16x128xf32>
    %88 = vector.broadcast %20 : vector<1x128xf32> to vector<16x128xf32>
    %89 = arith.addf %80, %88 : vector<16x128xf32>
    %90 = vector.shape_cast %16 : vector<16x1xi1> to vector<16x1xi1>
    %91 = vector.broadcast %90 : vector<16x1xi1> to vector<16x128xi1>
    %92 = vector.shape_cast %24 : vector<1x128xf32> to vector<1x128xf32>
    %93 = vector.broadcast %92 : vector<1x128xf32> to vector<16x128xf32>
    %94 = arith.select %91, %89, %93 : vector<16x128xi1>, vector<16x128xf32>
    %cst_34 = arith.constant dense<0xFF800000> : vector<16xf32>
    %95 = vector.multi_reduction <maximumf>, %87, %cst_34 [1] : vector<16x128xf32> to vector<16xf32>
    %96 = vector.shape_cast %95 : vector<16xf32> to vector<16x1xf32>
    %cst_35 = arith.constant dense<0xFF800000> : vector<16xf32>
    %97 = vector.multi_reduction <maximumf>, %94, %cst_35 [1] : vector<16x128xf32> to vector<16xf32>
    %98 = vector.shape_cast %97 : vector<16xf32> to vector<16x1xf32>
    %99 = arith.maximumf %96, %98 : vector<16x1xf32>
    %100 = vector.broadcast %99 : vector<16x1xf32> to vector<16x128xf32>
    %101 = arith.subf %87, %100 : vector<16x128xf32>
    %102 = math.exp %101 : vector<16x128xf32>
    %103 = vector.broadcast %99 : vector<16x1xf32> to vector<16x128xf32>
    %104 = arith.subf %94, %103 : vector<16x128xf32>
    %105 = math.exp %104 : vector<16x128xf32>
    %cst_36 = arith.constant dense<0.000000e+00> : vector<16xf32>
    %106 = vector.multi_reduction <add>, %102, %cst_36 [1] : vector<16x128xf32> to vector<16xf32>
    %107 = vector.shape_cast %106 : vector<16xf32> to vector<16x1xf32>
    %cst_37 = arith.constant dense<0.000000e+00> : vector<16xf32>
    %108 = vector.multi_reduction <add>, %105, %cst_37 [1] : vector<16x128xf32> to vector<16xf32>
    %109 = vector.shape_cast %108 : vector<16xf32> to vector<16x1xf32>
    %110 = arith.addf %107, %109 : vector<16x1xf32>
    %111 = arith.truncf %102 : vector<16x128xf32> to vector<16x128xbf16>
    %cst_38 = arith.constant dense<0.000000e+00> : vector<16x8xf32>
    %112 = tpu.matmul %111, %76, %cst_38 {dimension_numbers = #tpu.dot_dimension_numbers<[1], [0], [0], [1], [0, 0, 1, 1], [], []>} : vector<16x128xbf16>, vector<128x8xbf16>, vector<16x8xf32> -> vector<16x8xf32>
    %113 = arith.truncf %105 : vector<16x128xf32> to vector<16x128xbf16>
    %cst_39 = arith.constant dense<0.000000e+00> : vector<16x8xf32>
    %114 = tpu.matmul %113, %78, %cst_39 {dimension_numbers = #tpu.dot_dimension_numbers<[1], [0], [0], [1], [0, 0, 1, 1], [], []>} : vector<16x128xbf16>, vector<128x8xbf16>, vector<16x8xf32> -> vector<16x8xf32>
    %115 = arith.addf %112, %114 : vector<16x8xf32>
    %116 = tpu.reciprocal %110 {approx = true} : vector<16x1xf32> -> vector<16x1xf32>
    %cst_40 = arith.constant 0.353553385 : f32
    %117 = vector.broadcast %cst_40 : f32 to vector<16x1xf32>
    %118 = arith.mulf %116, %117 : vector<16x1xf32>
    %119 = vector.broadcast %118 : vector<16x1xf32> to vector<16x8xf32>
    %120 = arith.mulf %115, %119 : vector<16x8xf32>
    %121 = vector.extract_strided_slice %10 {offsets = [0, 16], sizes = [16, 8], strides = [1, 1]} : vector<16x64xbf16> to vector<16x8xbf16>
    %122 = vector.extract_strided_slice %10 {offsets = [0, 48], sizes = [16, 8], strides = [1, 1]} : vector<16x64xbf16> to vector<16x8xbf16>
    %123 = vector.extract_strided_slice %11 {offsets = [0, 16], sizes = [128, 8], strides = [1, 1]} : vector<128x64xbf16> to vector<128x8xbf16>
    %124 = vector.extract_strided_slice %11 {offsets = [0, 48], sizes = [128, 8], strides = [1, 1]} : vector<128x64xbf16> to vector<128x8xbf16>
    %125 = vector.extract_strided_slice %12 {offsets = [0, 16], sizes = [128, 8], strides = [1, 1]} : vector<128x64xbf16> to vector<128x8xbf16>
    %126 = vector.extract_strided_slice %12 {offsets = [0, 48], sizes = [128, 8], strides = [1, 1]} : vector<128x64xbf16> to vector<128x8xbf16>
    %cst_41 = arith.constant dense<0.000000e+00> : vector<16x128xf32>
    %127 = tpu.matmul %121, %123, %cst_41 {dimension_numbers = #tpu.dot_dimension_numbers<[1], [1], [0], [0], [0, 0, 1, 0], [], []>} : vector<16x8xbf16>, vector<128x8xbf16>, vector<16x128xf32> -> vector<16x128xf32>
    %cst_42 = arith.constant dense<0.000000e+00> : vector<16x128xf32>
    %128 = tpu.matmul %122, %125, %cst_42 {dimension_numbers = #tpu.dot_dimension_numbers<[1], [1], [0], [0], [0, 0, 1, 0], [], []>} : vector<16x8xbf16>, vector<128x8xbf16>, vector<16x128xf32> -> vector<16x128xf32>
    %129 = vector.broadcast %18 : vector<1x128xf32> to vector<16x128xf32>
    %130 = arith.addf %127, %129 : vector<16x128xf32>
    %131 = vector.shape_cast %16 : vector<16x1xi1> to vector<16x1xi1>
    %132 = vector.broadcast %131 : vector<16x1xi1> to vector<16x128xi1>
    %133 = vector.shape_cast %22 : vector<1x128xf32> to vector<1x128xf32>
    %134 = vector.broadcast %133 : vector<1x128xf32> to vector<16x128xf32>
    %135 = arith.select %132, %130, %134 : vector<16x128xi1>, vector<16x128xf32>
    %136 = vector.broadcast %20 : vector<1x128xf32> to vector<16x128xf32>
    %137 = arith.addf %128, %136 : vector<16x128xf32>
    %138 = vector.shape_cast %16 : vector<16x1xi1> to vector<16x1xi1>
    %139 = vector.broadcast %138 : vector<16x1xi1> to vector<16x128xi1>
    %140 = vector.shape_cast %24 : vector<1x128xf32> to vector<1x128xf32>
    %141 = vector.broadcast %140 : vector<1x128xf32> to vector<16x128xf32>
    %142 = arith.select %139, %137, %141 : vector<16x128xi1>, vector<16x128xf32>
    %cst_43 = arith.constant dense<0xFF800000> : vector<16xf32>
    %143 = vector.multi_reduction <maximumf>, %135, %cst_43 [1] : vector<16x128xf32> to vector<16xf32>
    %144 = vector.shape_cast %143 : vector<16xf32> to vector<16x1xf32>
    %cst_44 = arith.constant dense<0xFF800000> : vector<16xf32>
    %145 = vector.multi_reduction <maximumf>, %142, %cst_44 [1] : vector<16x128xf32> to vector<16xf32>
    %146 = vector.shape_cast %145 : vector<16xf32> to vector<16x1xf32>
    %147 = arith.maximumf %144, %146 : vector<16x1xf32>
    %148 = vector.broadcast %147 : vector<16x1xf32> to vector<16x128xf32>
    %149 = arith.subf %135, %148 : vector<16x128xf32>
    %150 = math.exp %149 : vector<16x128xf32>
    %151 = vector.broadcast %147 : vector<16x1xf32> to vector<16x128xf32>
    %152 = arith.subf %142, %151 : vector<16x128xf32>
    %153 = math.exp %152 : vector<16x128xf32>
    %cst_45 = arith.constant dense<0.000000e+00> : vector<16xf32>
    %154 = vector.multi_reduction <add>, %150, %cst_45 [1] : vector<16x128xf32> to vector<16xf32>
    %155 = vector.shape_cast %154 : vector<16xf32> to vector<16x1xf32>
    %cst_46 = arith.constant dense<0.000000e+00> : vector<16xf32>
    %156 = vector.multi_reduction <add>, %153, %cst_46 [1] : vector<16x128xf32> to vector<16xf32>
    %157 = vector.shape_cast %156 : vector<16xf32> to vector<16x1xf32>
    %158 = arith.addf %155, %157 : vector<16x1xf32>
    %159 = arith.truncf %150 : vector<16x128xf32> to vector<16x128xbf16>
    %cst_47 = arith.constant dense<0.000000e+00> : vector<16x8xf32>
    %160 = tpu.matmul %159, %124, %cst_47 {dimension_numbers = #tpu.dot_dimension_numbers<[1], [0], [0], [1], [0, 0, 1, 1], [], []>} : vector<16x128xbf16>, vector<128x8xbf16>, vector<16x8xf32> -> vector<16x8xf32>
    %161 = arith.truncf %153 : vector<16x128xf32> to vector<16x128xbf16>
    %cst_48 = arith.constant dense<0.000000e+00> : vector<16x8xf32>
    %162 = tpu.matmul %161, %126, %cst_48 {dimension_numbers = #tpu.dot_dimension_numbers<[1], [0], [0], [1], [0, 0, 1, 1], [], []>} : vector<16x128xbf16>, vector<128x8xbf16>, vector<16x8xf32> -> vector<16x8xf32>
    %163 = arith.addf %160, %162 : vector<16x8xf32>
    %164 = tpu.reciprocal %158 {approx = true} : vector<16x1xf32> -> vector<16x1xf32>
    %cst_49 = arith.constant 0.353553385 : f32
    %165 = vector.broadcast %cst_49 : f32 to vector<16x1xf32>
    %166 = arith.mulf %164, %165 : vector<16x1xf32>
    %167 = vector.broadcast %166 : vector<16x1xf32> to vector<16x8xf32>
    %168 = arith.mulf %163, %167 : vector<16x8xf32>
    %169 = vector.extract_strided_slice %10 {offsets = [0, 24], sizes = [16, 8], strides = [1, 1]} : vector<16x64xbf16> to vector<16x8xbf16>
    %170 = vector.extract_strided_slice %10 {offsets = [0, 56], sizes = [16, 8], strides = [1, 1]} : vector<16x64xbf16> to vector<16x8xbf16>
    %171 = vector.extract_strided_slice %11 {offsets = [0, 24], sizes = [128, 8], strides = [1, 1]} : vector<128x64xbf16> to vector<128x8xbf16>
    %172 = vector.extract_strided_slice %11 {offsets = [0, 56], sizes = [128, 8], strides = [1, 1]} : vector<128x64xbf16> to vector<128x8xbf16>
    %173 = vector.extract_strided_slice %12 {offsets = [0, 24], sizes = [128, 8], strides = [1, 1]} : vector<128x64xbf16> to vector<128x8xbf16>
    %174 = vector.extract_strided_slice %12 {offsets = [0, 56], sizes = [128, 8], strides = [1, 1]} : vector<128x64xbf16> to vector<128x8xbf16>
    %cst_50 = arith.constant dense<0.000000e+00> : vector<16x128xf32>
    %175 = tpu.matmul %169, %171, %cst_50 {dimension_numbers = #tpu.dot_dimension_numbers<[1], [1], [0], [0], [0, 0, 1, 0], [], []>} : vector<16x8xbf16>, vector<128x8xbf16>, vector<16x128xf32> -> vector<16x128xf32>
    %cst_51 = arith.constant dense<0.000000e+00> : vector<16x128xf32>
    %176 = tpu.matmul %170, %173, %cst_51 {dimension_numbers = #tpu.dot_dimension_numbers<[1], [1], [0], [0], [0, 0, 1, 0], [], []>} : vector<16x8xbf16>, vector<128x8xbf16>, vector<16x128xf32> -> vector<16x128xf32>
    %177 = vector.broadcast %18 : vector<1x128xf32> to vector<16x128xf32>
    %178 = arith.addf %175, %177 : vector<16x128xf32>
    %179 = vector.shape_cast %16 : vector<16x1xi1> to vector<16x1xi1>
    %180 = vector.broadcast %179 : vector<16x1xi1> to vector<16x128xi1>
    %181 = vector.shape_cast %22 : vector<1x128xf32> to vector<1x128xf32>
    %182 = vector.broadcast %181 : vector<1x128xf32> to vector<16x128xf32>
    %183 = arith.select %180, %178, %182 : vector<16x128xi1>, vector<16x128xf32>
    %184 = vector.broadcast %20 : vector<1x128xf32> to vector<16x128xf32>
    %185 = arith.addf %176, %184 : vector<16x128xf32>
    %186 = vector.shape_cast %16 : vector<16x1xi1> to vector<16x1xi1>
    %187 = vector.broadcast %186 : vector<16x1xi1> to vector<16x128xi1>
    %188 = vector.shape_cast %24 : vector<1x128xf32> to vector<1x128xf32>
    %189 = vector.broadcast %188 : vector<1x128xf32> to vector<16x128xf32>
    %190 = arith.select %187, %185, %189 : vector<16x128xi1>, vector<16x128xf32>
    %cst_52 = arith.constant dense<0xFF800000> : vector<16xf32>
    %191 = vector.multi_reduction <maximumf>, %183, %cst_52 [1] : vector<16x128xf32> to vector<16xf32>
    %192 = vector.shape_cast %191 : vector<16xf32> to vector<16x1xf32>
    %cst_53 = arith.constant dense<0xFF800000> : vector<16xf32>
    %193 = vector.multi_reduction <maximumf>, %190, %cst_53 [1] : vector<16x128xf32> to vector<16xf32>
    %194 = vector.shape_cast %193 : vector<16xf32> to vector<16x1xf32>
    %195 = arith.maximumf %192, %194 : vector<16x1xf32>
    %196 = vector.broadcast %195 : vector<16x1xf32> to vector<16x128xf32>
    %197 = arith.subf %183, %196 : vector<16x128xf32>
    %198 = math.exp %197 : vector<16x128xf32>
    %199 = vector.broadcast %195 : vector<16x1xf32> to vector<16x128xf32>
    %200 = arith.subf %190, %199 : vector<16x128xf32>
    %201 = math.exp %200 : vector<16x128xf32>
    %cst_54 = arith.constant dense<0.000000e+00> : vector<16xf32>
    %202 = vector.multi_reduction <add>, %198, %cst_54 [1] : vector<16x128xf32> to vector<16xf32>
    %203 = vector.shape_cast %202 : vector<16xf32> to vector<16x1xf32>
    %cst_55 = arith.constant dense<0.000000e+00> : vector<16xf32>
    %204 = vector.multi_reduction <add>, %201, %cst_55 [1] : vector<16x128xf32> to vector<16xf32>
    %205 = vector.shape_cast %204 : vector<16xf32> to vector<16x1xf32>
    %206 = arith.addf %203, %205 : vector<16x1xf32>
    %207 = arith.truncf %198 : vector<16x128xf32> to vector<16x128xbf16>
    %cst_56 = arith.constant dense<0.000000e+00> : vector<16x8xf32>
    %208 = tpu.matmul %207, %172, %cst_56 {dimension_numbers = #tpu.dot_dimension_numbers<[1], [0], [0], [1], [0, 0, 1, 1], [], []>} : vector<16x128xbf16>, vector<128x8xbf16>, vector<16x8xf32> -> vector<16x8xf32>
    %209 = arith.truncf %201 : vector<16x128xf32> to vector<16x128xbf16>
    %cst_57 = arith.constant dense<0.000000e+00> : vector<16x8xf32>
    %210 = tpu.matmul %209, %174, %cst_57 {dimension_numbers = #tpu.dot_dimension_numbers<[1], [0], [0], [1], [0, 0, 1, 1], [], []>} : vector<16x128xbf16>, vector<128x8xbf16>, vector<16x8xf32> -> vector<16x8xf32>
    %211 = arith.addf %208, %210 : vector<16x8xf32>
    %212 = tpu.reciprocal %206 {approx = true} : vector<16x1xf32> -> vector<16x1xf32>
    %cst_58 = arith.constant 0.353553385 : f32
    %213 = vector.broadcast %cst_58 : f32 to vector<16x1xf32>
    %214 = arith.mulf %212, %213 : vector<16x1xf32>
    %215 = vector.broadcast %214 : vector<16x1xf32> to vector<16x8xf32>
    %216 = arith.mulf %211, %215 : vector<16x8xf32>
    %217 = tpu.concatenate %72, %120, %168, %216 in 1 : vector<16x8xf32>, vector<16x8xf32>, vector<16x8xf32>, vector<16x8xf32> -> vector<16x32xf32>
    %c0_59 = arith.constant 0 : index
    %c0_60 = arith.constant 0 : index
    %c0_61 = arith.constant 0 : index
    %218 = vector.load %arg14[%c0_59, %c0_60, %c0_61] : memref<1x16x32xf32, #tpu.memory_space<vmem>>, vector<1x16x32xf32>
    %219 = vector.shape_cast %218 : vector<1x16x32xf32> to vector<16x32xf32>
    %220 = vector.shape_cast %217 : vector<16x32xf32> to vector<1x16x32xf32>
    tpu.vector_store %arg14[%c0_59, %c0_60, %c0_61], %220 {strides = array<i32>} : memref<1x16x32xf32, #tpu.memory_space<vmem>>, vector<1x16x32xf32>,
    return
  }
  func.func @transform_0(%arg0: i32, %arg1: i32) -> (i32, i32, i32) {
    %c0_i32 = arith.constant 0 : i32
    %c0_i32_0 = arith.constant 0 : i32
    return %arg0, %arg1, %c0_i32 : i32, i32, i32
  }
  func.func @transform_1(%arg0: i32, %arg1: i32) -> (i32, i32, i32) {
    %c0_i32 = arith.constant 0 : i32
    %c0_i32_0 = arith.constant 0 : i32
    %c0_i32_1 = arith.constant 0 : i32
    return %arg0, %c0_i32, %c0_i32_0 : i32, i32, i32
  }
  func.func @transform_2(%arg0: i32, %arg1: i32) -> (i32, i32, i32) {
    %c0_i32 = arith.constant 0 : i32
    %c0_i32_0 = arith.constant 0 : i32
    %c0_i32_1 = arith.constant 0 : i32
    return %arg0, %c0_i32, %c0_i32_0 : i32, i32, i32
  }
  func.func @transform_3(%arg0: i32, %arg1: i32) -> (i32, i32, i32) {
    %c0_i32 = arith.constant 0 : i32
    %c0_i32_0 = arith.constant 0 : i32
    return %arg0, %arg1, %c0_i32 : i32, i32, i32
  }
  func.func @transform_4(%arg0: i32, %arg1: i32) -> (i32, i32, i32) {
    %c0_i32 = arith.constant 0 : i32
    %c0_i32_0 = arith.constant 0 : i32
    %c0_i32_1 = arith.constant 0 : i32
    return %arg0, %c0_i32, %c0_i32_0 : i32, i32, i32
  }
  func.func @transform_5(%arg0: i32, %arg1: i32) -> (i32, i32, i32) {
    %c0_i32 = arith.constant 0 : i32
    %c0_i32_0 = arith.constant 0 : i32
    %c0_i32_1 = arith.constant 0 : i32
    return %arg0, %c0_i32, %c0_i32_0 : i32, i32, i32
  }
  func.func @transform_6(%arg0: i32, %arg1: i32) -> (i32, i32) {
    %c0_i32 = arith.constant 0 : i32
    %c0_i32_0 = arith.constant 0 : i32
    %c0_i32_1 = arith.constant 0 : i32
    return %c0_i32, %c0_i32_0 : i32, i32
  }
  func.func @transform_7(%arg0: i32, %arg1: i32) -> (i32, i32) {
    %c0_i32 = arith.constant 0 : i32
    %c0_i32_0 = arith.constant 0 : i32
    %c0_i32_1 = arith.constant 0 : i32
    return %c0_i32, %c0_i32_0 : i32, i32
  }
  func.func @transform_8(%arg0: i32, %arg1: i32) -> (i32, i32) {
    %c0_i32 = arith.constant 0 : i32
    %c0_i32_0 = arith.constant 0 : i32
    %c0_i32_1 = arith.constant 0 : i32
    return %c0_i32, %c0_i32_0 : i32, i32
  }
  func.func @transform_9(%arg0: i32, %arg1: i32) -> (i32, i32) {
    %c0_i32 = arith.constant 0 : i32
    %c0_i32_0 = arith.constant 0 : i32
    %c0_i32_1 = arith.constant 0 : i32
    return %c0_i32, %c0_i32_0 : i32, i32
  }
  func.func @transform_10(%arg0: i32, %arg1: i32) -> (i32, i32) {
    %c0_i32 = arith.constant 0 : i32
    %c0_i32_0 = arith.constant 0 : i32
    %c0_i32_1 = arith.constant 0 : i32
    return %c0_i32, %c0_i32_0 : i32, i32
  }
  func.func @transform_11(%arg0: i32, %arg1: i32) -> (i32, i32) {
    %c0_i32 = arith.constant 0 : i32
    %c0_i32_0 = arith.constant 0 : i32
    %c0_i32_1 = arith.constant 0 : i32
    return %c0_i32, %c0_i32_0 : i32, i32
  }
  func.func @transform_12(%arg0: i32, %arg1: i32) -> (i32, i32, i32) {
    %c0_i32 = arith.constant 0 : i32
    %c0_i32_0 = arith.constant 0 : i32
    return %arg0, %arg1, %c0_i32 : i32, i32, i32
  }
}

</mosaic_0001>

<bundles_post_ra>
// kernel: tpu_custom_call.1
= control target key start
LH: loop header
LB: loop body
LE: loop exit
PB: predicated region body
PF: predicated region fallthrough
CT: control target
= control target key end

     0   :  { %s4531_s0 = inlined_call_operand.vmem [shape: bf16[2,16,32], index: 0, kind: input, shape index: {}]   ;;  %s4532_s1 = inlined_call_operand.vmem [shape: bf16[2,128,32], index: 1, kind: input, shape index: {}]   ;;  %s4533_s2 = inlined_call_operand.vmem [shape: bf16[2,128,32], index: 2, kind: input, shape index: {}]   ;;  %s4534_s3 = inlined_call_operand.vmem [shape: f32[2,16,1], index: 3, kind: input, shape index: {}]   ;;  %s4535_s4 = inlined_call_operand.vmem [shape: f32[2,1,128], index: 4, kind: input, shape index: {}]   ;;  %s4536_s5 = inlined_call_operand.vmem [shape: f32[2,1,128], index: 5, kind: input, shape index: {}]   ;;  %s4537_s6 = inlined_call_operand.vmem [shape: bf16[32,64], index: 6, kind: input, shape index: {}]   ;;  %s4538_s7 = inlined_call_operand.vmem [shape: f32[1,64], index: 7, kind: input, shape index: {}]   ;;  %s4539_s8 = inlined_call_operand.vmem [shape: bf16[32,64], index: 8, kind: input, shape index: {}]   ;;  %s4540_s9 = inlined_call_operand.vmem [shape: f32[1,64], index: 9, kind: input, shape index: {}]   ;;  %s4541_s10 = inlined_call_operand.vmem [shape: bf16[32,64], index: 10, kind: input, shape index: {}]   ;;  %s4542_s11 = inlined_call_operand.vmem [shape: f32[1,64], index: 11, kind: input, shape index: {}]   ;;  %s4543_s12 = inlined_call_operand.hbm [shape: f32[2,16,32], index: 12, kind: output, shape index: {}]  }
   0x1   :  { %4546 = sst [smem:[#allocation8_spill]] %s4531_s0 }
   0x2   :  { %4547 = sst [smem:[#allocation9_spill]] %s4539_s8 }
   0x3   :  { %17 = vsyncpa [#allocation5], 0 }
   0x4   :  { %19 = vsyncpa [#allocation5 + $0x1], 0  ;;  %s3625_s21 = smov 0   ;;  %s3627_s22 = smov 0  }
   0x5   :  { %s3629_s23 = smov 0   ;;  %s3631_s24 = smov 0  }
   0x6   :  { %s3633_s25 = smov 0   ;;  %s3635_s26 = smov 0  }
   0x7 LB: > { %s2677_s27 = sadd.s32 4294967295, %s3543_s26   ;;  %s2678_s28 = sadd.s32 4294967294, %s3543_s26   ;;  %s3543_s26 = sphi %s3635_s26, %s25_s26   ;;  %s3539_s25 = sphi %s3633_s25, %s4559_s25   ;;  %s3535_s24 = sphi %s3631_s24, %s4558_s24   ;;  %s3531_s23 = sphi %s3629_s23, %s4557_s23   ;;  %s3527_s22 = sphi %s3627_s22, %s4556_s22   ;;  %s3523_s21 = sphi %s3625_s21, %s4555_s21  }
   0x8   : > { %s37_s29 = sadd.s32 1, %s3539_s25  ;;  %s332_s30 = sadd.s32 1, %s3531_s23 }
   0x9   : > { %p39_p0 = scmp.ge.s32.totalorder %s37_s29, 2  ;;  %p342_p1 = scmp.ne.s32.totalorder %s3531_s23, %s3527_s22 }
   0xa   : > { %p343_p2 = scmp.eq.s32.totalorder %s2677_s27, 1  ;;  %p348_p3 = scmp.ne.s32.totalorder %s3527_s22, %s3523_s21 }
   0xb   : > { %s4561_s29 = smov (%p39_p0, %s37_s29), 0  ;;  %p349_p5 = scmp.eq.s32.totalorder %s2678_s28, 1 }
   0xc   : > { %4548 = sst [smem:[#allocation7_spill]] %s4561_s29  ;;  %p3665_p4 = por %p343_p2, %p342_p1 }
   0xd   : > { %s327_s14 = ssub.s32 %s3539_s25, %s4561_s29  ;;  %p2681_p6 = scmp.ge.s32.totalorder %s3543_s26, 1 }
   0xe   : > { %p330_p7 = scmp.eq.s32.totalorder %s327_s14, 0  ;;  %p3672_p8 = por %p349_p5, %p348_p3 }
   0xf   : > { %p439_p9 = scmp.lt.s32.totalorder %s3543_s26, 3 }
  0x10   : > { %s3678_s16 = scalar_select %p330_p7, %s3531_s23, %s332_s30  }
  0x11   : > { %p440_p10 = pnand %p2681_p6, %p439_p9 }
  0x12   : > { %s4551_s8 = sld [smem:[#allocation9_spill]] (!%p440_p10)  ;;  %p511_p11 = scmp.lt.s32.totalorder (!%p440_p10), %s3535_s24, 1  ;;  %vm631_vm0 = vcmask (!%p440_p10), 261120   ;;  %v3391_v2 = vld [vmem:[%s4541_s10] sm:$0xff] (!%p440_p10)   ;;  %v3545_v6 = vmov (!%p440_p10), 0.0   ;;  %v3385_v8 = vld [vmem:[%s4537_s6 + $0x8] sm:$0xff] (!%p440_p10)  }
  0x13   : > { %443 = sbr.rel (%p440_p10) target bundleno = 2586 (0xa1a), region = 68  ;;  %v3382_v3 = vld [vmem:[%s4537_s6] sm:$0xff] (!%p440_p10)   ;;  %s4552_s0 = sld [smem:[#allocation8_spill]] (!%p440_p10)  ;;  %v3392_v13 = vld [vmem:[%s4541_s10 + $0x8] sm:$0xff] (!%p440_p10)   ;;  %vm3546_vm1 = vmmov (!%p440_p10), 0   ;;  %v3547_v25 = vmov (!%p440_p10), 0  }
  0x14   : > { %3377 = vset.pattern.permute.xlu1 (!%p440_p10), %v3547_v25  ;;  %3376 = vset.pattern.permute.xlu0 (!%p440_p10), %v3547_v25  ;;  %v2691_v30 = vld [vmem:[%s4540_s9] ss:$0 sm:$0xff] (!%p440_p10)  ;;  %vm761_vm4 = vcmask (!%p440_p10), 523264   ;;  %vm1092_vm5 = vcmask (!%p440_p10), 64512   ;;  %s3550_s17 = smov (!%p440_p10), 88   ;;  %vm2514_vm8 = vcmask (!%p440_p10), 130048  }
  0x15   : > { %vm2517_vm9 = vcmask (!%p440_p10), 195584  }
  0x18   : > { %v3378_v0 = vld [vmem:[%s4551_s8] sm:$0xff] (!%p440_p10)   ;;  %v3379_v1 = vld [vmem:[%s4551_s8 + $0x8] sm:$0xff] (!%p440_p10)  }
  0x19   : > { %2919 = vmatprep.subr.bf16.mxu0 (!%p440_p10), %v3378_v0  ;;  %3287 = vmatprep.subr.bf16.mxu1 (!%p440_p10), %v3378_v0 }
  0x1a   : > { %s3688_s27 = scalar_select %p511_p11, %s3535_s24, 1  ;;  %2920 = vmatpush3.bf16.msra.mxu0 %v3378_v0  ;;  %3289 = vmatpush3.bf16.msra.mxu1 %v3378_v0 }
  0x1b   : > { %2921 = vmatprep.subr.bf16.mxu0 %v3379_v1  ;;  %3288 = vmatprep.subr.bf16.mxu1 %v3379_v1 }
  0x1c   : > { %s2748_s28 = sshll.u32 %s3688_s27, 6  ;;  %s2747_s29 = sshll.u32 %s3688_s27, 3 }
  0x1d   : > { %s3697_s19 = scalar_lea.vmem %s4532_s1, %s2748_s28  ;;  %s518_s14 = scalar_lea.vmem %s4552_s0, %s2747_s29 }
  0x1e   : > { %v3380_v4 = vld [vmem:[%s3697_s19] sm:$0xff]   ;;  %2922 = vmatpush3.bf16.msra.mxu0 %v3379_v1  ;;  %v3381_v5 = vld [vmem:[%s3697_s19 + $0x8] sm:$0xff]   ;;  %3290 = vmatpush3.bf16.msra.mxu1 %v3379_v1  ;;  %v3383_v7 = vld [vmem:[%s3697_s19 + $0x10] sm:$0xff]   ;;  %s3724_s8 = scalar_lea.vmem %s4533_s2, %s2748_s28  ;;  %s2750_s28 = sshll.u32 %s3688_s27, 4 }
  0x1f   : > { %2923 = vmatprep.mubr.msk.bf16.mxu0 %vm631_vm0, %v3380_v4  ;;  %2959 = vmatprep.subr.bf16.mxu0 %v3545_v6  ;;  %v3387_v9 = vld [vmem:[%s3697_s19 + $0x20] sm:$0xff]   ;;  %v3388_v10 = vld [vmem:[%s3697_s19 + $0x28] sm:$0xff]   ;;  %v3389_v11 = vld [vmem:[%s3697_s19 + $0x30] sm:$0xff]   ;;  %s538_s18 = scalar_lea.vmem %s4534_s3, %s2750_s28  ;;  %s542_s20 = scalar_lea.vmem %s4535_s4, %s3688_s27 }
  0x20   : > { %2939 = vmatprep.subr.bf16.mxu1 %v3391_v2  ;;  %2931 = vmatprep.mubr.msk.bf16.mxu1 %vm631_vm0, %v3387_v9  ;;  %v3384_v12 = vld [vmem:[%s3697_s19 + $0x18] sm:$0xff]   ;;  %v3393_v15 = vld [vmem:[%s3724_s8] sm:$0xff]   ;;  %v3394_v17 = vld [vmem:[%s3724_s8 + $0x8] sm:$0xff]   ;;  %s545_s30 = scalar_lea.vmem %s4536_s5, %s3688_s27  ;;  %s3549_s27 = smov 120  }
  0x21   : > { %2924 = vmatmul.mubr.msk.bf16.vlgmr.msra.gmra.mrb[0].mxu0 %vm631_vm0, %v3381_v5  ;;  %2932 = vmatmul.mubr.msk.bf16.vlgmr.msra.gmra.mrb[0].mxu1 %vm631_vm0, %v3388_v10  ;;  %v3390_v14 = vld [vmem:[%s3697_s19 + $0x38] sm:$0xff]   ;;  %v3386_v16 = vld [vmem:[%s518_s14] sm:$0xff]   ;;  %v3395_v18 = vld [vmem:[%s3724_s8 + $0x10] sm:$0xff]   ;;  %s3548_s19 = smov 96   ;;  %s3551_s28 = smov 112  }
  0x22   : > { %2960 = vmatpush3.bf16.msra.mxu0 %v3382_v3  ;;  %2927 = vmatprep.mubr.msk.bf16.mxu0 %vm631_vm0, %v3383_v7  ;;  %v3396_v19 = vld [vmem:[%s3724_s8 + $0x18] sm:$0xff]   ;;  %v3397_v20 = vld [vmem:[%s3724_s8 + $0x20] sm:$0xff]   ;;  %v3398_v21 = vld [vmem:[%s3724_s8 + $0x28] sm:$0xff]   ;;  %s3553_s14 = smov 104   ;;  %s3556_s29 = smov 16  }
  0x23   : > { %2961 = vmatprep.subr.bf16.mxu0 %v3545_v6  ;;  %2935 = vmatprep.mubr.msk.bf16.mxu1 %vm631_vm0, %v3389_v11  ;;  %v3399_v22 = vld [vmem:[%s3724_s8 + $0x30] sm:$0xff]   ;;  %v3400_v23 = vld [vmem:[%s3724_s8 + $0x38] sm:$0xff]   ;;  %v1079_v24 = vld [vmem:[%s538_s18 + $0x8] sm:$0xff]  ;;  %s3557_s8 = smov 24  }
  0x24   : > { %2940 = vmatpush3.bf16.msra.mxu1 %v3391_v2  ;;  %vm1081_vm2 = vcmp.gt.f32.partialorder %v1079_v24, 0.5  ;;  %v1078_v27 = vld [vmem:[%s538_s18] sm:$0xff]  ;;  %s3554_s18 = smov 72  }
  0x25   : > { %2941 = vmatprep.subr.bf16.mxu1 %v3392_v13  ;;  %v1162_v26 = vsel %vm1081_vm2, 1, %v3547_v25  ;;  %vm1080_vm3 = vcmp.gt.f32.partialorder %v1078_v27, 0.5  ;;  %v2729_v4 = vld [vmem:[%s4538_s7] ss:$0 sm:$0xff] }
  0x26   : > { %2962 = vmatpush3.bf16.msra.mxu0 %v3385_v8  ;;  %1167 = vperm.xlu1 %3377, %v1162_v26   ;;  %v3764_v28 = vsel %vm1080_vm3, 1, %v3547_v25 }
  0x27   : > { %2987 = vmatprep.subr.bf16.mxu0 %v3545_v6 }
  0x28   : > { %2942 = vmatpush3.bf16.msra.mxu1 %v3392_v13 }
  0x29   : > { %2928 = vmatmul.mubr.msk.bf16.gmra.mrb[4].mxu0 %vm631_vm0, %v3384_v12  ;;  %2967 = vmatprep.subr.bf16.mxu1 %v3545_v6 }
  0x2a   : > { %2963 = vmatprep.mubr.msk.bf16.mxu0 %vm3546_vm1, %v3545_v6  ;;  %2936 = vmatmul.mubr.msk.bf16.gmra.mrb[4].mxu1 %vm631_vm0, %v3390_v14 }
  0x2b   : > { %2943 = vmatprep.mubr.msk.bf16.mxu1 %vm631_vm0, %v3393_v15 }
  0x31   : > { %2964 = vmatmul.mubr.msk.bf16.vlgmr.msra.gmra.mrb[8].mxu0 %vm631_vm0, %v3386_v16  ;;  %v3787_v16 = vld [vmem:[%s4542_s11] ss:$0 sm:$0xff] }
  0x32   : > { %3003 = vmatprep.mubr.msk.bf16.mxu0 %vm3546_vm1, %v3545_v6  ;;  %2944 = vmatmul.mubr.msk.bf16.vlgmr.msra.gmra.mrb[8].mxu1 %vm631_vm0, %v3394_v17 }
  0x33   : > { %2947 = vmatprep.mubr.msk.bf16.mxu1 %vm631_vm0, %v3395_v18 }
  0x3a   : > { %2948 = vmatmul.mubr.msk.bf16.gmra.mrb[12].mxu1 %vm631_vm0, %v3396_v19 }
  0x3b   : > { %2951 = vmatprep.mubr.msk.bf16.mxu1 %vm631_vm0, %v3397_v20 }
  0x42   : > { %2952 = vmatmul.mubr.msk.bf16.gmra.mrb[16].mxu1 %vm631_vm0, %v3398_v21 }
  0x43   : > { %2955 = vmatprep.mubr.msk.bf16.mxu1 %vm631_vm0, %v3399_v22 }
  0x4a   : > { %2956 = vmatmul.mubr.msk.bf16.gmra.mrb[20].mxu1 %vm631_vm0, %v3400_v23 }
  0x4b   : > { %2983 = vmatprep.mubr.msk.bf16.mxu1 %vm3546_vm1, %v3545_v6 }
  0xf4   : > { %v2925_v29 = vpop.f32.mrb[0].mxu0  ;;  %v2933_v38 = vpop.f32.mrb[0].mxu1 }
  0xf5   : > { %v690_v31 = vpop.f32.mrb[1].mxu0  ;;  %v699_v33 = vadd.f32 %v2925_v29, %v2691_v30  ;;  %v731_v40 = vadd.f32 %v2933_v38, %v2691_v30  ;;  %v722_v41 = vpop.f32.mrb[1].mxu1 }
  0xf6   : > { %v2926_v32 = vpop.f32.mrb[2].mxu0  ;;  %v691_v36 = vadd.f32 %v2691_v30, %v690_v31  ;;  %v723_v43 = vadd.f32 %v2691_v30, %v722_v41  ;;  %v2934_v44 = vpop.f32.mrb[2].mxu1 }
  0xf7   : > { %v702_v34 = vadd.f32 %v2926_v32, %v2691_v30  ;;  %v693_v35 = vpop.f32.mrb[3].mxu0  ;;  %v734_v45 = vadd.f32 %v2934_v44, %v2691_v30  ;;  %v725_v46 = vpop.f32.mrb[3].mxu1 }
  0xf8   : > { %v694_v37 = vadd.f32 %v2691_v30, %v693_v35  ;;  %v726_v48 = vadd.f32 %v2691_v30, %v725_v46 }
  0xf9   : > { %v754_v39 = vpack.c.bf16 %v702_v34, %v699_v33  ;;  %v758_v50 = vpack.c.bf16 %v734_v45, %v731_v40 }
  0xfa   : > { %v753_v42 = vpack.c.bf16 %v694_v37, %v691_v36  ;;  %v757_v52 = vpack.c.bf16 %v726_v48, %v723_v43 }
  0xfb   : > { %763 = vst.msk [vmem:[#allocation2 + $0x8] sm:$0xff] %vm761_vm4, %v754_v39  ;;  %767 = vst.msk [vmem:[#allocation2 + $0x28] sm:$0xff] %vm761_vm4, %v758_v50 }
  0xfc   : > { %762 = vst.msk [vmem:[#allocation2] sm:$0xff] %vm761_vm4, %v753_v42  ;;  %v2929_v47 = vpop.f32.mrb[4].mxu0  ;;  %766 = vst.msk [vmem:[#allocation2 + $0x20] sm:$0xff] %vm761_vm4, %v757_v52 }
  0xfd   : > { %v706_v49 = vpop.f32.mrb[5].mxu0  ;;  %v715_v53 = vadd.f32 %v2929_v47, %v2691_v30  ;;  %v2937_v58 = vpop.f32.mrb[4].mxu1 }
  0xfe   : > { %v2930_v51 = vpop.f32.mrb[6].mxu0  ;;  %v707_v56 = vadd.f32 %v2691_v30, %v706_v49  ;;  %v747_v60 = vadd.f32 %v2937_v58, %v2691_v30  ;;  %v738_v61 = vpop.f32.mrb[5].mxu1 }
  0xff   : > { %v718_v54 = vadd.f32 %v2930_v51, %v2691_v30  ;;  %v709_v55 = vpop.f32.mrb[7].mxu0  ;;  %v739_v63 = vadd.f32 %v2691_v30, %v738_v61  ;;  %v2938_v0 = vpop.f32.mrb[6].mxu1 }
 0x100   : > { %v710_v57 = vadd.f32 %v2691_v30, %v709_v55  ;;  %v750_v2 = vadd.f32 %v2938_v0, %v2691_v30  ;;  %v741_v3 = vpop.f32.mrb[7].mxu1 }
 0x101   : > { %v756_v59 = vpack.c.bf16 %v718_v54, %v715_v53  ;;  %v742_v8 = vadd.f32 %v2691_v30, %v741_v3 }
 0x102   : > { %v755_v62 = vpack.c.bf16 %v710_v57, %v707_v56  ;;  %v760_v10 = vpack.c.bf16 %v750_v2, %v747_v60  ;;  %v3792_v19 = vld [vmem:[#allocation2 + $0x8] sm:$0xff] }
 0x103   : > { %765 = vst.msk [vmem:[#allocation2 + $0x18] sm:$0xff] %vm761_vm4, %v756_v59  ;;  %v3774_v1 = vld [vmem:[#allocation2] sm:$0xff]  ;;  %v759_v12 = vpack.c.bf16 %v742_v8, %v739_v63  ;;  %v1100_v26 = vsel %vm1092_vm5, %v3792_v19, 0 }
 0x104   : > { %764 = vst.msk [vmem:[#allocation2 + $0x10] sm:$0xff] %vm761_vm4, %v755_v62  ;;  %v1054_v5 = vpop.f32.mrb[8].mxu0  ;;  %v1097_v7 = vsel %vm1092_vm5, %v3774_v1, 0  ;;  %769 = vst.msk [vmem:[#allocation2 + $0x38] sm:$0xff] %vm761_vm4, %v760_v10  ;;  %v3841_v59 = vld [vmem:[#allocation2 + $0x20] sm:$0xff] }
 0x105   : > { %v2965_v9 = vpop.f32.mrb[9].mxu0  ;;  %2968 = vmatpush3.bf16.xpose.msra.mxu1 %v1097_v7  ;;  %v1055_v13 = vadd.f32 %v2729_v4, %v1054_v5  ;;  %768 = vst.msk [vmem:[#allocation2 + $0x30] sm:$0xff] %vm761_vm4, %v759_v12  ;;  %v2945_v17 = vpop.f32.mrb[8].mxu1  ;;  %v1109_v63 = vsel %vm1092_vm5, %v3841_v59, 0  ;;  %v3863_v12 = vld [vmem:[#allocation2 + $0x28] sm:$0xff] }
 0x106   : > { %v1057_v11 = vpop.f32.mrb[10].mxu0  ;;  %2969 = vmatprep.subr.bf16.mxu1 %v3545_v6  ;;  %v916_v20 = vadd.f32 %v2945_v17, %v3787_v16  ;;  %v907_v21 = vpop.f32.mrb[9].mxu1 }
 0x107   : > { %v1058_v14 = vadd.f32 %v2729_v4, %v1057_v11  ;;  %v2966_v15 = vpop.f32.mrb[11].mxu0  ;;  %v908_v22 = vadd.f32 %v3787_v16, %v907_v21  ;;  %v2946_v23 = vpop.f32.mrb[10].mxu1 }
 0x108   : > { %v919_v24 = vadd.f32 %v2946_v23, %v3787_v16  ;;  %v910_v25 = vpop.f32.mrb[11].mxu1 }
 0x109   : > { %v3790_v18 = vpack.c.bf16 %v1058_v14, %v1055_v13  ;;  %v911_v27 = vadd.f32 %v3787_v16, %v910_v25  ;;  %v1112_v14 = vsel %vm1092_vm5, %v3863_v12, 0 }
 0x10a   : > { %v971_v29 = vpack.c.bf16 %v919_v24, %v916_v20  ;;  %v3827_v46 = vld [vmem:[#allocation2 + $0x18] sm:$0xff] }
 0x10b   : > { %1186 = vrot.lane.b32.xlu0 %v3790_v18, %s3548_s19  ;;  %v970_v30 = vpack.c.bf16 %v911_v27, %v908_v22  ;;  %v3806_v32 = vld [vmem:[#allocation2 + $0x10] sm:$0xff]  ;;  %v1106_v53 = vsel %vm1092_vm5, %v3827_v46, 0  ;;  %v3887_v21 = vld [vmem:[#allocation2 + $0x38] sm:$0xff] }
 0x10c   : > { %979 = vst.msk [vmem:[#allocation3 + $0x8] sm:$0xff] %vm761_vm4, %v971_v29  ;;  %v1103_v39 = vsel %vm1092_vm5, %v3806_v32, 0  ;;  %v1118_v22 = vsel %vm1092_vm5, %v3887_v21, 0 }
 0x10d   : > { %2970 = vmatpush3.bf16.xpose.msra.mxu1 %v1100_v26  ;;  %978 = vst.msk [vmem:[#allocation3] sm:$0xff] %vm761_vm4, %v970_v30  ;;  %v2949_v31 = vpop.f32.mrb[12].mxu1  ;;  %v3913_v30 = vpop.permute.xlu1 %1167 }
 0x10e   : > { %2971 = vmatprep.subr.bf16.mxu1 %v3545_v6  ;;  %v932_v33 = vadd.f32 %v2949_v31, %v3787_v16  ;;  %v923_v34 = vpop.f32.mrb[13].mxu1  ;;  %vm1170_vm7 = vcmp.eq.s32.totalorder %v3913_v30, 1 }
 0x10f   : > { %1164 = vperm.xlu0 %3376, %v3764_v28   ;;  %v924_v35 = vadd.f32 %v3787_v16, %v923_v34  ;;  %v2950_v36 = vpop.f32.mrb[14].mxu1 }
 0x110   : > { %v935_v37 = vadd.f32 %v2950_v36, %v3787_v16  ;;  %v926_v38 = vpop.f32.mrb[15].mxu1 }
 0x111   : > { %v927_v40 = vadd.f32 %v3787_v16, %v926_v38 }
 0x112   : > { %v973_v28 = vpack.c.bf16 %v935_v37, %v932_v33 }
 0x113   : > { %v972_v41 = vpack.c.bf16 %v927_v40, %v924_v35  ;;  %v3815_v42 = vld [vmem:[#allocation3 + $0x8] sm:$0xff] }
 0x114   : > { %v3817_v43 = vld [vmem:[#allocation3] sm:$0xff]  ;;  %981 = vst.msk [vmem:[#allocation3 + $0x18] sm:$0xff] %vm761_vm4, %v973_v28  ;;  %1308 = vrot.lane.b32.xlu0 %v3815_v42, %s3548_s19  ;;  %v1195_v56 = vsel %vm1092_vm5, %v3815_v42, 0 }
 0x115   : > { %2972 = vmatpush3.bf16.xpose.msra.mxu1 %v1103_v39  ;;  %v1192_v44 = vsel %vm1092_vm5, %v3817_v43, 0  ;;  %980 = vst.msk [vmem:[#allocation3 + $0x10] sm:$0xff] %vm761_vm4, %v972_v41  ;;  %1306 = vrot.lane.b32.xlu1 %v3817_v43, %s3548_s19  ;;  %v2953_v45 = vpop.f32.mrb[16].mxu1  ;;  %v1087_v39 = vlaneseq  ;;  %v1082_v28 = vld [vmem:[%s542_s20] sm:$0x1]  ;;  %s4545_s20 = smov 8  }
 0x116   : > { %2973 = vmatprep.subr.bf16.mxu1 %v3545_v6  ;;  %2988 = vmatpush3.bf16.xpose.msra.mxu0 %v1192_v44  ;;  %v948_v47 = vadd.f32 %v2953_v45, %v3787_v16  ;;  %v939_v48 = vpop.f32.mrb[17].mxu1  ;;  %v1084_v44 = vmin.f32 %v1082_v28, -10000.0 }
 0x117   : > { %2989 = vmatprep.subr.bf16.mxu0 %v3545_v6  ;;  %v940_v49 = vadd.f32 %v3787_v16, %v939_v48  ;;  %v2954_v50 = vpop.f32.mrb[18].mxu1  ;;  %v1088_v40 = vshrl.u32 %v1087_v39, 7 }
 0x118   : > { %v951_v51 = vadd.f32 %v2954_v50, %v3787_v16  ;;  %v942_v52 = vpop.f32.mrb[19].mxu1 }
 0x119   : > { %v943_v54 = vadd.f32 %v3787_v16, %v942_v52  ;;  %v1089_v41 = vsub.s32 0, %v1088_v40 }
 0x11a   : > { %v975_v55 = vpack.c.bf16 %v951_v51, %v948_v47 }
 0x11b   : > { %v3839_v57 = vld [vmem:[#allocation3 + $0x18] sm:$0xff]  ;;  %v974_v58 = vpack.c.bf16 %v943_v54, %v940_v49  ;;  %v3927_v45 = vrot.slane %v1082_v28, %v1089_v41  ;;  %v3929_v47 = vrot.slane %v1084_v44, %v1089_v41 }
 0x11c   : > { %1312 = vrot.lane.b32.xlu1 %v3839_v57, %s3548_s19  ;;  %983 = vst.msk [vmem:[#allocation3 + $0x28] sm:$0xff] %vm761_vm4, %v975_v55  ;;  %v3851_v0 = vld [vmem:[#allocation3 + $0x10] sm:$0xff]  ;;  %v1201_v15 = vsel %vm1092_vm5, %v3839_v57, 0 }
 0x11d   : > { %2974 = vmatpush3.bf16.xpose.msra.mxu1 %v1106_v53  ;;  %982 = vst.msk [vmem:[#allocation3 + $0x20] sm:$0xff] %vm761_vm4, %v974_v58  ;;  %v2957_v60 = vpop.f32.mrb[20].mxu1  ;;  %v1198_v9 = vsel %vm1092_vm5, %v3851_v0, 0 }
 0x11e   : > { %2975 = vmatprep.subr.bf16.mxu1 %v3545_v6  ;;  %2990 = vmatpush3.bf16.xpose.msra.mxu0 %v1195_v56  ;;  %v964_v61 = vadd.f32 %v2957_v60, %v3787_v16  ;;  %v955_v62 = vpop.f32.mrb[21].mxu1  ;;  %v1083_v56 = vld [vmem:[%s545_s30] sm:$0x1]  ;;  %s507_s30 = sand.u32 1, %s3527_s22  }
 0x11f   : > { %2991 = vmatprep.subr.bf16.mxu0 %v3545_v6  ;;  %v956_v2 = vadd.f32 %v3787_v16, %v955_v62  ;;  %v2958_v3 = vpop.f32.mrb[22].mxu1  ;;  %v1085_v58 = vmin.f32 %v1083_v56, -10000.0  ;;  %v3951_v60 = vrot.slane %v1083_v56, %v1089_v41 }
 0x120   : > { %1310 = vrot.lane.b32.xlu1 %v3851_v0, %s3548_s19  ;;  %v967_v4 = vadd.f32 %v2958_v3, %v3787_v16  ;;  %v958_v5 = vpop.f32.mrb[23].mxu1 }
 0x121   : > { %v959_v7 = vadd.f32 %v3787_v16, %v958_v5  ;;  %v3879_v16 = vld [vmem:[#allocation2 + $0x30] sm:$0xff] }
 0x122   : > { %v977_v8 = vpack.c.bf16 %v967_v4, %v964_v61  ;;  %v1115_v17 = vsel %vm1092_vm5, %v3879_v16, 0  ;;  %v3953_v61 = vrot.slane %v1085_v58, %v1089_v41 }
 0x123   : > { %v976_v10 = vpack.c.bf16 %v959_v7, %v956_v2  ;;  %v3861_v11 = vld [vmem:[#allocation3 + $0x28] sm:$0xff] }
 0x124   : > { %v3865_v13 = vld [vmem:[#allocation3 + $0x20] sm:$0xff]  ;;  %985 = vst.msk [vmem:[#allocation3 + $0x38] sm:$0xff] %vm761_vm4, %v977_v8  ;;  %1316 = vrot.lane.b32.xlu1 %v3861_v11, %s3548_s19  ;;  %v1207_v23 = vsel %vm1092_vm5, %v3861_v11, 0 }
 0x125   : > { %2976 = vmatpush3.bf16.xpose.msra.mxu1 %v1109_v63  ;;  %984 = vst.msk [vmem:[#allocation3 + $0x30] sm:$0xff] %vm761_vm4, %v976_v10  ;;  %1314 = vrot.lane.b32.xlu0 %v3865_v13, %s3548_s19  ;;  %v1204_v20 = vsel %vm1092_vm5, %v3865_v13, 0 }
 0x126   : > { %2977 = vmatprep.subr.bf16.mxu1 %v3545_v6  ;;  %2992 = vmatpush3.bf16.xpose.msra.mxu0 %v1198_v9 }
 0x127   : > { %2993 = vmatprep.subr.bf16.mxu0 %v3545_v6 }
 0x12b   : > { %v3905_v26 = vld [vmem:[#allocation3 + $0x38] sm:$0xff] }
 0x12c   : > { %v3896_v24 = vld [vmem:[#allocation3 + $0x30] sm:$0xff]  ;;  %v1213_v27 = vsel %vm1092_vm5, %v3905_v26, 0 }
 0x12d   : > { %2978 = vmatpush3.bf16.xpose.msra.mxu1 %v1112_v14  ;;  %v1210_v25 = vsel %vm1092_vm5, %v3896_v24, 0 }
 0x12e   : > { %2979 = vmatprep.subr.bf16.mxu1 %v3545_v6  ;;  %2994 = vmatpush3.bf16.xpose.msra.mxu0 %v1201_v15 }
 0x12f   : > { %2995 = vmatprep.subr.bf16.mxu0 %v3545_v6 }
 0x135   : > { %2980 = vmatpush3.bf16.xpose.msra.mxu1 %v1115_v17 }
 0x136   : > { %2981 = vmatprep.subr.bf16.mxu1 %v3545_v6  ;;  %2996 = vmatpush3.bf16.xpose.msra.mxu0 %v1204_v20 }
 0x137   : > { %2997 = vmatprep.subr.bf16.mxu0 %v3545_v6 }
 0x13d   : > { %2982 = vmatpush3.bf16.xpose.msra.mxu1 %v1118_v22 }
 0x13e   : > { %3007 = vmatprep.subr.bf16.mxu1 %v3545_v6  ;;  %2998 = vmatpush3.bf16.xpose.msra.mxu0 %v1207_v23 }
 0x13f   : > { %2999 = vmatprep.subr.bf16.mxu0 %v3545_v6 }
 0x144   : > { %2984 = vmatmul.mubr.msk.bf16.vlgmr.msra.gmra.mrb[24].mxu1 %vm1092_vm5, %v3790_v18 }
 0x145   : > { %3023 = vmatprep.mubr.msk.bf16.mxu1 %vm3546_vm1, %v3545_v6 }
 0x146   : > { %3000 = vmatpush3.bf16.xpose.msra.mxu0 %v1210_v25 }
 0x147   : > { %3001 = vmatprep.subr.bf16.mxu0 %v3545_v6 }
 0x14e   : > { %3002 = vmatpush3.bf16.xpose.msra.mxu0 %v1213_v27 }
 0x14f   : > { %3047 = vmatprep.subr.bf16.mxu0 %v3545_v6 }
 0x17d   : > { %v1187_v29 = vpop.permute.xlu0 %1186 }
 0x17e   : > { %3004 = vmatmul.mubr.msk.bf16.vlgmr.msra.gmra.mrb[12].mxu0 %vm1092_vm5, %v1187_v29 }
 0x17f   : > { %3063 = vmatprep.mubr.msk.bf16.mxu0 %vm3546_vm1, %v3545_v6 }
 0x187   : > { %v1307_v31 = vpop.permute.xlu1 %1306 }
 0x188   : > { %3008 = vmatpush3.bf16.msra.mxu1 %v1307_v31 }
 0x189   : > { %3009 = vmatprep.subr.bf16.mxu1 %v3545_v6 }
 0x18e   : > { %v3916_v33 = vpop.permute.xlu0 %1164  ;;  %v1313_v34 = vpop.permute.xlu1 %1312 }
 0x18f   : > { %vm1169_vm6 = vcmp.eq.s32.totalorder %v3916_v33, 1 }
 0x192   : > { %v1309_v35 = vpop.permute.xlu0 %1308  ;;  %v1311_v36 = vpop.permute.xlu1 %1310 }
 0x193   : > { %3010 = vmatpush3.bf16.msra.mxu1 %v1309_v35 }
 0x194   : > { %3011 = vmatprep.subr.bf16.mxu1 %v3545_v6 }
 0x196   : > { %v1317_v38 = vpop.permute.xlu1 %1316 }
 0x197   : > { %3012 = vmatpush3.bf16.msra.mxu1 %v1311_v36  ;;  %v1315_v37 = vpop.permute.xlu0 %1314 }
 0x198   : > { %3013 = vmatprep.subr.bf16.mxu1 %v3545_v6 }
 0x19b   : > { %3014 = vmatpush3.bf16.msra.mxu1 %v1313_v34 }
 0x19c   : > { %3015 = vmatprep.subr.bf16.mxu1 %v3545_v6 }
 0x19f   : > { %3016 = vmatpush3.bf16.msra.mxu1 %v1315_v37 }
 0x1a0   : > { %3017 = vmatprep.subr.bf16.mxu1 %v3545_v6 }
 0x1a3   : > { %3018 = vmatpush3.bf16.msra.mxu1 %v1317_v38 }
 0x1a4   : > { %3019 = vmatprep.subr.bf16.mxu1 %v3545_v6 }
 0x217   : > { %v1154_v48 = vpop.f32.mrb[24].mxu1 }
 0x218   : > { %v1155_v49 = vadd.f32 %v1154_v48, %v3927_v45  ;;  %v2985_v50 = vpop.f32.mrb[25].mxu1 }
 0x219   : > { %v1157_v51 = vpop.f32.mrb[26].mxu1 }
 0x21a   : > { %v1158_v52 = vadd.f32 %v1157_v51, %v3927_v45  ;;  %v2986_v53 = vpop.f32.mrb[27].mxu1  ;;  %v3938_v54 = vsel %vm1169_vm6, %v1155_v49, %v3929_v47 }
 0x21b   : > { %1264 = vmax.xlane.f32.xlu1 %v3938_v54 }
 0x21c   : > { %v3944_v55 = vsel %vm1170_vm7, %v1158_v52, %v3929_v47 }
 0x21d   : > { %1266 = vmax.xlane.f32.xlu0 %v3944_v55 }
 0x251   : > { %v1249_v62 = vpop.f32.mrb[12].mxu0 }
 0x252   : > { %v1250_v63 = vadd.f32 %v1249_v62, %v3951_v60  ;;  %v3005_v2 = vpop.f32.mrb[13].mxu0 }
 0x253   : > { %v1252_v3 = vpop.f32.mrb[14].mxu0 }
 0x254   : > { %v1253_v4 = vadd.f32 %v1252_v3, %v3951_v60  ;;  %v3006_v5 = vpop.f32.mrb[15].mxu0  ;;  %v1262_v7 = vsel %vm1169_vm6, %v1250_v63, %v3953_v61 }
 0x255   : > { %1268 = vmax.xlane.f32.xlu1 %v1262_v7 }
 0x256   : > { %v1263_v8 = vsel %vm1170_vm7, %v1253_v4, %v3953_v61 }
 0x257   : > { %1270 = vmax.xlane.f32.xlu0 %v1263_v8 }
 0x266   : > { %1320 = vrot.lane.b32.xlu1 %v3905_v26, %s3548_s19 }
 0x26a   : > { %1381 = vrot.lane.b32.xlu1 %v3792_v19, %s3548_s19 }
 0x26d   : > { %1318 = vrot.lane.b32.xlu0 %v3896_v24, %s3548_s19 }
 0x26e   : > { %1385 = vrot.lane.b32.xlu1 %v3827_v46, %s3548_s19 }
 0x271   : > { %1379 = vrot.lane.b32.xlu0 %v3774_v1, %s3548_s19 }
 0x272   : > { %1389 = vrot.lane.b32.xlu1 %v3863_v12, %s3548_s19 }
 0x275   : > { %1383 = vrot.lane.b32.xlu0 %v3806_v32, %s3548_s19 }
 0x276   : > { %1393 = vrot.lane.b32.xlu1 %v3887_v21, %s3548_s19 }
 0x279   : > { %1387 = vrot.lane.b32.xlu0 %v3841_v59, %s3548_s19 }
 0x27a   : > { %1540 = vrot.lane.b32.xlu1 %v3817_v43, %s3549_s27 }
 0x27d   : > { %1391 = vrot.lane.b32.xlu0 %v3879_v16, %s3548_s19  ;;  %s3552_s19 = smov 80  }
 0x27e   : > { %1542 = vrot.lane.b32.xlu1 %v3815_v42, %s3549_s27 }
 0x281   : > { %1452 = vrot.lane.b32.xlu0 %v3774_v1, %s3549_s27 }
 0x282   : > { %1544 = vrot.lane.b32.xlu1 %v3851_v0, %s3549_s27 }
 0x285   : > { %1454 = vrot.lane.b32.xlu0 %v3792_v19, %s3549_s27 }
 0x286   : > { %1546 = vrot.lane.b32.xlu1 %v3839_v57, %s3549_s27 }
 0x289   : > { %1456 = vrot.lane.b32.xlu0 %v3806_v32, %s3549_s27 }
 0x28a   : > { %1548 = vrot.lane.b32.xlu1 %v3865_v13, %s3549_s27 }
 0x28d   : > { %1458 = vrot.lane.b32.xlu0 %v3827_v46, %s3549_s27 }
 0x28e   : > { %1550 = vrot.lane.b32.xlu1 %v3861_v11, %s3549_s27 }
 0x291   : > { %1460 = vrot.lane.b32.xlu0 %v3841_v59, %s3549_s27 }
 0x292   : > { %1552 = vrot.lane.b32.xlu1 %v3896_v24, %s3549_s27 }
 0x295   : > { %1462 = vrot.lane.b32.xlu0 %v3863_v12, %s3549_s27 }
 0x296   : > { %1554 = vrot.lane.b32.xlu1 %v3905_v26, %s3549_s27 }
 0x299   : > { %1464 = vrot.lane.b32.xlu0 %v3879_v16, %s3549_s27 }
 0x29a   : > { %1538 = vrot.lane.b32.xlu1 %v3790_v18, %s3550_s17 }
 0x29d   : > { %1466 = vrot.lane.b32.xlu0 %v3887_v21, %s3549_s27 }
 0x29e   : > { %1660 = vrot.lane.b32.xlu1 %v3817_v43, %s3550_s17 }
 0x2a1   : > { %1450 = vrot.lane.b32.xlu0 %v3790_v18, %s3549_s27  ;;  %s2682_s27 = sshll.u32 %s507_s30, 4 }
 0x2a2   : > { %1664 = vrot.lane.b32.xlu1 %v3851_v0, %s3550_s17 }
 0x2a5   : > { %1662 = vrot.lane.b32.xlu0 %v3815_v42, %s3550_s17 }
 0x2a6   : > { %1666 = vrot.lane.b32.xlu1 %v3839_v57, %s3550_s17 }
 0x2a8   : > { %v1265_v9 = vpop.xlane.xlu1 %1264 }
 0x2a9   : > { %1668 = vrot.lane.b32.xlu0 %v3865_v13, %s3550_s17 }
 0x2aa   : > { %1670 = vrot.lane.b32.xlu1 %v3861_v11, %s3550_s17  ;;  %v1267_v10 = vpop.xlane.xlu0 %1266 }
 0x2e2   : > { %v1269_v14 = vpop.xlane.xlu1 %1268 }
 0x2e3   : > { %v1272_v15 = vmax.f32 %v1265_v9, %v1269_v14 }
 0x2e4   : > { %v1271_v17 = vpop.xlane.xlu0 %1270 }
 0x2e5   : > { %v1280_v20 = vsub.f32 %v1262_v7, %v1272_v15  ;;  %v1273_v22 = vmax.f32 %v1267_v10, %v1271_v17  ;;  %v1274_v53 = vsub.f32 %v3938_v54, %v1272_v15 }
 0x2e6   : > { %v1321_v31 = vpop.permute.xlu1 %1320 }
 0x2e7   : > { %v1282_v23 = vmul.f32 1.442695, %v1280_v20  ;;  %v1281_v25 = vsub.f32 %v1263_v8, %v1273_v22  ;;  %v1275_v51 = vsub.f32 %v3944_v55, %v1273_v22  ;;  %v1276_v63 = vmul.f32 1.442695, %v1274_v53 }
 0x2e8   : > { %v1319_v27 = vpop.permute.xlu0 %1318 }
 0x2e9   : > { %v1284_v29 = vmul.f32 1.442695, %v1281_v25  ;;  %3020 = vmatpush3.bf16.msra.mxu1 %v1319_v27  ;;  %3401 = vpow2.f32 %v1282_v23  ;;  %v1278_v58 = vmul.f32 1.442695, %v1275_v51 }
 0x2ea   : > { %3021 = vmatprep.subr.bf16.mxu1 %v3545_v6  ;;  %v1382_v35 = vpop.permute.xlu1 %1381 }
 0x2eb   : > { %3403 = vpow2.f32 %v1284_v29 }
 0x2ec   : > { %v1380_v34 = vpop.permute.xlu0 %1379  ;;  %3405 = vpow2.f32 %v1278_v58 }
 0x2ed   : > { %3022 = vmatpush3.bf16.msra.mxu1 %v1321_v31  ;;  %3407 = vpow2.f32 %v1276_v63 }
 0x2ee   : > { %3027 = vmatprep.subr.bf16.mxu1 %v3545_v6  ;;  %v1386_v39 = vpop.permute.xlu1 %1385 }
 0x2f0   : > { %v1384_v36 = vpop.permute.xlu0 %1383 }
 0x2f2   : > { %v1390_v44 = vpop.permute.xlu1 %1389 }
 0x2f3   : > { %v4016_v38 = vpop.eup %3401 }
 0x2f4   : > { %v1388_v37 = vpop.permute.xlu0 %1387 }
 0x2f5   : > { %v4018_v40 = vpop.eup %3403 }
 0x2f6   : > { %v1297_v28 = vpack.c.bf16 %v4018_v40, %v4016_v38  ;;  %v1394_v50 = vpop.permute.xlu1 %1393  ;;  %v4039_v5 = vpop.eup %3405 }
 0x2f7   : > { %v4042_v8 = vpop.eup %3407 }
 0x2f8   : > { %v1392_v41 = vpop.permute.xlu0 %1391  ;;  %3024 = vmatmul.mubr.bf16.vlgmr.msra.gmra.mrb[28].mxu1 %v1297_v28  ;;  %v1296_v9 = vpack.c.bf16 %v4039_v5, %v4042_v8 }
 0x2f9   : > { %3028 = vmatpush3.bf16.msra.mxu1 %v1380_v34  ;;  %3043 = vmatprep.mubr.msk.bf16.mxu1 %vm3546_vm1, %v3545_v6 }
 0x2fa   : > { %3029 = vmatprep.subr.bf16.mxu1 %v3545_v6  ;;  %v1541_v62 = vpop.permute.xlu1 %1540 }
 0x2fb   : > { %v1560_v17 = vsel %vm1092_vm5, %v1541_v62, 0 }
 0x2fc   : > { %v1453_v48 = vpop.permute.xlu0 %1452 }
 0x2fd   : > { %v1472_v49 = vsel %vm1092_vm5, %v1453_v48, 0  ;;  %3030 = vmatpush3.bf16.msra.mxu1 %v1382_v35 }
 0x2fe   : > { %3048 = vmatpush3.bf16.xpose.msra.mxu0 %v1472_v49  ;;  %3031 = vmatprep.subr.bf16.mxu1 %v3545_v6  ;;  %v1543_v55 = vpop.permute.xlu1 %1542 }
 0x2ff   : > { %3049 = vmatprep.subr.bf16.mxu0 %v3545_v6  ;;  %v1563_v27 = vsel %vm1092_vm5, %v1543_v55, 0 }
 0x300   : > { %v1455_v52 = vpop.permute.xlu0 %1454 }
 0x301   : > { %3032 = vmatpush3.bf16.msra.mxu1 %v1384_v36  ;;  %v1475_v56 = vsel %vm1092_vm5, %v1455_v52, 0 }
 0x302   : > { %3033 = vmatprep.subr.bf16.mxu1 %v3545_v6  ;;  %v1545_v4 = vpop.permute.xlu1 %1544 }
 0x303   : > { %v1566_v35 = vsel %vm1092_vm5, %v1545_v4, 0 }
 0x304   : > { %v1457_v2 = vpop.permute.xlu0 %1456 }
 0x305   : > { %3034 = vmatpush3.bf16.msra.mxu1 %v1386_v39  ;;  %v1478_v54 = vsel %vm1092_vm5, %v1457_v2, 0 }
 0x306   : > { %3050 = vmatpush3.bf16.xpose.msra.mxu0 %v1475_v56  ;;  %3035 = vmatprep.subr.bf16.mxu1 %v3545_v6  ;;  %v1547_v10 = vpop.permute.xlu1 %1546 }
 0x307   : > { %3051 = vmatprep.subr.bf16.mxu0 %v3545_v6  ;;  %v1569_v28 = vsel %vm1092_vm5, %v1547_v10, 0 }
 0x308   : > { %v1459_v3 = vpop.permute.xlu0 %1458 }
 0x309   : > { %3036 = vmatpush3.bf16.msra.mxu1 %v1388_v37  ;;  %v1481_v7 = vsel %vm1092_vm5, %v1459_v3, 0 }
 0x30a   : > { %3037 = vmatprep.subr.bf16.mxu1 %v3545_v6  ;;  %v1549_v20 = vpop.permute.xlu1 %1548 }
 0x30b   : > { %v1572_v49 = vsel %vm1092_vm5, %v1549_v20, 0 }
 0x30c   : > { %v1461_v14 = vpop.permute.xlu0 %1460 }
 0x30d   : > { %3038 = vmatpush3.bf16.msra.mxu1 %v1390_v44  ;;  %v1484_v15 = vsel %vm1092_vm5, %v1461_v14, 0 }
 0x30e   : > { %3052 = vmatpush3.bf16.xpose.msra.mxu0 %v1478_v54  ;;  %3039 = vmatprep.subr.bf16.mxu1 %v3545_v6  ;;  %v1551_v23 = vpop.permute.xlu1 %1550 }
 0x30f   : > { %3053 = vmatprep.subr.bf16.mxu0 %v3545_v6  ;;  %v1575_v52 = vsel %vm1092_vm5, %v1551_v23, 0 }
 0x310   : > { %v1463_v22 = vpop.permute.xlu0 %1462 }
 0x311   : > { %3040 = vmatpush3.bf16.msra.mxu1 %v1392_v41  ;;  %v1487_v25 = vsel %vm1092_vm5, %v1463_v22, 0 }
 0x312   : > { %3041 = vmatprep.subr.bf16.mxu1 %v3545_v6  ;;  %v1553_v31 = vpop.permute.xlu1 %1552 }
 0x313   : > { %v1578_v58 = vsel %vm1092_vm5, %v1553_v31, 0 }
 0x314   : > { %v1465_v29 = vpop.permute.xlu0 %1464 }
 0x315   : > { %3042 = vmatpush3.bf16.msra.mxu1 %v1394_v50  ;;  %v1490_v34 = vsel %vm1092_vm5, %v1465_v29, 0 }
 0x316   : > { %3054 = vmatpush3.bf16.xpose.msra.mxu0 %v1481_v7  ;;  %3067 = vmatprep.subr.bf16.mxu1 %v3545_v6  ;;  %v1555_v36 = vpop.permute.xlu1 %1554 }
 0x317   : > { %3055 = vmatprep.subr.bf16.mxu0 %v3545_v6  ;;  %v1581_v63 = vsel %vm1092_vm5, %v1555_v36, 0 }
 0x318   : > { %3044 = vmatmul.mubr.bf16.vlgmr.msra.gmra.mrb[28].mxu1 %v1296_v9  ;;  %v1467_v37 = vpop.permute.xlu0 %1466 }
 0x319   : > { %3083 = vmatprep.mubr.msk.bf16.mxu1 %vm3546_vm1, %v3545_v6  ;;  %v1493_v39 = vsel %vm1092_vm5, %v1467_v37, 0 }
 0x31a   : > { %v1539_v41 = vpop.permute.xlu1 %1538 }
 0x31c   : > { %v1451_v44 = vpop.permute.xlu0 %1450 }
 0x31e   : > { %3056 = vmatpush3.bf16.xpose.msra.mxu0 %v1484_v15  ;;  %3068 = vmatpush3.bf16.xpose.msra.mxu1 %v1560_v17  ;;  %v1661_v48 = vpop.permute.xlu1 %1660 }
 0x31f   : > { %3057 = vmatprep.subr.bf16.mxu0 %v3545_v6  ;;  %3069 = vmatprep.subr.bf16.mxu1 %v3545_v6 }
 0x320   : > { %v1663_v50 = vpop.permute.xlu0 %1662 }
 0x322   : > { %v1665_v51 = vpop.permute.xlu1 %1664 }
 0x324   : > { %v1669_v56 = vpop.permute.xlu0 %1668 }
 0x326   : > { %3058 = vmatpush3.bf16.xpose.msra.mxu0 %v1487_v25  ;;  %3070 = vmatpush3.bf16.xpose.msra.mxu1 %v1563_v27  ;;  %v1667_v53 = vpop.permute.xlu1 %1666 }
 0x327   : > { %3059 = vmatprep.subr.bf16.mxu0 %v3545_v6  ;;  %3071 = vmatprep.subr.bf16.mxu1 %v3545_v6 }
 0x32a   : > { %v1671_v62 = vpop.permute.xlu1 %1670 }
 0x32e   : > { %3060 = vmatpush3.bf16.xpose.msra.mxu0 %v1490_v34  ;;  %3072 = vmatpush3.bf16.xpose.msra.mxu1 %v1566_v35 }
 0x32f   : > { %3061 = vmatprep.subr.bf16.mxu0 %v3545_v6  ;;  %3073 = vmatprep.subr.bf16.mxu1 %v3545_v6 }
 0x336   : > { %3062 = vmatpush3.bf16.xpose.msra.mxu0 %v1493_v39  ;;  %3074 = vmatpush3.bf16.xpose.msra.mxu1 %v1569_v28 }
 0x337   : > { %3087 = vmatprep.subr.bf16.mxu0 %v3545_v6  ;;  %3075 = vmatprep.subr.bf16.mxu1 %v3545_v6 }
 0x33d   : > { %3064 = vmatmul.mubr.msk.bf16.vlgmr.msra.gmra.mrb[16].mxu0 %vm1092_vm5, %v1451_v44 }
 0x33e   : > { %3088 = vmatpush3.bf16.msra.mxu0 %v1661_v48  ;;  %3103 = vmatprep.mubr.msk.bf16.mxu0 %vm3546_vm1, %v3545_v6 }
 0x33f   : > { %3076 = vmatpush3.bf16.xpose.msra.mxu1 %v1572_v49  ;;  %3089 = vmatprep.subr.bf16.mxu0 %v3545_v6 }
 0x340   : > { %3077 = vmatprep.subr.bf16.mxu1 %v3545_v6 }
 0x342   : > { %3090 = vmatpush3.bf16.msra.mxu0 %v1663_v50 }
 0x343   : > { %3091 = vmatprep.subr.bf16.mxu0 %v3545_v6 }
 0x346   : > { %3092 = vmatpush3.bf16.msra.mxu0 %v1665_v51 }
 0x347   : > { %3078 = vmatpush3.bf16.xpose.msra.mxu1 %v1575_v52  ;;  %3093 = vmatprep.subr.bf16.mxu0 %v3545_v6 }
 0x348   : > { %3079 = vmatprep.subr.bf16.mxu1 %v3545_v6 }
 0x34a   : > { %3094 = vmatpush3.bf16.msra.mxu0 %v1667_v53 }
 0x34b   : > { %3095 = vmatprep.subr.bf16.mxu0 %v3545_v6 }
 0x34e   : > { %3096 = vmatpush3.bf16.msra.mxu0 %v1669_v56 }
 0x34f   : > { %3080 = vmatpush3.bf16.xpose.msra.mxu1 %v1578_v58  ;;  %3097 = vmatprep.subr.bf16.mxu0 %v3545_v6 }
 0x350   : > { %3081 = vmatprep.subr.bf16.mxu1 %v3545_v6 }
 0x352   : > { %3098 = vmatpush3.bf16.msra.mxu0 %v1671_v62 }
 0x353   : > { %3099 = vmatprep.subr.bf16.mxu0 %v3545_v6 }
 0x357   : > { %3082 = vmatpush3.bf16.xpose.msra.mxu1 %v1581_v63 }
 0x358   : > { %3127 = vmatprep.subr.bf16.mxu1 %v3545_v6 }
 0x35e   : > { %3084 = vmatmul.mubr.msk.bf16.vlgmr.msra.gmra.mrb[32].mxu1 %vm1092_vm5, %v1539_v41 }
 0x35f   : > { %3143 = vmatprep.mubr.msk.bf16.mxu1 %vm3546_vm1, %v3545_v6 }
 0x3eb   : > { %v4086_v2 = vpop.f32.mrb[28].mxu1 }
 0x3ec   : > { %v3045_v55 = vpop.f32.mrb[29].mxu1 }
 0x3ed   : > { %v4088_v54 = vpop.f32.mrb[30].mxu1 }
 0x3ee   : > { %v3046_v3 = vpop.f32.mrb[31].mxu1 }
 0x410   : > { %v1529_v4 = vpop.f32.mrb[16].mxu0 }
 0x411   : > { %v1530_v7 = vadd.f32 %v1529_v4, %v3927_v45  ;;  %v3065_v9 = vpop.f32.mrb[17].mxu0 }
 0x412   : > { %v1532_v10 = vpop.f32.mrb[18].mxu0 }
 0x413   : > { %v1533_v14 = vadd.f32 %v1532_v10, %v3927_v45  ;;  %v3066_v15 = vpop.f32.mrb[19].mxu0  ;;  %v4095_v17 = vsel %vm1169_vm6, %v1530_v7, %v3929_v47 }
 0x414   : > { %1626 = vmax.xlane.f32.xlu0 %v4095_v17 }
 0x415   : > { %v4101_v20 = vsel %vm1170_vm7, %v1533_v14, %v3929_v47 }
 0x416   : > { %1628 = vmax.xlane.f32.xlu1 %v4101_v20 }
 0x427   : > { %1674 = vrot.lane.b32.xlu1 %v3905_v26, %s3550_s17 }
 0x42b   : > { %1727 = vrot.lane.b32.xlu1 %v3792_v19, %s3550_s17 }
 0x42f   : > { %1731 = vrot.lane.b32.xlu1 %v3827_v46, %s3550_s17 }
 0x431   : > { %v1617_v22 = vpop.f32.mrb[32].mxu1 }
 0x432   : > { %v1618_v23 = vadd.f32 %v1617_v22, %v3951_v60  ;;  %v3085_v25 = vpop.f32.mrb[33].mxu1 }
 0x433   : > { %v1620_v27 = vpop.f32.mrb[34].mxu1  ;;  %1735 = vrot.lane.b32.xlu1 %v3863_v12, %s3550_s17 }
 0x434   : > { %v1621_v29 = vadd.f32 %v1620_v27, %v3951_v60  ;;  %v3086_v31 = vpop.f32.mrb[35].mxu1  ;;  %v1624_v34 = vsel %vm1169_vm6, %v1618_v23, %v3953_v61 }
 0x435   : > { %1630 = vmax.xlane.f32.xlu0 %v1624_v34 }
 0x436   : > { %v1625_v35 = vsel %vm1170_vm7, %v1621_v29, %v3953_v61 }
 0x437   : > { %1739 = vrot.lane.b32.xlu1 %v3887_v21, %s3550_s17 }
 0x439   : > { %1632 = vmax.xlane.f32.xlu0 %v1625_v35 }
 0x43b   : > { %1886 = vrot.lane.b32.xlu1 %v3817_v43, %s3551_s28 }
 0x43f   : > { %1888 = vrot.lane.b32.xlu1 %v3815_v42, %s3551_s28 }
 0x443   : > { %1890 = vrot.lane.b32.xlu1 %v3851_v0, %s3551_s28 }
 0x447   : > { %1892 = vrot.lane.b32.xlu1 %v3839_v57, %s3551_s28 }
 0x44b   : > { %1894 = vrot.lane.b32.xlu1 %v3865_v13, %s3551_s28 }
 0x44f   : > { %1672 = vrot.lane.b32.xlu0 %v3896_v24, %s3550_s17  ;;  %1896 = vrot.lane.b32.xlu1 %v3861_v11, %s3551_s28 }
 0x453   : > { %1725 = vrot.lane.b32.xlu0 %v3774_v1, %s3550_s17  ;;  %1898 = vrot.lane.b32.xlu1 %v3896_v24, %s3551_s28 }
 0x457   : > { %1729 = vrot.lane.b32.xlu0 %v3806_v32, %s3550_s17  ;;  %1900 = vrot.lane.b32.xlu1 %v3905_v26, %s3551_s28 }
 0x45b   : > { %1733 = vrot.lane.b32.xlu0 %v3841_v59, %s3550_s17  ;;  %1884 = vrot.lane.b32.xlu1 %v3790_v18, %s3552_s19 }
 0x45f   : > { %1737 = vrot.lane.b32.xlu0 %v3879_v16, %s3550_s17  ;;  %2006 = vrot.lane.b32.xlu1 %v3817_v43, %s3552_s19  ;;  %s509_s17 = scalar_lea.vmem [#allocation4], %s2682_s27  ;;  %s3558_s27 = smov [#allocation4]  }
 0x463   : > { %1798 = vrot.lane.b32.xlu0 %v3774_v1, %s3551_s28  ;;  %2010 = vrot.lane.b32.xlu1 %v3851_v0, %s3552_s19 }
 0x467   : > { %1800 = vrot.lane.b32.xlu0 %v3792_v19, %s3551_s28  ;;  %2012 = vrot.lane.b32.xlu1 %v3839_v57, %s3552_s19 }
 0x46b   : > { %1802 = vrot.lane.b32.xlu0 %v3806_v32, %s3551_s28  ;;  %2016 = vrot.lane.b32.xlu1 %v3861_v11, %s3552_s19 }
 0x46f   : > { %1804 = vrot.lane.b32.xlu0 %v3827_v46, %s3551_s28 }
 0x473   : > { %1806 = vrot.lane.b32.xlu0 %v3841_v59, %s3551_s28 }
 0x477   : > { %1808 = vrot.lane.b32.xlu0 %v3863_v12, %s3551_s28 }
 0x47b   : > { %1810 = vrot.lane.b32.xlu0 %v3879_v16, %s3551_s28 }
 0x47f   : > { %1812 = vrot.lane.b32.xlu0 %v3887_v21, %s3551_s28 }
 0x483   : > { %1796 = vrot.lane.b32.xlu0 %v3790_v18, %s3551_s28  ;;  %s2538_s28 = sshll.u32 %s509_s17, 4  ;;  %s4475_s28 = int_to_ptr.vmem [resolvable:$true] %s2538_s28 }
 0x487   : > { %2008 = vrot.lane.b32.xlu0 %v3815_v42, %s3552_s19 }
 0x48b   : > { %2014 = vrot.lane.b32.xlu0 %v3865_v13, %s3552_s19 }
 0x4a1   : > { %v1627_v1 = vpop.xlane.xlu0 %1626 }
 0x4a3   : > { %v1629_v43 = vpop.xlane.xlu1 %1628 }
 0x4a7   : > { %v1675_v36 = vpop.permute.xlu1 %1674 }
 0x4ab   : > { %v1728_v13 = vpop.permute.xlu1 %1727 }
 0x4af   : > { %v1732_v44 = vpop.permute.xlu1 %1731 }
 0x4b3   : > { %v1736_v51 = vpop.permute.xlu1 %1735 }
 0x4b7   : > { %v1740_v56 = vpop.permute.xlu1 %1739 }
 0x4bb   : > { %v1887_v4 = vpop.permute.xlu1 %1886 }
 0x4bf   : > { %v1889_v10 = vpop.permute.xlu1 %1888 }
 0x4c2   : > { %v1631_v19 = vpop.xlane.xlu0 %1630 }
 0x4c3   : > { %v1634_v32 = vmax.f32 %v1627_v1, %v1631_v19 }
 0x4c5   : > { %v1642_v46 = vsub.f32 %v1624_v34, %v1634_v32  ;;  %v1636_v63 = vsub.f32 %v4095_v17, %v1634_v32  ;;  %v1891_v17 = vpop.permute.xlu1 %1890  ;;  %v1906_v34 = vsel %vm1092_vm5, %v1887_v4, 0 }
 0x4c6   : > { %v1633_v57 = vpop.xlane.xlu0 %1632 }
 0x4c7   : > { %v1635_v59 = vmax.f32 %v1629_v43, %v1633_v57  ;;  %v1644_v0 = vmul.f32 1.442695, %v1642_v46  ;;  %v1638_v7 = vmul.f32 1.442695, %v1636_v63  ;;  %v1909_v43 = vsel %vm1092_vm5, %v1889_v10, 0 }
 0x4c9   : > { %v1643_v11 = vsub.f32 %v1625_v35, %v1635_v59  ;;  %3409 = vpow2.f32 %v1644_v0  ;;  %v1637_v58 = vsub.f32 %v4101_v20, %v1635_v59  ;;  %v1893_v27 = vpop.permute.xlu1 %1892  ;;  %v1912_v0 = vsel %vm1092_vm5, %v1891_v17, 0 }
 0x4ca   : > { %v1673_v16 = vpop.permute.xlu0 %1672 }
 0x4cb   : > { %v1646_v37 = vmul.f32 1.442695, %v1643_v11  ;;  %3100 = vmatpush3.bf16.msra.mxu0 %v1673_v16  ;;  %v1640_v3 = vmul.f32 1.442695, %v1637_v58 }
 0x4cc   : > { %3101 = vmatprep.subr.bf16.mxu0 %v3545_v6 }
 0x4cd   : > { %3411 = vpow2.f32 %v1646_v37  ;;  %v1895_v35 = vpop.permute.xlu1 %1894  ;;  %v1915_v37 = vsel %vm1092_vm5, %v1893_v27, 0  ;;  %v4259_v27 = vld [vmem:[#allocation2 + $0x18] sm:$0xff] }
 0x4ce   : > { %v1726_v42 = vpop.permute.xlu0 %1725  ;;  %3413 = vpow2.f32 %v1640_v3 }
 0x4cf   : > { %3102 = vmatpush3.bf16.msra.mxu0 %v1675_v36  ;;  %3415 = vpow2.f32 %v1638_v7 }
 0x4d0   : > { %3107 = vmatprep.subr.bf16.mxu0 %v3545_v6 }
 0x4d1   : > { %v1897_v19 = vpop.permute.xlu1 %1896 }
 0x4d2   : > { %v1730_v39 = vpop.permute.xlu0 %1729 }
 0x4d3   : > { %v4165_v41 = vpop.eup %3409 }
 0x4d5   : > { %v1899_v57 = vpop.permute.xlu1 %1898 }
 0x4d6   : > { %v1734_v28 = vpop.permute.xlu0 %1733 }
 0x4d7   : > { %v4167_v48 = vpop.eup %3411 }
 0x4d8   : > { %v1659_v49 = vpack.c.bf16 %v4167_v48, %v4165_v41  ;;  %v4188_v20 = vpop.eup %3413 }
 0x4d9   : > { %v4191_v23 = vpop.eup %3415  ;;  %v1901_v11 = vpop.permute.xlu1 %1900 }
 0x4da   : > { %v1738_v50 = vpop.permute.xlu0 %1737  ;;  %3104 = vmatmul.mubr.bf16.vlgmr.msra.gmra.mrb[20].mxu0 %v1659_v49  ;;  %v1658_v25 = vpack.c.bf16 %v4188_v20, %v4191_v23  ;;  %v1927_v58 = vsel %vm1092_vm5, %v1901_v11, 0  ;;  %v4283_v11 = vld [vmem:[#allocation2] sm:$0xff] }
 0x4db   : > { %3108 = vmatpush3.bf16.msra.mxu0 %v1726_v42  ;;  %3123 = vmatprep.mubr.msk.bf16.mxu0 %vm3546_vm1, %v3545_v6 }
 0x4dc   : > { %3109 = vmatprep.subr.bf16.mxu0 %v3545_v6 }
 0x4dd   : > { %v1885_v42 = vpop.permute.xlu1 %1884 }
 0x4de   : > { %v1799_v52 = vpop.permute.xlu0 %1798 }
 0x4df   : > { %v1818_v53 = vsel %vm1092_vm5, %v1799_v52, 0  ;;  %3110 = vmatpush3.bf16.msra.mxu0 %v1728_v13 }
 0x4e0   : > { %3128 = vmatpush3.bf16.xpose.msra.mxu1 %v1818_v53  ;;  %3111 = vmatprep.subr.bf16.mxu0 %v3545_v6  ;;  %v1924_v53 = vsel %vm1092_vm5, %v1899_v57, 0  ;;  %v3453_v57 = vld [vmem:[#allocation3 + $0x10] sm:$0xff] }
 0x4e1   : > { %3129 = vmatprep.subr.bf16.mxu1 %v3545_v6 }
 0x4e2   : > { %v1801_v62 = vpop.permute.xlu0 %1800 }
 0x4e3   : > { %3112 = vmatpush3.bf16.msra.mxu0 %v1730_v39  ;;  %v1821_v55 = vsel %vm1092_vm5, %v1801_v62, 0  ;;  %v2007_v39 = vpop.permute.xlu1 %2006 }
 0x4e4   : > { %3113 = vmatprep.subr.bf16.mxu0 %v3545_v6 }
 0x4e6   : > { %v1803_v9 = vpop.permute.xlu0 %1802 }
 0x4e7   : > { %3114 = vmatpush3.bf16.msra.mxu0 %v1732_v44  ;;  %v1824_v14 = vsel %vm1092_vm5, %v1803_v9, 0  ;;  %v2011_v49 = vpop.permute.xlu1 %2010 }
 0x4e8   : > { %3130 = vmatpush3.bf16.xpose.msra.mxu1 %v1821_v55  ;;  %3115 = vmatprep.subr.bf16.mxu0 %v3545_v6 }
 0x4e9   : > { %3131 = vmatprep.subr.bf16.mxu1 %v3545_v6 }
 0x4ea   : > { %v1805_v15 = vpop.permute.xlu0 %1804 }
 0x4eb   : > { %3116 = vmatpush3.bf16.msra.mxu0 %v1734_v28  ;;  %v1827_v22 = vsel %vm1092_vm5, %v1805_v15, 0  ;;  %v1918_v28 = vsel %vm1092_vm5, %v1895_v35, 0 }
 0x4ec   : > { %3117 = vmatprep.subr.bf16.mxu0 %v3545_v6 }
 0x4ee   : > { %v1807_v29 = vpop.permute.xlu0 %1806 }
 0x4ef   : > { %3118 = vmatpush3.bf16.msra.mxu0 %v1736_v51  ;;  %v1830_v31 = vsel %vm1092_vm5, %v1807_v29, 0  ;;  %v2013_v51 = vpop.permute.xlu1 %2012 }
 0x4f0   : > { %3132 = vmatpush3.bf16.xpose.msra.mxu1 %v1824_v14  ;;  %3119 = vmatprep.subr.bf16.mxu0 %v3545_v6 }
 0x4f1   : > { %3133 = vmatprep.subr.bf16.mxu1 %v3545_v6 }
 0x4f2   : > { %v1809_v1 = vpop.permute.xlu0 %1808 }
 0x4f3   : > { %3120 = vmatpush3.bf16.msra.mxu0 %v1738_v50  ;;  %v1833_v32 = vsel %vm1092_vm5, %v1809_v1, 0  ;;  %v1921_v50 = vsel %vm1092_vm5, %v1897_v19, 0 }
 0x4f4   : > { %3121 = vmatprep.subr.bf16.mxu0 %v3545_v6 }
 0x4f6   : > { %v1811_v46 = vpop.permute.xlu0 %1810 }
 0x4f7   : > { %3122 = vmatpush3.bf16.msra.mxu0 %v1740_v56  ;;  %v1836_v59 = vsel %vm1092_vm5, %v1811_v46, 0  ;;  %v2017_v56 = vpop.permute.xlu1 %2016  ;;  %v3451_v46 = vld [vmem:[#allocation3] sm:$0xff] }
 0x4f8   : > { %3134 = vmatpush3.bf16.xpose.msra.mxu1 %v1827_v22  ;;  %3147 = vmatprep.subr.bf16.mxu0 %v3545_v6 }
 0x4f9   : > { %3135 = vmatprep.subr.bf16.mxu1 %v3545_v6 }
 0x4fa   : > { %3124 = vmatmul.mubr.bf16.vlgmr.msra.gmra.mrb[20].mxu0 %v1658_v25  ;;  %v1813_v16 = vpop.permute.xlu0 %1812  ;;  %v4255_v25 = vld [vmem:[#allocation2 + $0x8] sm:$0xff] }
 0x4fb   : > { %3163 = vmatprep.mubr.msk.bf16.mxu0 %vm3546_vm1, %v3545_v6  ;;  %v1839_v36 = vsel %vm1092_vm5, %v1813_v16, 0  ;;  %v4289_v16 = vld [vmem:[#allocation2 + $0x10] sm:$0xff] }
 0x4fe   : > { %v1797_v13 = vpop.permute.xlu0 %1796 }
 0x500   : > { %3136 = vmatpush3.bf16.xpose.msra.mxu1 %v1830_v31  ;;  %3148 = vmatpush3.bf16.xpose.msra.mxu0 %v1906_v34 }
 0x501   : > { %3137 = vmatprep.subr.bf16.mxu1 %v3545_v6  ;;  %3149 = vmatprep.subr.bf16.mxu0 %v3545_v6 }
 0x502   : > { %v2009_v44 = vpop.permute.xlu0 %2008 }
 0x506   : > { %v2015_v52 = vpop.permute.xlu0 %2014 }
 0x508   : > { %3138 = vmatpush3.bf16.xpose.msra.mxu1 %v1833_v32  ;;  %3150 = vmatpush3.bf16.xpose.msra.mxu0 %v1909_v43 }
 0x509   : > { %3139 = vmatprep.subr.bf16.mxu1 %v3545_v6  ;;  %3151 = vmatprep.subr.bf16.mxu0 %v3545_v6 }
 0x510   : > { %3140 = vmatpush3.bf16.xpose.msra.mxu1 %v1836_v59  ;;  %3152 = vmatpush3.bf16.xpose.msra.mxu0 %v1912_v0  ;;  %v3454_v59 = vld [vmem:[#allocation3 + $0x18] sm:$0xff]  ;;  %v3455_v0 = vld [vmem:[#allocation3 + $0x20] sm:$0xff] }
 0x511   : > { %3141 = vmatprep.subr.bf16.mxu1 %v3545_v6  ;;  %3153 = vmatprep.subr.bf16.mxu0 %v3545_v6 }
 0x518   : > { %3142 = vmatpush3.bf16.xpose.msra.mxu1 %v1839_v36  ;;  %3154 = vmatpush3.bf16.xpose.msra.mxu0 %v1915_v37  ;;  %v4295_v36 = vld [vmem:[#allocation2 + $0x20] sm:$0xff]  ;;  %v4301_v37 = vld [vmem:[#allocation2 + $0x30] sm:$0xff] }
 0x519   : > { %3167 = vmatprep.subr.bf16.mxu1 %v3545_v6  ;;  %3155 = vmatprep.subr.bf16.mxu0 %v3545_v6 }
 0x51f   : > { %3144 = vmatmul.mubr.msk.bf16.vlgmr.msra.gmra.mrb[36].mxu1 %vm1092_vm5, %v1797_v13 }
 0x520   : > { %3168 = vmatpush3.bf16.msra.mxu1 %v2007_v39  ;;  %3183 = vmatprep.mubr.msk.bf16.mxu1 %vm3546_vm1, %v3545_v6 }
 0x521   : > { %3156 = vmatpush3.bf16.xpose.msra.mxu0 %v1918_v28  ;;  %3169 = vmatprep.subr.bf16.mxu1 %v3545_v6 }
 0x522   : > { %3157 = vmatprep.subr.bf16.mxu0 %v3545_v6 }
 0x524   : > { %3170 = vmatpush3.bf16.msra.mxu1 %v2009_v44 }
 0x525   : > { %3171 = vmatprep.subr.bf16.mxu1 %v3545_v6 }
 0x528   : > { %3172 = vmatpush3.bf16.msra.mxu1 %v2011_v49 }
 0x529   : > { %3158 = vmatpush3.bf16.xpose.msra.mxu0 %v1921_v50  ;;  %3173 = vmatprep.subr.bf16.mxu1 %v3545_v6 }
 0x52a   : > { %3159 = vmatprep.subr.bf16.mxu0 %v3545_v6 }
 0x52c   : > { %3174 = vmatpush3.bf16.msra.mxu1 %v2013_v51 }
 0x52d   : > { %3175 = vmatprep.subr.bf16.mxu1 %v3545_v6 }
 0x530   : > { %3176 = vmatpush3.bf16.msra.mxu1 %v2015_v52 }
 0x531   : > { %3160 = vmatpush3.bf16.xpose.msra.mxu0 %v1924_v53  ;;  %3177 = vmatprep.subr.bf16.mxu1 %v3545_v6 }
 0x532   : > { %3161 = vmatprep.subr.bf16.mxu0 %v3545_v6 }
 0x534   : > { %3178 = vmatpush3.bf16.msra.mxu1 %v2017_v56 }
 0x535   : > { %3179 = vmatprep.subr.bf16.mxu1 %v3545_v6 }
 0x539   : > { %3162 = vmatpush3.bf16.xpose.msra.mxu0 %v1927_v58 }
 0x53a   : > { %3207 = vmatprep.subr.bf16.mxu0 %v3545_v6 }
 0x540   : > { %3164 = vmatmul.mubr.msk.bf16.vlgmr.msra.gmra.mrb[24].mxu0 %vm1092_vm5, %v1885_v42 }
 0x541   : > { %3223 = vmatprep.mubr.msk.bf16.mxu0 %vm3546_vm1, %v3545_v6 }
 0x5cd   : > { %v4235_v62 = vpop.f32.mrb[20].mxu0 }
 0x5ce   : > { %v3125_v63 = vpop.f32.mrb[21].mxu0 }
 0x5cf   : > { %v4237_v55 = vpop.f32.mrb[22].mxu0 }
 0x5d0   : > { %v3126_v3 = vpop.f32.mrb[23].mxu0 }
 0x5f2   : > { %v1875_v4 = vpop.f32.mrb[36].mxu1 }
 0x5f3   : > { %v1876_v7 = vadd.f32 %v1875_v4, %v3927_v45  ;;  %v3145_v9 = vpop.f32.mrb[37].mxu1 }
 0x5f4   : > { %v1878_v10 = vpop.f32.mrb[38].mxu1 }
 0x5f5   : > { %v1879_v14 = vadd.f32 %v1878_v10, %v3927_v45  ;;  %v3146_v15 = vpop.f32.mrb[39].mxu1  ;;  %v4244_v17 = vsel %vm1169_vm6, %v1876_v7, %v3929_v47 }
 0x5f6   : > { %1972 = vmax.xlane.f32.xlu0 %v4244_v17 }
 0x5f7   : > { %v4250_v22 = vsel %vm1170_vm7, %v1879_v14, %v3929_v47 }
 0x5f8   : > { %1974 = vmax.xlane.f32.xlu1 %v4250_v22 }
 0x609   : > { %2020 = vrot.lane.b32.xlu1 %v3905_v26, %s3552_s19 }
 0x60d   : > { %2073 = vrot.lane.b32.xlu1 %v4255_v25, %s3552_s19 }
 0x611   : > { %2077 = vrot.lane.b32.xlu1 %v4259_v27, %s3552_s19 }
 0x613   : > { %v1963_v29 = vpop.f32.mrb[24].mxu0 }
 0x614   : > { %v1964_v31 = vadd.f32 %v1963_v29, %v3951_v60  ;;  %v3165_v34 = vpop.f32.mrb[25].mxu0 }
 0x615   : > { %v1966_v35 = vpop.f32.mrb[26].mxu0  ;;  %2081 = vrot.lane.b32.xlu1 %v3863_v12, %s3552_s19  ;;  %v3452_v12 = vld [vmem:[#allocation3 + $0x8] sm:$0xff] }
 0x616   : > { %v1967_v1 = vadd.f32 %v1966_v35, %v3951_v60  ;;  %v3166_v19 = vpop.f32.mrb[27].mxu0  ;;  %v1970_v32 = vsel %vm1169_vm6, %v1964_v31, %v3953_v61 }
 0x617   : > { %1976 = vmax.xlane.f32.xlu0 %v1970_v32 }
 0x618   : > { %v1971_v43 = vsel %vm1170_vm7, %v1967_v1, %v3953_v61 }
 0x619   : > { %2085 = vrot.lane.b32.xlu1 %v3887_v21, %s3552_s19  ;;  %v3456_v21 = vld [vmem:[#allocation3 + $0x28] sm:$0xff] }
 0x61b   : > { %1978 = vmax.xlane.f32.xlu0 %v1971_v43 }
 0x61d   : > { %2232 = vrot.lane.b32.xlu1 %v3451_v46, %s3553_s14 }
 0x621   : > { %2234 = vrot.lane.b32.xlu1 %v3452_v12, %s3553_s14 }
 0x625   : > { %2236 = vrot.lane.b32.xlu1 %v3453_v57, %s3553_s14 }
 0x629   : > { %2238 = vrot.lane.b32.xlu1 %v3454_v59, %s3553_s14 }
 0x62d   : > { %2240 = vrot.lane.b32.xlu1 %v3455_v0, %s3553_s14 }
 0x631   : > { %2018 = vrot.lane.b32.xlu0 %v3896_v24, %s3552_s19  ;;  %2242 = vrot.lane.b32.xlu1 %v3456_v21, %s3553_s14 }
 0x635   : > { %2071 = vrot.lane.b32.xlu0 %v4283_v11, %s3552_s19  ;;  %2244 = vrot.lane.b32.xlu1 %v3896_v24, %s3553_s14  ;;  %v4319_v24 = vld [vmem:[#allocation2 + $0x28] sm:$0xff] }
 0x639   : > { %2075 = vrot.lane.b32.xlu0 %v4289_v16, %s3552_s19  ;;  %2246 = vrot.lane.b32.xlu1 %v3905_v26, %s3553_s14  ;;  %v4325_v26 = vld [vmem:[#allocation2 + $0x38] sm:$0xff] }
 0x63d   : > { %2079 = vrot.lane.b32.xlu0 %v4295_v36, %s3552_s19  ;;  %2230 = vrot.lane.b32.xlu1 %v3790_v18, %s3554_s18 }
 0x641   : > { %2083 = vrot.lane.b32.xlu0 %v4301_v37, %s3552_s19  ;;  %2352 = vrot.lane.b32.xlu1 %v3451_v46, %s3554_s18  ;;  %s2751_s19 = sshll.u32 %s3535_s24, 8  ;;  %s4484_s24 = scalar_lea.sflag [#allocation5], %s507_s30 }
 0x645   : > { %2144 = vrot.lane.b32.xlu0 %v4283_v11, %s3553_s14  ;;  %2356 = vrot.lane.b32.xlu1 %v3453_v57, %s3554_s18 }
 0x649   : > { %2146 = vrot.lane.b32.xlu0 %v4255_v25, %s3553_s14  ;;  %2358 = vrot.lane.b32.xlu1 %v3454_v59, %s3554_s18 }
 0x64d   : > { %2148 = vrot.lane.b32.xlu0 %v4289_v16, %s3553_s14  ;;  %2362 = vrot.lane.b32.xlu1 %v3456_v21, %s3554_s18 }
 0x651   : > { %2150 = vrot.lane.b32.xlu0 %v4259_v27, %s3553_s14 }
 0x655   : > { %2152 = vrot.lane.b32.xlu0 %v4295_v36, %s3553_s14 }
 0x659   : > { %2154 = vrot.lane.b32.xlu0 %v4319_v24, %s3553_s14 }
 0x65d   : > { %2156 = vrot.lane.b32.xlu0 %v4301_v37, %s3553_s14 }
 0x661   : > { %2158 = vrot.lane.b32.xlu0 %v4325_v26, %s3553_s14 }
 0x665   : > { %2142 = vrot.lane.b32.xlu0 %v3790_v18, %s3553_s14 }
 0x669   : > { %2354 = vrot.lane.b32.xlu0 %v3452_v12, %s3554_s18 }
 0x66d   : > { %2360 = vrot.lane.b32.xlu0 %v3455_v0, %s3554_s18 }
 0x683   : > { %v1973_v42 = vpop.xlane.xlu0 %1972 }
 0x685   : > { %v1975_v28 = vpop.xlane.xlu1 %1974 }
 0x689   : > { %v2021_v56 = vpop.permute.xlu1 %2020 }
 0x68d   : > { %v2074_v63 = vpop.permute.xlu1 %2073 }
 0x691   : > { %v2078_v9 = vpop.permute.xlu1 %2077 }
 0x695   : > { %v2082_v29 = vpop.permute.xlu1 %2081 }
 0x699   : > { %v2086_v35 = vpop.permute.xlu1 %2085 }
 0x69d   : > { %v2233_v12 = vpop.permute.xlu1 %2232 }
 0x6a4   : > { %v1977_v13 = vpop.xlane.xlu0 %1976 }
 0x6a5   : > { %v1980_v39 = vmax.f32 %v1973_v42, %v1977_v13 }
 0x6a7   : > { %v1988_v44 = vsub.f32 %v1970_v32, %v1980_v39  ;;  %v1982_v32 = vsub.f32 %v4244_v17, %v1980_v39 }
 0x6a8   : > { %v1979_v49 = vpop.xlane.xlu0 %1978 }
 0x6a9   : > { %v1981_v50 = vmax.f32 %v1975_v28, %v1979_v49  ;;  %v1990_v51 = vmul.f32 1.442695, %v1988_v44  ;;  %v1984_v57 = vmul.f32 1.442695, %v1982_v32 }
 0x6ab   : > { %v1989_v52 = vsub.f32 %v1971_v43, %v1981_v50  ;;  %3417 = vpow2.f32 %v1990_v51  ;;  %v1983_v1 = vsub.f32 %v4250_v22, %v1981_v50  ;;  %v2235_v22 = vpop.permute.xlu1 %2234  ;;  %v2252_v51 = vsel %vm1092_vm5, %v2233_v12, 0 }
 0x6ac   : > { %v2019_v53 = vpop.permute.xlu0 %2018 }
 0x6ad   : > { %v1992_v58 = vmul.f32 1.442695, %v1989_v52  ;;  %3180 = vmatpush3.bf16.msra.mxu1 %v2019_v53  ;;  %v1986_v46 = vmul.f32 1.442695, %v1983_v1 }
 0x6ae   : > { %3181 = vmatprep.subr.bf16.mxu1 %v3545_v6 }
 0x6af   : > { %3419 = vpow2.f32 %v1992_v58  ;;  %v2237_v21 = vpop.permute.xlu1 %2236 }
 0x6b0   : > { %v2072_v18 = vpop.permute.xlu0 %2071  ;;  %3421 = vpow2.f32 %v1986_v46 }
 0x6b1   : > { %3182 = vmatpush3.bf16.msra.mxu1 %v2021_v56  ;;  %3423 = vpow2.f32 %v1984_v57 }
 0x6b2   : > { %3187 = vmatprep.subr.bf16.mxu1 %v3545_v6 }
 0x6b3   : > { %v2239_v44 = vpop.permute.xlu1 %2238 }
 0x6b4   : > { %v2076_v3 = vpop.permute.xlu0 %2075 }
 0x6b5   : > { %v4335_v7 = vpop.eup %3417 }
 0x6b7   : > { %v2241_v52 = vpop.permute.xlu1 %2240 }
 0x6b8   : > { %v2080_v4 = vpop.permute.xlu0 %2079 }
 0x6b9   : > { %v4337_v10 = vpop.eup %3419 }
 0x6ba   : > { %v2005_v14 = vpack.c.bf16 %v4337_v10, %v4335_v7  ;;  %v4358_v42 = vpop.eup %3421 }
 0x6bb   : > { %v4361_v39 = vpop.eup %3423  ;;  %v2243_v56 = vpop.permute.xlu1 %2242 }
 0x6bc   : > { %v2084_v15 = vpop.permute.xlu0 %2083  ;;  %3184 = vmatmul.mubr.bf16.vlgmr.msra.gmra.mrb[40].mxu1 %v2005_v14  ;;  %v2004_v28 = vpack.c.bf16 %v4358_v42, %v4361_v39  ;;  %v2267_v46 = vsel %vm1092_vm5, %v2243_v56, 0 }
 0x6bd   : > { %3188 = vmatpush3.bf16.msra.mxu1 %v2072_v18  ;;  %3203 = vmatprep.mubr.msk.bf16.mxu1 %vm3546_vm1, %v3545_v6  ;;  %v2255_v18 = vsel %vm1092_vm5, %v2235_v22, 0 }
 0x6be   : > { %3189 = vmatprep.subr.bf16.mxu1 %v3545_v6 }
 0x6c0   : > { %v2145_v31 = vpop.permute.xlu0 %2144 }
 0x6c1   : > { %v2164_v34 = vsel %vm1092_vm5, %v2145_v31, 0  ;;  %3190 = vmatpush3.bf16.msra.mxu1 %v2074_v63  ;;  %v2261_v31 = vsel %vm1092_vm5, %v2239_v44, 0 }
 0x6c2   : > { %3208 = vmatpush3.bf16.xpose.msra.mxu0 %v2164_v34  ;;  %3191 = vmatprep.subr.bf16.mxu1 %v3545_v6 }
 0x6c3   : > { %3209 = vmatprep.subr.bf16.mxu0 %v3545_v6 }
 0x6c4   : > { %v2147_v19 = vpop.permute.xlu0 %2146 }
 0x6c5   : > { %3192 = vmatpush3.bf16.msra.mxu1 %v2076_v3  ;;  %v2167_v43 = vsel %vm1092_vm5, %v2147_v19, 0  ;;  %v2245_v3 = vpop.permute.xlu1 %2244  ;;  %v2264_v19 = vsel %vm1092_vm5, %v2241_v52, 0 }
 0x6c6   : > { %3193 = vmatprep.subr.bf16.mxu1 %v3545_v6 }
 0x6c8   : > { %v2149_v59 = vpop.permute.xlu0 %2148 }
 0x6c9   : > { %3194 = vmatpush3.bf16.msra.mxu1 %v2078_v9  ;;  %v2170_v17 = vsel %vm1092_vm5, %v2149_v59, 0  ;;  %v2258_v9 = vsel %vm1092_vm5, %v2237_v21, 0  ;;  %v2247_v14 = vpop.permute.xlu1 %2246  ;;  %v2270_v59 = vsel %vm1092_vm5, %v2245_v3, 0 }
 0x6ca   : > { %3210 = vmatpush3.bf16.xpose.msra.mxu0 %v2167_v43  ;;  %3195 = vmatprep.subr.bf16.mxu1 %v3545_v6 }
 0x6cb   : > { %3211 = vmatprep.subr.bf16.mxu0 %v3545_v6 }
 0x6cc   : > { %v2151_v0 = vpop.permute.xlu0 %2150 }
 0x6cd   : > { %3196 = vmatpush3.bf16.msra.mxu1 %v2080_v4  ;;  %v2173_v13 = vsel %vm1092_vm5, %v2151_v0, 0  ;;  %v2231_v34 = vpop.permute.xlu1 %2230 }
 0x6ce   : > { %3197 = vmatprep.subr.bf16.mxu1 %v3545_v6 }
 0x6d0   : > { %v2153_v49 = vpop.permute.xlu0 %2152 }
 0x6d1   : > { %3198 = vmatpush3.bf16.msra.mxu1 %v2082_v29  ;;  %v2176_v50 = vsel %vm1092_vm5, %v2153_v49, 0  ;;  %v2353_v1 = vpop.permute.xlu1 %2352 }
 0x6d2   : > { %3212 = vmatpush3.bf16.xpose.msra.mxu0 %v2170_v17  ;;  %3199 = vmatprep.subr.bf16.mxu1 %v3545_v6  ;;  %v2273_v17 = vsel %vm1092_vm5, %v2247_v14, 0 }
 0x6d3   : > { %3213 = vmatprep.subr.bf16.mxu0 %v3545_v6 }
 0x6d4   : > { %v2155_v53 = vpop.permute.xlu0 %2154 }
 0x6d5   : > { %3200 = vmatpush3.bf16.msra.mxu1 %v2084_v15  ;;  %v2179_v58 = vsel %vm1092_vm5, %v2155_v53, 0  ;;  %v2357_v43 = vpop.permute.xlu1 %2356 }
 0x6d6   : > { %3201 = vmatprep.subr.bf16.mxu1 %v3545_v6 }
 0x6d8   : > { %v2157_v63 = vpop.permute.xlu0 %2156 }
 0x6d9   : > { %3202 = vmatpush3.bf16.msra.mxu1 %v2086_v35  ;;  %v2182_v4 = vsel %vm1092_vm5, %v2157_v63, 0  ;;  %v2359_v12 = vpop.permute.xlu1 %2358 }
 0x6da   : > { %3214 = vmatpush3.bf16.xpose.msra.mxu0 %v2173_v13  ;;  %3227 = vmatprep.subr.bf16.mxu1 %v3545_v6 }
 0x6db   : > { %3215 = vmatprep.subr.bf16.mxu0 %v3545_v6 }
 0x6dc   : > { %3204 = vmatmul.mubr.bf16.vlgmr.msra.gmra.mrb[40].mxu1 %v2004_v28  ;;  %v2159_v15 = vpop.permute.xlu0 %2158 }
 0x6dd   : > { %3243 = vmatprep.mubr.msk.bf16.mxu1 %vm3546_vm1, %v3545_v6  ;;  %v2185_v29 = vsel %vm1092_vm5, %v2159_v15, 0  ;;  %v2363_v22 = vpop.permute.xlu1 %2362 }
 0x6e0   : > { %v2143_v35 = vpop.permute.xlu0 %2142 }
 0x6e2   : > { %3216 = vmatpush3.bf16.xpose.msra.mxu0 %v2176_v50  ;;  %3228 = vmatpush3.bf16.xpose.msra.mxu1 %v2252_v51 }
 0x6e3   : > { %3217 = vmatprep.subr.bf16.mxu0 %v3545_v6  ;;  %3229 = vmatprep.subr.bf16.mxu1 %v3545_v6 }
 0x6e4   : > { %v2355_v32 = vpop.permute.xlu0 %2354 }
 0x6e8   : > { %v2361_v57 = vpop.permute.xlu0 %2360 }
 0x6ea   : > { %3218 = vmatpush3.bf16.xpose.msra.mxu0 %v2179_v58  ;;  %3230 = vmatpush3.bf16.xpose.msra.mxu1 %v2255_v18  ;;  %v3463_v18 = vld [vmem:[#allocation3 + $0x38] sm:$0xff] }
 0x6eb   : > { %3219 = vmatprep.subr.bf16.mxu0 %v3545_v6  ;;  %3231 = vmatprep.subr.bf16.mxu1 %v3545_v6 }
 0x6f2   : > { %3220 = vmatpush3.bf16.xpose.msra.mxu0 %v2182_v4  ;;  %3232 = vmatpush3.bf16.xpose.msra.mxu1 %v2258_v9 }
 0x6f3   : > { %3221 = vmatprep.subr.bf16.mxu0 %v3545_v6  ;;  %3233 = vmatprep.subr.bf16.mxu1 %v3545_v6 }
 0x6fa   : > { %3222 = vmatpush3.bf16.xpose.msra.mxu0 %v2185_v29  ;;  %3234 = vmatpush3.bf16.xpose.msra.mxu1 %v2261_v31 }
 0x6fb   : > { %3247 = vmatprep.subr.bf16.mxu0 %v3545_v6  ;;  %3235 = vmatprep.subr.bf16.mxu1 %v3545_v6 }
 0x701   : > { %3224 = vmatmul.mubr.msk.bf16.vlgmr.msra.gmra.mrb[28].mxu0 %vm1092_vm5, %v2143_v35 }
 0x702   : > { %3248 = vmatpush3.bf16.msra.mxu0 %v2353_v1  ;;  %3263 = vmatprep.mubr.msk.bf16.mxu0 %vm3546_vm1, %v3545_v6 }
 0x703   : > { %3236 = vmatpush3.bf16.xpose.msra.mxu1 %v2264_v19  ;;  %3249 = vmatprep.subr.bf16.mxu0 %v3545_v6 }
 0x704   : > { %3237 = vmatprep.subr.bf16.mxu1 %v3545_v6 }
 0x706   : > { %3250 = vmatpush3.bf16.msra.mxu0 %v2355_v32 }
 0x707   : > { %3251 = vmatprep.subr.bf16.mxu0 %v3545_v6 }
 0x70a   : > { %3252 = vmatpush3.bf16.msra.mxu0 %v2357_v43 }
 0x70b   : > { %3238 = vmatpush3.bf16.xpose.msra.mxu1 %v2267_v46  ;;  %3253 = vmatprep.subr.bf16.mxu0 %v3545_v6 }
 0x70c   : > { %3239 = vmatprep.subr.bf16.mxu1 %v3545_v6 }
 0x70e   : > { %3254 = vmatpush3.bf16.msra.mxu0 %v2359_v12 }
 0x70f   : > { %3255 = vmatprep.subr.bf16.mxu0 %v3545_v6 }
 0x712   : > { %3256 = vmatpush3.bf16.msra.mxu0 %v2361_v57 }
 0x713   : > { %3240 = vmatpush3.bf16.xpose.msra.mxu1 %v2270_v59  ;;  %3257 = vmatprep.subr.bf16.mxu0 %v3545_v6 }
 0x714   : > { %3241 = vmatprep.subr.bf16.mxu1 %v3545_v6 }
 0x716   : > { %3258 = vmatpush3.bf16.msra.mxu0 %v2363_v22 }
 0x717   : > { %3259 = vmatprep.subr.bf16.mxu0 %v3545_v6 }
 0x71b   : > { %3242 = vmatpush3.bf16.xpose.msra.mxu1 %v2273_v17 }
 0x722   : > { %3244 = vmatmul.mubr.msk.bf16.vlgmr.msra.gmra.mrb[44].mxu1 %vm1092_vm5, %v2231_v34 }
 0x7af   : > { %v4402_v0 = vpop.f32.mrb[40].mxu1 }
 0x7b0   : > { %v3205_v21 = vpop.f32.mrb[41].mxu1 }
 0x7b1   : > { %v4404_v13 = vpop.f32.mrb[42].mxu1 }
 0x7b2   : > { %v3206_v28 = vpop.f32.mrb[43].mxu1 }
 0x7d4   : > { %v2221_v44 = vpop.f32.mrb[28].mxu0 }
 0x7d5   : > { %v2222_v49 = vadd.f32 %v2221_v44, %v3927_v45  ;;  %v3225_v50 = vpop.f32.mrb[29].mxu0 }
 0x7d6   : > { %v2224_v51 = vpop.f32.mrb[30].mxu0 }
 0x7d7   : > { %v2225_v52 = vadd.f32 %v2224_v51, %v3927_v45  ;;  %v3226_v53 = vpop.f32.mrb[31].mxu0  ;;  %v2228_v56 = vsel %vm1169_vm6, %v2222_v49, %v3929_v47 }
 0x7d8   : > { %2318 = vmax.xlane.f32.xlu0 %v2228_v56 }
 0x7d9   : > { %v2229_v58 = vsel %vm1170_vm7, %v2225_v52, %v3929_v47 }
 0x7da   : > { %2320 = vmax.xlane.f32.xlu1 %v2229_v58 }
 0x7eb   : > { %2366 = vrot.lane.b32.xlu1 %v3463_v18, %s3554_s18 }
 0x7ef   : > { %2419 = vrot.lane.b32.xlu1 %v4255_v25, %s3554_s18 }
 0x7f3   : > { %2423 = vrot.lane.b32.xlu1 %v4259_v27, %s3554_s18  ;;  %v3464_v27 = vld [vmem:[#allocation3 + $0x30] sm:$0xff] }
 0x7f5   : > { %v2309_v45 = vpop.f32.mrb[44].mxu1 }
 0x7f6   : > { %v2310_v63 = vadd.f32 %v2309_v45, %v3951_v60  ;;  %v3245_v3 = vpop.f32.mrb[45].mxu1 }
 0x7f7   : > { %v2312_v4 = vpop.f32.mrb[46].mxu1  ;;  %2427 = vrot.lane.b32.xlu1 %v4319_v24, %s3554_s18 }
 0x7f8   : > { %v2313_v47 = vadd.f32 %v2312_v4, %v3951_v60  ;;  %v3246_v9 = vpop.f32.mrb[47].mxu1  ;;  %v2316_v14 = vsel %vm1169_vm6, %v2310_v63, %v3953_v61 }
 0x7f9   : > { %2322 = vmax.xlane.f32.xlu0 %v2316_v14 }
 0x7fa   : > { %v2317_v25 = vsel %vm1170_vm7, %v2313_v47, %v3953_v61 }
 0x7fb   : > { %2431 = vrot.lane.b32.xlu1 %v4325_v26, %s3554_s18 }
 0x7fd   : > { %2324 = vmax.xlane.f32.xlu0 %v2317_v25 }
 0x813   : > { %2364 = vrot.lane.b32.xlu0 %v3464_v27, %s3554_s18 }
 0x817   : > { %2417 = vrot.lane.b32.xlu0 %v4283_v11, %s3554_s18 }
 0x81b   : > { %2421 = vrot.lane.b32.xlu0 %v4289_v16, %s3554_s18 }
 0x81f   : > { %2425 = vrot.lane.b32.xlu0 %v4295_v36, %s3554_s18  ;;  %1650 = vadd.xlane.f32.xlu1 %v4188_v20 }
 0x823   : > { %2429 = vrot.lane.b32.xlu0 %v4301_v37, %s3554_s18  ;;  %1994 = vadd.xlane.f32.xlu1 %v4361_v39 }
 0x827   : > { %1998 = vadd.xlane.f32.xlu1 %v4335_v7 }
 0x842   : > { %1648 = vadd.xlane.f32.xlu0 %v4191_v23 }
 0x846   : > { %1652 = vadd.xlane.f32.xlu0 %v4165_v41 }
 0x84a   : > { %1654 = vadd.xlane.f32.xlu0 %v4167_v48 }
 0x84e   : > { %1996 = vadd.xlane.f32.xlu0 %v4358_v42 }
 0x852   : > { %2000 = vadd.xlane.f32.xlu0 %v4337_v10 }
 0x865   : > { %v2319_v30 = vpop.xlane.xlu0 %2318 }
 0x867   : > { %v2321_v11 = vpop.xlane.xlu1 %2320 }
 0x86b   : > { %v2367_v10 = vpop.permute.xlu1 %2366 }
 0x86f   : > { %v2420_v35 = vpop.permute.xlu1 %2419 }
 0x886   : > { %v2323_v33 = vpop.xlane.xlu0 %2322 }
 0x887   : > { %v2326_v60 = vmax.f32 %v2319_v30, %v2323_v33 }
 0x889   : > { %v2328_v61 = vsub.f32 %v2228_v56, %v2326_v60  ;;  %v2334_v20 = vsub.f32 %v2316_v14, %v2326_v60 }
 0x88a   : > { %v2325_v16 = vpop.xlane.xlu0 %2324 }
 0x88b   : > { %v2330_v36 = vmul.f32 1.442695, %v2328_v61  ;;  %v2327_v37 = vmax.f32 %v2321_v11, %v2325_v16  ;;  %v2336_v24 = vmul.f32 1.442695, %v2334_v20 }
 0x88d   : > { %3425 = vpow2.f32 %v2330_v36  ;;  %v2329_v23 = vsub.f32 %v2229_v58, %v2327_v37  ;;  %v2335_v26 = vsub.f32 %v2317_v25, %v2327_v37 }
 0x88e   : > { %v2365_v41 = vpop.permute.xlu0 %2364  ;;  %3427 = vpow2.f32 %v2336_v24 }
 0x88f   : > { %v2332_v7 = vmul.f32 1.442695, %v2329_v23  ;;  %v2338_v48 = vmul.f32 1.442695, %v2335_v26  ;;  %3260 = vmatpush3.bf16.msra.mxu0 %v2365_v41 }
 0x890   : > { %3261 = vmatprep.subr.bf16.mxu0 %v3545_v6 }
 0x891   : > { %3429 = vpow2.f32 %v2332_v7 }
 0x892   : > { %3431 = vpow2.f32 %v2338_v48  ;;  %v2418_v34 = vpop.permute.xlu0 %2417 }
 0x893   : > { %3262 = vmatpush3.bf16.msra.mxu0 %v2367_v10 }
 0x894   : > { %3267 = vmatprep.subr.bf16.mxu0 %v3545_v6 }
 0x896   : > { %v2422_v1 = vpop.permute.xlu0 %2421 }
 0x897   : > { %v3426_v42 = vpop.eup %3425 }
 0x898   : > { %2340 = vadd.xlane.f32.xlu1 %v3426_v42  ;;  %v3428_v39 = vpop.eup %3427 }
 0x89a   : > { %v2426_v19 = vpop.permute.xlu0 %2425 }
 0x89b   : > { %v3430_v15 = vpop.eup %3429 }
 0x89c   : > { %v3432_v29 = vpop.eup %3431  ;;  %2344 = vadd.xlane.f32.xlu1 %v3428_v39  ;;  %2342 = vadd.xlane.f32.xlu0 %v3430_v15 }
 0x89d   : > { %v2351_v31 = vpack.c.bf16 %v3432_v29, %v3428_v39 }
 0x89f   : > { %3264 = vmatmul.mubr.bf16.vlgmr.msra.gmra.mrb[32].mxu0 %v2351_v31 }
 0x8a0   : > { %3268 = vmatpush3.bf16.msra.mxu0 %v2418_v34  ;;  %1286 = vadd.xlane.f32.xlu1 %v4042_v8  ;;  %v2424_v8 = vpop.permute.xlu1 %2423 }
 0x8a1   : > { %2346 = vadd.xlane.f32.xlu0 %v3432_v29  ;;  %3269 = vmatprep.subr.bf16.mxu0 %v3545_v6 }
 0x8a2   : > { %3283 = vmatprep.mubr.msk.bf16.mxu0 %vm3546_vm1, %v3545_v6 }
 0x8a4   : > { %3270 = vmatpush3.bf16.msra.mxu0 %v2420_v35  ;;  %1290 = vadd.xlane.f32.xlu1 %v4016_v38  ;;  %v2428_v32 = vpop.permute.xlu1 %2427  ;;  %v2430_v38 = vpop.permute.xlu0 %2429 }
 0x8a5   : > { %1288 = vadd.xlane.f32.xlu0 %v4039_v5  ;;  %3271 = vmatprep.subr.bf16.mxu0 %v3545_v6 }
 0x8a8   : > { %3272 = vmatpush3.bf16.msra.mxu0 %v2422_v1  ;;  %v2432_v5 = vpop.permute.xlu1 %2431 }
 0x8a9   : > { %1292 = vadd.xlane.f32.xlu0 %v4018_v40  ;;  %3273 = vmatprep.subr.bf16.mxu0 %v3545_v6  ;;  %v2350_v40 = vpack.c.bf16 %v3430_v15, %v3426_v42 }
 0x8ac   : > { %3274 = vmatpush3.bf16.msra.mxu0 %v2424_v8  ;;  %v1651_v43 = vpop.xlane.xlu1 %1650 }
 0x8ad   : > { %3275 = vmatprep.subr.bf16.mxu0 %v3545_v6 }
 0x8b0   : > { %3276 = vmatpush3.bf16.msra.mxu0 %v2426_v19  ;;  %v1995_v46 = vpop.xlane.xlu1 %1994 }
 0x8b1   : > { %3277 = vmatprep.subr.bf16.mxu0 %v3545_v6 }
 0x8b4   : > { %3278 = vmatpush3.bf16.msra.mxu0 %v2428_v32  ;;  %v1999_v12 = vpop.xlane.xlu1 %1998 }
 0x8b5   : > { %3279 = vmatprep.subr.bf16.mxu0 %v3545_v6  ;;  %v2002_v59 = vadd.f32 %v1999_v12, %v1995_v46 }
 0x8b7   : > { %3433 = vrcp.f32 %v2002_v59 }
 0x8b8   : > { %3280 = vmatpush3.bf16.msra.mxu0 %v2430_v38 }
 0x8b9   : > { %3281 = vmatprep.subr.bf16.mxu0 %v3545_v6 }
 0x8bc   : > { %3282 = vmatpush3.bf16.msra.mxu0 %v2432_v5 }
 0x8bf   : > { %3284 = vmatmul.mubr.bf16.vlgmr.msra.gmra.mrb[32].mxu0 %v2350_v40 }
 0x8c1   : > { %v3434_v49 = vpop.eup %3433 }
 0x8c2   : > { %v2138_v53 = vmul.f32 0.35355338, %v3434_v49 }
 0x8c4   : > { %v2140_v45 = vmul.f32 %v2138_v53, %v4402_v0 }
 0x8cf   : > { %v1649_v57 = vpop.xlane.xlu0 %1648 }
 0x8d3   : > { %v1653_v22 = vpop.xlane.xlu0 %1652 }
 0x8d4   : > { %v1656_v17 = vadd.f32 %v1653_v22, %v1649_v57 }
 0x8d6   : > { %3435 = vrcp.f32 %v1656_v17 }
 0x8d7   : > { %v1655_v21 = vpop.xlane.xlu0 %1654 }
 0x8d8   : > { %v1657_v28 = vadd.f32 %v1655_v21, %v1651_v43 }
 0x8da   : > { %3437 = vrcp.f32 %v1657_v28 }
 0x8db   : > { %v1997_v44 = vpop.xlane.xlu0 %1996 }
 0x8df   : > { %v2001_v50 = vpop.xlane.xlu0 %2000 }
 0x8e0   : > { %v3436_v6 = vpop.eup %3435  ;;  %v2003_v51 = vadd.f32 %v2001_v50, %v1997_v44 }
 0x8e1   : > { %v1792_v52 = vmul.f32 0.35355338, %v3436_v6 }
 0x8e2   : > { %3439 = vrcp.f32 %v2003_v51 }
 0x8e3   : > { %v1794_v56 = vmul.f32 %v1792_v52, %v4235_v62 }
 0x8e4   : > { %v3438_v58 = vpop.eup %3437 }
 0x8e5   : > { %v1793_v18 = vmul.f32 0.35355338, %v3438_v58  ;;  %2490 = vrot.lane.b32.xlu1 %v1794_v56, %s4545_s20 }
 0x8e7   : > { %v1795_v63 = vmul.f32 %v1793_v18, %v4237_v55 }
 0x8e9   : > { %2492 = vrot.lane.b32.xlu0 %v1795_v63, %s4545_s20  ;;  %2498 = vrot.lane.b32.xlu1 %v2140_v45, %s3556_s29  ;;  %s3469_s20 = sshll.u32 %s3558_s27, 4  ;;  %s3470_s20 = int_to_ptr.vmem [resolvable:$false] %s3469_s20 }
 0x8ea   : > { %s3471_s0 = scalar_lea.vmem %s3470_s20, 512  ;;  %p3472_p1 = scmp.lt.s32.totalorder %s4475_s28, %s3470_s20 }
 0x8ec   : > { %v3440_v3 = vpop.eup %3439 }
 0x8ed   : > { %v2139_v4 = vmul.f32 0.35355338, %v3440_v3 }
 0x8ef   : > { %v2141_v47 = vmul.f32 %v2139_v4, %v4404_v13 }
 0x8f1   : > { %2500 = vrot.lane.b32.xlu1 %v2141_v47, %s3556_s29  ;;  %s4481_s29 = scalar_lea.hbm %s4543_s12, %s2751_s19 }
 0x925   : > { %v2341_v9 = vpop.xlane.xlu1 %2340 }
 0x929   : > { %v2343_v62 = vpop.xlane.xlu0 %2342  ;;  %v2345_v14 = vpop.xlane.xlu1 %2344 }
 0x92a   : > { %v2348_v27 = vadd.f32 %v2345_v14, %v2341_v9 }
 0x92c   : > { %3441 = vrcp.f32 %v2348_v27 }
 0x92d   : > { %v1287_v37 = vpop.xlane.xlu1 %1286 }
 0x92e   : > { %v2347_v25 = vpop.xlane.xlu0 %2346 }
 0x92f   : > { %v2349_v30 = vadd.f32 %v2347_v25, %v2343_v62 }
 0x931   : > { %3443 = vrcp.f32 %v2349_v30  ;;  %v1291_v23 = vpop.xlane.xlu1 %1290 }
 0x932   : > { %v1289_v24 = vpop.xlane.xlu0 %1288  ;;  %v1294_v41 = vadd.f32 %v1291_v23, %v1287_v37 }
 0x934   : > { %3445 = vrcp.f32 %v1294_v41 }
 0x936   : > { %v3442_v0 = vpop.eup %3441  ;;  %v1293_v26 = vpop.xlane.xlu0 %1292 }
 0x937   : > { %v2484_v55 = vmul.f32 0.35355338, %v3442_v0  ;;  %v1295_v7 = vadd.f32 %v1293_v26, %v1289_v24 }
 0x939   : > { %3447 = vrcp.f32 %v1295_v7 }
 0x93b   : > { %v3444_v33 = vpop.eup %3443 }
 0x93c   : > { %v2485_v11 = vmul.f32 0.35355338, %v3444_v33 }
 0x93e   : > { %v3446_v10 = vpop.eup %3445 }
 0x93f   : > { %v1446_v39 = vmul.f32 0.35355338, %v3446_v10 }
 0x941   : > { %v1448_v34 = vmul.f32 %v1446_v39, %v4086_v2 }
 0x943   : > { %v3448_v42 = vpop.eup %3447 }
 0x944   : > { %v1447_v29 = vmul.f32 0.35355338, %v3448_v42 }
 0x946   : > { %v1449_v1 = vmul.f32 %v1447_v29, %v4088_v54 }
 0x957   : > { %v2491_v48 = vpop.permute.xlu1 %2490 }
 0x958   : > { %v2512_v8 = vsel %vm1092_vm5, %v1448_v34, %v2491_v48 }
 0x95b   : > { %v2499_v15 = vpop.permute.xlu1 %2498  ;;  %v2493_v31 = vpop.permute.xlu0 %2492 }
 0x95c   : > { %v2515_v19 = vsel %vm2514_vm8, %v2512_v8, %v2499_v15  ;;  %v2513_v38 = vsel %vm1092_vm5, %v1449_v1, %v2493_v31 }
 0x963   : > { %v2501_v35 = vpop.permute.xlu1 %2500 }
 0x964   : > { %v2516_v2 = vsel %vm2514_vm8, %v2513_v38, %v2501_v35 }
 0x992   : > { %v2475_v60 = vpop.f32.mrb[32].mxu0 }
 0x993   : > { %v2486_v61 = vmul.f32 %v2484_v55, %v2475_v60  ;;  %v3285_v20 = vpop.f32.mrb[33].mxu0 }
 0x994   : > { %v2478_v16 = vpop.f32.mrb[34].mxu0 }
 0x995   : > { %v2487_v36 = vmul.f32 %v2485_v11, %v2478_v16  ;;  %2506 = vrot.lane.b32.xlu0 %v2486_v61, %s3557_s8  ;;  %v3286_v13 = vpop.f32.mrb[35].mxu0 }
 0x997   : > { %2508 = vrot.lane.b32.xlu1 %v2487_v36, %s3557_s8  ;;  %s3465_s8 = scalar_lea.vmem %s4475_s28, 256 }
 0x998   : > { %p3466_p12 = scmp.ne.s32.totalorder %s4475_s28, %s3465_s8  ;;  %p3473_p2 = scmp.lt.s32.totalorder %s3471_s0, %s3465_s8 }
 0x99a   : > { %p3467_p13 = pnand %p3466_p12, %p3665_p4  ;;  %p3474_p3 = por %p3473_p2, %p3472_p1 }
 0x99c   : > { %p3468_p0 = pneg %p3467_p13 }
 0x99e   : > { %p3475_p5 = pnand %p3474_p3, %p3468_p0 }
 0xa07   : > { %v2507_v32 = vpop.permute.xlu0 %2506 }
 0xa08   : > { %v2518_v5 = vsel %vm2517_vm9, %v2515_v19, %v2507_v32 }
 0xa09   : > { %2520 = vst.msk [vmem:[%s509_s17] sm:$0xff] %vm631_vm0, %v2518_v5  ;;  %v2509_v40 = vpop.permute.xlu1 %2508 }
 0xa0a   : > { %v2519_v54 = vsel %vm2517_vm9, %v2516_v2, %v2509_v40 }
 0xa0b   : > { %2521 = vst.msk [vmem:[%s509_s17 + $0x8] sm:$0xff] %vm631_vm0, %v2519_v54 }
 0xa0c   : > { %3478 = shalt.err (!%p3475_p5)
}
 0xa0d   : > { %s3479_s30 = scalar_lea.hbm %s4481_s29, 256  ;;  %s3483_s14 = scalar_lea.hbm %s4543_s12, 512 }
 0xa0e   : > { %p3480_p6 = scmp.ne.s32.totalorder %s4481_s29, %s3479_s30  ;;  %p3484_p10 = scmp.lt.u32.totalorder %s4481_s29, %s4543_s12 }
 0xa0f   : > { %p3485_p11 = scmp.lt.u32.totalorder %s3483_s14, %s3479_s30  ;;  %p3487_p13 = scmp.lt.u32.totalorder %s3479_s30, %s4481_s29 }
 0xa10   : > { %p3481_p7 = pnand %p3480_p6, %p3665_p4 }
 0xa11   : > { %p3486_p12 = por %p3485_p11, %p3484_p10 }
 0xa12   : > { %p3482_p9 = pneg %p3481_p7 }
 0xa13   : > { %p3488_p0 = por %p3487_p13, %p3486_p12 }
 0xa15   : > { %p3489_p1 = pnand %p3488_p0, %p3482_p9 }
 0xa17   : > { %3492 = shalt.err (!%p3489_p1)
}
 0xa18   : > { %s3559_s0 = smov 128   ;;  %s4553_s8 = smov 8  }
 0xa19   : > { %3307 = dma.vmem_to_hbm [thread:$0]  (%p3665_p4), %s4475_s28, 256, %s4481_s29, %s4484_s24, %s3559_s0, %s3559_s0, %s4553_s8  }
 0xa1a PF: > { %p3313_p2 = scmp.ge.s32.totalorder %s3543_s26, 2  ;;  %s2553_s27 = sand.u32 1, %s3523_s21  }
 0xa1b   : > { %s2554_s30 = scalar_lea.sflag [#allocation5], %s2553_s27 }
 0xa1c   : > { %p3310_p3 = pnand %p3313_p2, %p3672_p8 }
 0xa1e   : > { %3518 = dma.done.wait (!%p3310_p3), %s2554_s30, 256  }
 0xa1f   : > { %3520 = vsyncadd (!%p3310_p3), %s2554_s30, 4294967040  ;;  %s25_s26 = sadd.s32 1, %s3543_s26   ;;  %s4554_s13 = sld [smem:[#allocation7_spill]] }
 0xa20   : > { %p22_p5 = scmp.ge.s32.totalorder %s25_s26, 4   ;;  %s4555_s21 = smov %s3527_s22 }
 0xa21   : > { %s4556_s22 = smov %s3531_s23  ;;  %s4557_s23 = smov %s3678_s16 }
 0xa22   : > { %s4558_s24 = smov %s3539_s25  ;;  %24 = sbr.rel (!%p22_p5) target bundleno = 7 (0x7), region = 122 }
 0xa25   : > { %s4559_s25 = smov %s4554_s13 }
 0xa29   :  { %2559 = vsyncpa [#allocation5], 1 }
 0xa2a   :  { %2561 = vsyncpa [#allocation5 + $0x1], 1 }

// kernel: tpu_custom_call.1
= control target key start
LH: loop header
LB: loop body
LE: loop exit
PB: predicated region body
PF: predicated region fallthrough
CT: control target
= control target key end

     0   :  { %s4531_s0 = inlined_call_operand.vmem [shape: bf16[2,16,32], index: 0, kind: input, shape index: {}]   ;;  %s4532_s1 = inlined_call_operand.vmem [shape: bf16[2,128,32], index: 1, kind: input, shape index: {}]   ;;  %s4533_s2 = inlined_call_operand.vmem [shape: bf16[2,128,32], index: 2, kind: input, shape index: {}]   ;;  %s4534_s3 = inlined_call_operand.vmem [shape: f32[2,16,1], index: 3, kind: input, shape index: {}]   ;;  %s4535_s4 = inlined_call_operand.vmem [shape: f32[2,1,128], index: 4, kind: input, shape index: {}]   ;;  %s4536_s5 = inlined_call_operand.vmem [shape: f32[2,1,128], index: 5, kind: input, shape index: {}]   ;;  %s4537_s6 = inlined_call_operand.vmem [shape: bf16[32,64], index: 6, kind: input, shape index: {}]   ;;  %s4538_s7 = inlined_call_operand.vmem [shape: f32[1,64], index: 7, kind: input, shape index: {}]   ;;  %s4539_s8 = inlined_call_operand.vmem [shape: bf16[32,64], index: 8, kind: input, shape index: {}]   ;;  %s4540_s9 = inlined_call_operand.vmem [shape: f32[1,64], index: 9, kind: input, shape index: {}]   ;;  %s4541_s10 = inlined_call_operand.vmem [shape: bf16[32,64], index: 10, kind: input, shape index: {}]   ;;  %s4542_s11 = inlined_call_operand.vmem [shape: f32[1,64], index: 11, kind: input, shape index: {}]   ;;  %s4543_s12 = inlined_call_operand.hbm [shape: f32[2,16,32], index: 12, kind: output, shape index: {}]  }
   0x1   :  { %4546 = sst [smem:[#allocation8_spill]] %s4531_s0 }
   0x2   :  { %4547 = sst [smem:[#allocation9_spill]] %s4539_s8 }
   0x3   :  { %17 = vsyncpa [#allocation5], 0 }
   0x4   :  { %19 = vsyncpa [#allocation5 + $0x1], 0  ;;  %s3625_s21 = smov 0   ;;  %s3627_s22 = smov 0  }
   0x5   :  { %s3629_s23 = smov 0   ;;  %s3631_s24 = smov 0  }
   0x6   :  { %s3633_s25 = smov 0   ;;  %s3635_s26 = smov 0  }
   0x7 LB: > { %s2677_s27 = sadd.s32 4294967295, %s3543_s26   ;;  %s2678_s28 = sadd.s32 4294967294, %s3543_s26   ;;  %s3543_s26 = sphi %s3635_s26, %s25_s26   ;;  %s3539_s25 = sphi %s3633_s25, %s4559_s25   ;;  %s3535_s24 = sphi %s3631_s24, %s4558_s24   ;;  %s3531_s23 = sphi %s3629_s23, %s4557_s23   ;;  %s3527_s22 = sphi %s3627_s22, %s4556_s22   ;;  %s3523_s21 = sphi %s3625_s21, %s4555_s21  }
   0x8   : > { %s37_s29 = sadd.s32 1, %s3539_s25  ;;  %s332_s30 = sadd.s32 1, %s3531_s23 }
   0x9   : > { %p39_p0 = scmp.ge.s32.totalorder %s37_s29, 2  ;;  %p342_p1 = scmp.ne.s32.totalorder %s3531_s23, %s3527_s22 }
   0xa   : > { %p343_p2 = scmp.eq.s32.totalorder %s2677_s27, 1  ;;  %p348_p3 = scmp.ne.s32.totalorder %s3527_s22, %s3523_s21 }
   0xb   : > { %s4561_s29 = smov (%p39_p0, %s37_s29), 0  ;;  %p349_p5 = scmp.eq.s32.totalorder %s2678_s28, 1 }
   0xc   : > { %4548 = sst [smem:[#allocation7_spill]] %s4561_s29  ;;  %p3665_p4 = por %p343_p2, %p342_p1 }
   0xd   : > { %s327_s14 = ssub.s32 %s3539_s25, %s4561_s29  ;;  %p2681_p6 = scmp.ge.s32.totalorder %s3543_s26, 1 }
   0xe   : > { %p330_p7 = scmp.eq.s32.totalorder %s327_s14, 0  ;;  %p3672_p8 = por %p349_p5, %p348_p3 }
   0xf   : > { %p439_p9 = scmp.lt.s32.totalorder %s3543_s26, 3 }
  0x10   : > { %s3678_s16 = scalar_select %p330_p7, %s3531_s23, %s332_s30  }
  0x11   : > { %p440_p10 = pnand %p2681_p6, %p439_p9 }
  0x12   : > { %s4551_s8 = sld [smem:[#allocation9_spill]] (!%p440_p10)  ;;  %p511_p11 = scmp.lt.s32.totalorder (!%p440_p10), %s3535_s24, 1  ;;  %vm631_vm0 = vcmask (!%p440_p10), 261120   ;;  %v3391_v2 = vld [vmem:[%s4541_s10] sm:$0xff] (!%p440_p10)   ;;  %v3545_v6 = vmov (!%p440_p10), 0.0   ;;  %v3385_v8 = vld [vmem:[%s4537_s6 + $0x8] sm:$0xff] (!%p440_p10)  }
  0x13   : > { %443 = sbr.rel (%p440_p10) target bundleno = 2586 (0xa1a), region = 68  ;;  %v3382_v3 = vld [vmem:[%s4537_s6] sm:$0xff] (!%p440_p10)   ;;  %s4552_s0 = sld [smem:[#allocation8_spill]] (!%p440_p10)  ;;  %v3392_v13 = vld [vmem:[%s4541_s10 + $0x8] sm:$0xff] (!%p440_p10)   ;;  %vm3546_vm1 = vmmov (!%p440_p10), 0   ;;  %v3547_v25 = vmov (!%p440_p10), 0  }
  0x14   : > { %3377 = vset.pattern.permute.xlu1 (!%p440_p10), %v3547_v25  ;;  %3376 = vset.pattern.permute.xlu0 (!%p440_p10), %v3547_v25  ;;  %v2691_v30 = vld [vmem:[%s4540_s9] ss:$0 sm:$0xff] (!%p440_p10)  ;;  %vm761_vm4 = vcmask (!%p440_p10), 523264   ;;  %vm1092_vm5 = vcmask (!%p440_p10), 64512   ;;  %s3550_s17 = smov (!%p440_p10), 88   ;;  %vm2514_vm8 = vcmask (!%p440_p10), 130048  }
  0x15   : > { %vm2517_vm9 = vcmask (!%p440_p10), 195584  }
  0x18   : > { %v3378_v0 = vld [vmem:[%s4551_s8] sm:$0xff] (!%p440_p10)   ;;  %v3379_v1 = vld [vmem:[%s4551_s8 + $0x8] sm:$0xff] (!%p440_p10)  }
  0x19   : > { %2919 = vmatprep.subr.bf16.mxu0 (!%p440_p10), %v3378_v0  ;;  %3287 = vmatprep.subr.bf16.mxu1 (!%p440_p10), %v3378_v0 }
  0x1a   : > { %s3688_s27 = scalar_select %p511_p11, %s3535_s24, 1  ;;  %2920 = vmatpush3.bf16.msra.mxu0 %v3378_v0  ;;  %3289 = vmatpush3.bf16.msra.mxu1 %v3378_v0 }
  0x1b   : > { %2921 = vmatprep.subr.bf16.mxu0 %v3379_v1  ;;  %3288 = vmatprep.subr.bf16.mxu1 %v3379_v1 }
  0x1c   : > { %s2748_s28 = sshll.u32 %s3688_s27, 6  ;;  %s2747_s29 = sshll.u32 %s3688_s27, 3 }
  0x1d   : > { %s3697_s19 = scalar_lea.vmem %s4532_s1, %s2748_s28  ;;  %s518_s14 = scalar_lea.vmem %s4552_s0, %s2747_s29 }
  0x1e   : > { %v3380_v4 = vld [vmem:[%s3697_s19] sm:$0xff]   ;;  %2922 = vmatpush3.bf16.msra.mxu0 %v3379_v1  ;;  %v3381_v5 = vld [vmem:[%s3697_s19 + $0x8] sm:$0xff]   ;;  %3290 = vmatpush3.bf16.msra.mxu1 %v3379_v1  ;;  %v3383_v7 = vld [vmem:[%s3697_s19 + $0x10] sm:$0xff]   ;;  %s3724_s8 = scalar_lea.vmem %s4533_s2, %s2748_s28  ;;  %s2750_s28 = sshll.u32 %s3688_s27, 4 }
  0x1f   : > { %2923 = vmatprep.mubr.msk.bf16.mxu0 %vm631_vm0, %v3380_v4  ;;  %2959 = vmatprep.subr.bf16.mxu0 %v3545_v6  ;;  %v3387_v9 = vld [vmem:[%s3697_s19 + $0x20] sm:$0xff]   ;;  %v3388_v10 = vld [vmem:[%s3697_s19 + $0x28] sm:$0xff]   ;;  %v3389_v11 = vld [vmem:[%s3697_s19 + $0x30] sm:$0xff]   ;;  %s538_s18 = scalar_lea.vmem %s4534_s3, %s2750_s28  ;;  %s542_s20 = scalar_lea.vmem %s4535_s4, %s3688_s27 }
  0x20   : > { %2939 = vmatprep.subr.bf16.mxu1 %v3391_v2  ;;  %2931 = vmatprep.mubr.msk.bf16.mxu1 %vm631_vm0, %v3387_v9  ;;  %v3384_v12 = vld [vmem:[%s3697_s19 + $0x18] sm:$0xff]   ;;  %v3393_v15 = vld [vmem:[%s3724_s8] sm:$0xff]   ;;  %v3394_v17 = vld [vmem:[%s3724_s8 + $0x8] sm:$0xff]   ;;  %s545_s30 = scalar_lea.vmem %s4536_s5, %s3688_s27  ;;  %s3549_s27 = smov 120  }
  0x21   : > { %2924 = vmatmul.mubr.msk.bf16.vlgmr.msra.gmra.mrb[0].mxu0 %vm631_vm0, %v3381_v5  ;;  %2932 = vmatmul.mubr.msk.bf16.vlgmr.msra.gmra.mrb[0].mxu1 %vm631_vm0, %v3388_v10  ;;  %v3390_v14 = vld [vmem:[%s3697_s19 + $0x38] sm:$0xff]   ;;  %v3386_v16 = vld [vmem:[%s518_s14] sm:$0xff]   ;;  %v3395_v18 = vld [vmem:[%s3724_s8 + $0x10] sm:$0xff]   ;;  %s3548_s19 = smov 96   ;;  %s3551_s28 = smov 112  }
  0x22   : > { %2960 = vmatpush3.bf16.msra.mxu0 %v3382_v3  ;;  %2927 = vmatprep.mubr.msk.bf16.mxu0 %vm631_vm0, %v3383_v7  ;;  %v3396_v19 = vld [vmem:[%s3724_s8 + $0x18] sm:$0xff]   ;;  %v3397_v20 = vld [vmem:[%s3724_s8 + $0x20] sm:$0xff]   ;;  %v3398_v21 = vld [vmem:[%s3724_s8 + $0x28] sm:$0xff]   ;;  %s3553_s14 = smov 104   ;;  %s3556_s29 = smov 16  }
  0x23   : > { %2961 = vmatprep.subr.bf16.mxu0 %v3545_v6  ;;  %2935 = vmatprep.mubr.msk.bf16.mxu1 %vm631_vm0, %v3389_v11  ;;  %v3399_v22 = vld [vmem:[%s3724_s8 + $0x30] sm:$0xff]   ;;  %v3400_v23 = vld [vmem:[%s3724_s8 + $0x38] sm:$0xff]   ;;  %v1079_v24 = vld [vmem:[%s538_s18 + $0x8] sm:$0xff]  ;;  %s3557_s8 = smov 24  }
  0x24   : > { %2940 = vmatpush3.bf16.msra.mxu1 %v3391_v2  ;;  %vm1081_vm2 = vcmp.gt.f32.partialorder %v1079_v24, 0.5  ;;  %v1078_v27 = vld [vmem:[%s538_s18] sm:$0xff]  ;;  %s3554_s18 = smov 72  }
  0x25   : > { %2941 = vmatprep.subr.bf16.mxu1 %v3392_v13  ;;  %v1162_v26 = vsel %vm1081_vm2, 1, %v3547_v25  ;;  %vm1080_vm3 = vcmp.gt.f32.partialorder %v1078_v27, 0.5  ;;  %v2729_v4 = vld [vmem:[%s4538_s7] ss:$0 sm:$0xff] }
  0x26   : > { %2962 = vmatpush3.bf16.msra.mxu0 %v3385_v8  ;;  %1167 = vperm.xlu1 %3377, %v1162_v26   ;;  %v3764_v28 = vsel %vm1080_vm3, 1, %v3547_v25 }
  0x27   : > { %2987 = vmatprep.subr.bf16.mxu0 %v3545_v6 }
  0x28   : > { %2942 = vmatpush3.bf16.msra.mxu1 %v3392_v13 }
  0x29   : > { %2928 = vmatmul.mubr.msk.bf16.gmra.mrb[4].mxu0 %vm631_vm0, %v3384_v12  ;;  %2967 = vmatprep.subr.bf16.mxu1 %v3545_v6 }
  0x2a   : > { %2963 = vmatprep.mubr.msk.bf16.mxu0 %vm3546_vm1, %v3545_v6  ;;  %2936 = vmatmul.mubr.msk.bf16.gmra.mrb[4].mxu1 %vm631_vm0, %v3390_v14 }
  0x2b   : > { %2943 = vmatprep.mubr.msk.bf16.mxu1 %vm631_vm0, %v3393_v15 }
  0x31   : > { %2964 = vmatmul.mubr.msk.bf16.vlgmr.msra.gmra.mrb[8].mxu0 %vm631_vm0, %v3386_v16  ;;  %v3787_v16 = vld [vmem:[%s4542_s11] ss:$0 sm:$0xff] }
  0x32   : > { %3003 = vmatprep.mubr.msk.bf16.mxu0 %vm3546_vm1, %v3545_v6  ;;  %2944 = vmatmul.mubr.msk.bf16.vlgmr.msra.gmra.mrb[8].mxu1 %vm631_vm0, %v3394_v17 }
  0x33   : > { %2947 = vmatprep.mubr.msk.bf16.mxu1 %vm631_vm0, %v3395_v18 }
  0x3a   : > { %2948 = vmatmul.mubr.msk.bf16.gmra.mrb[12].mxu1 %vm631_vm0, %v3396_v19 }
  0x3b   : > { %2951 = vmatprep.mubr.msk.bf16.mxu1 %vm631_vm0, %v3397_v20 }
  0x42   : > { %2952 = vmatmul.mubr.msk.bf16.gmra.mrb[16].mxu1 %vm631_vm0, %v3398_v21 }
  0x43   : > { %2955 = vmatprep.mubr.msk.bf16.mxu1 %vm631_vm0, %v3399_v22 }
  0x4a   : > { %2956 = vmatmul.mubr.msk.bf16.gmra.mrb[20].mxu1 %vm631_vm0, %v3400_v23 }
  0x4b   : > { %2983 = vmatprep.mubr.msk.bf16.mxu1 %vm3546_vm1, %v3545_v6 }
  0xf4   : > { %v2925_v29 = vpop.f32.mrb[0].mxu0  ;;  %v2933_v38 = vpop.f32.mrb[0].mxu1 }
  0xf5   : > { %v690_v31 = vpop.f32.mrb[1].mxu0  ;;  %v699_v33 = vadd.f32 %v2925_v29, %v2691_v30  ;;  %v731_v40 = vadd.f32 %v2933_v38, %v2691_v30  ;;  %v722_v41 = vpop.f32.mrb[1].mxu1 }
  0xf6   : > { %v2926_v32 = vpop.f32.mrb[2].mxu0  ;;  %v691_v36 = vadd.f32 %v2691_v30, %v690_v31  ;;  %v723_v43 = vadd.f32 %v2691_v30, %v722_v41  ;;  %v2934_v44 = vpop.f32.mrb[2].mxu1 }
  0xf7   : > { %v702_v34 = vadd.f32 %v2926_v32, %v2691_v30  ;;  %v693_v35 = vpop.f32.mrb[3].mxu0  ;;  %v734_v45 = vadd.f32 %v2934_v44, %v2691_v30  ;;  %v725_v46 = vpop.f32.mrb[3].mxu1 }
  0xf8   : > { %v694_v37 = vadd.f32 %v2691_v30, %v693_v35  ;;  %v726_v48 = vadd.f32 %v2691_v30, %v725_v46 }
  0xf9   : > { %v754_v39 = vpack.c.bf16 %v702_v34, %v699_v33  ;;  %v758_v50 = vpack.c.bf16 %v734_v45, %v731_v40 }
  0xfa   : > { %v753_v42 = vpack.c.bf16 %v694_v37, %v691_v36  ;;  %v757_v52 = vpack.c.bf16 %v726_v48, %v723_v43 }
  0xfb   : > { %763 = vst.msk [vmem:[#allocation2 + $0x8] sm:$0xff] %vm761_vm4, %v754_v39  ;;  %767 = vst.msk [vmem:[#allocation2 + $0x28] sm:$0xff] %vm761_vm4, %v758_v50 }
  0xfc   : > { %762 = vst.msk [vmem:[#allocation2] sm:$0xff] %vm761_vm4, %v753_v42  ;;  %v2929_v47 = vpop.f32.mrb[4].mxu0  ;;  %766 = vst.msk [vmem:[#allocation2 + $0x20] sm:$0xff] %vm761_vm4, %v757_v52 }
  0xfd   : > { %v706_v49 = vpop.f32.mrb[5].mxu0  ;;  %v715_v53 = vadd.f32 %v2929_v47, %v2691_v30  ;;  %v2937_v58 = vpop.f32.mrb[4].mxu1 }
  0xfe   : > { %v2930_v51 = vpop.f32.mrb[6].mxu0  ;;  %v707_v56 = vadd.f32 %v2691_v30, %v706_v49  ;;  %v747_v60 = vadd.f32 %v2937_v58, %v2691_v30  ;;  %v738_v61 = vpop.f32.mrb[5].mxu1 }
  0xff   : > { %v718_v54 = vadd.f32 %v2930_v51, %v2691_v30  ;;  %v709_v55 = vpop.f32.mrb[7].mxu0  ;;  %v739_v63 = vadd.f32 %v2691_v30, %v738_v61  ;;  %v2938_v0 = vpop.f32.mrb[6].mxu1 }
 0x100   : > { %v710_v57 = vadd.f32 %v2691_v30, %v709_v55  ;;  %v750_v2 = vadd.f32 %v2938_v0, %v2691_v30  ;;  %v741_v3 = vpop.f32.mrb[7].mxu1 }
 0x101   : > { %v756_v59 = vpack.c.bf16 %v718_v54, %v715_v53  ;;  %v742_v8 = vadd.f32 %v2691_v30, %v741_v3 }
 0x102   : > { %v755_v62 = vpack.c.bf16 %v710_v57, %v707_v56  ;;  %v760_v10 = vpack.c.bf16 %v750_v2, %v747_v60  ;;  %v3792_v19 = vld [vmem:[#allocation2 + $0x8] sm:$0xff] }
 0x103   : > { %765 = vst.msk [vmem:[#allocation2 + $0x18] sm:$0xff] %vm761_vm4, %v756_v59  ;;  %v3774_v1 = vld [vmem:[#allocation2] sm:$0xff]  ;;  %v759_v12 = vpack.c.bf16 %v742_v8, %v739_v63  ;;  %v1100_v26 = vsel %vm1092_vm5, %v3792_v19, 0 }
 0x104   : > { %764 = vst.msk [vmem:[#allocation2 + $0x10] sm:$0xff] %vm761_vm4, %v755_v62  ;;  %v1054_v5 = vpop.f32.mrb[8].mxu0  ;;  %v1097_v7 = vsel %vm1092_vm5, %v3774_v1, 0  ;;  %769 = vst.msk [vmem:[#allocation2 + $0x38] sm:$0xff] %vm761_vm4, %v760_v10  ;;  %v3841_v59 = vld [vmem:[#allocation2 + $0x20] sm:$0xff] }
 0x105   : > { %v2965_v9 = vpop.f32.mrb[9].mxu0  ;;  %2968 = vmatpush3.bf16.xpose.msra.mxu1 %v1097_v7  ;;  %v1055_v13 = vadd.f32 %v2729_v4, %v1054_v5  ;;  %768 = vst.msk [vmem:[#allocation2 + $0x30] sm:$0xff] %vm761_vm4, %v759_v12  ;;  %v2945_v17 = vpop.f32.mrb[8].mxu1  ;;  %v1109_v63 = vsel %vm1092_vm5, %v3841_v59, 0  ;;  %v3863_v12 = vld [vmem:[#allocation2 + $0x28] sm:$0xff] }
 0x106   : > { %v1057_v11 = vpop.f32.mrb[10].mxu0  ;;  %2969 = vmatprep.subr.bf16.mxu1 %v3545_v6  ;;  %v916_v20 = vadd.f32 %v2945_v17, %v3787_v16  ;;  %v907_v21 = vpop.f32.mrb[9].mxu1 }
 0x107   : > { %v1058_v14 = vadd.f32 %v2729_v4, %v1057_v11  ;;  %v2966_v15 = vpop.f32.mrb[11].mxu0  ;;  %v908_v22 = vadd.f32 %v3787_v16, %v907_v21  ;;  %v2946_v23 = vpop.f32.mrb[10].mxu1 }
 0x108   : > { %v919_v24 = vadd.f32 %v2946_v23, %v3787_v16  ;;  %v910_v25 = vpop.f32.mrb[11].mxu1 }
 0x109   : > { %v3790_v18 = vpack.c.bf16 %v1058_v14, %v1055_v13  ;;  %v911_v27 = vadd.f32 %v3787_v16, %v910_v25  ;;  %v1112_v14 = vsel %vm1092_vm5, %v3863_v12, 0 }
 0x10a   : > { %v971_v29 = vpack.c.bf16 %v919_v24, %v916_v20  ;;  %v3827_v46 = vld [vmem:[#allocation2 + $0x18] sm:$0xff] }
 0x10b   : > { %1186 = vrot.lane.b32.xlu0 %v3790_v18, %s3548_s19  ;;  %v970_v30 = vpack.c.bf16 %v911_v27, %v908_v22  ;;  %v3806_v32 = vld [vmem:[#allocation2 + $0x10] sm:$0xff]  ;;  %v1106_v53 = vsel %vm1092_vm5, %v3827_v46, 0  ;;  %v3887_v21 = vld [vmem:[#allocation2 + $0x38] sm:$0xff] }
 0x10c   : > { %979 = vst.msk [vmem:[#allocation3 + $0x8] sm:$0xff] %vm761_vm4, %v971_v29  ;;  %v1103_v39 = vsel %vm1092_vm5, %v3806_v32, 0  ;;  %v1118_v22 = vsel %vm1092_vm5, %v3887_v21, 0 }
 0x10d   : > { %2970 = vmatpush3.bf16.xpose.msra.mxu1 %v1100_v26  ;;  %978 = vst.msk [vmem:[#allocation3] sm:$0xff] %vm761_vm4, %v970_v30  ;;  %v2949_v31 = vpop.f32.mrb[12].mxu1  ;;  %v3913_v30 = vpop.permute.xlu1 %1167 }
 0x10e   : > { %2971 = vmatprep.subr.bf16.mxu1 %v3545_v6  ;;  %v932_v33 = vadd.f32 %v2949_v31, %v3787_v16  ;;  %v923_v34 = vpop.f32.mrb[13].mxu1  ;;  %vm1170_vm7 = vcmp.eq.s32.totalorder %v3913_v30, 1 }
 0x10f   : > { %1164 = vperm.xlu0 %3376, %v3764_v28   ;;  %v924_v35 = vadd.f32 %v3787_v16, %v923_v34  ;;  %v2950_v36 = vpop.f32.mrb[14].mxu1 }
 0x110   : > { %v935_v37 = vadd.f32 %v2950_v36, %v3787_v16  ;;  %v926_v38 = vpop.f32.mrb[15].mxu1 }
 0x111   : > { %v927_v40 = vadd.f32 %v3787_v16, %v926_v38 }
 0x112   : > { %v973_v28 = vpack.c.bf16 %v935_v37, %v932_v33 }
 0x113   : > { %v972_v41 = vpack.c.bf16 %v927_v40, %v924_v35  ;;  %v3815_v42 = vld [vmem:[#allocation3 + $0x8] sm:$0xff] }
 0x114   : > { %v3817_v43 = vld [vmem:[#allocation3] sm:$0xff]  ;;  %981 = vst.msk [vmem:[#allocation3 + $0x18] sm:$0xff] %vm761_vm4, %v973_v28  ;;  %1308 = vrot.lane.b32.xlu0 %v3815_v42, %s3548_s19  ;;  %v1195_v56 = vsel %vm1092_vm5, %v3815_v42, 0 }
 0x115   : > { %2972 = vmatpush3.bf16.xpose.msra.mxu1 %v1103_v39  ;;  %v1192_v44 = vsel %vm1092_vm5, %v3817_v43, 0  ;;  %980 = vst.msk [vmem:[#allocation3 + $0x10] sm:$0xff] %vm761_vm4, %v972_v41  ;;  %1306 = vrot.lane.b32.xlu1 %v3817_v43, %s3548_s19  ;;  %v2953_v45 = vpop.f32.mrb[16].mxu1  ;;  %v1087_v39 = vlaneseq  ;;  %v1082_v28 = vld [vmem:[%s542_s20] sm:$0x1]  ;;  %s4545_s20 = smov 8  }
 0x116   : > { %2973 = vmatprep.subr.bf16.mxu1 %v3545_v6  ;;  %2988 = vmatpush3.bf16.xpose.msra.mxu0 %v1192_v44  ;;  %v948_v47 = vadd.f32 %v2953_v45, %v3787_v16  ;;  %v939_v48 = vpop.f32.mrb[17].mxu1  ;;  %v1084_v44 = vmin.f32 %v1082_v28, -10000.0 }
 0x117   : > { %2989 = vmatprep.subr.bf16.mxu0 %v3545_v6  ;;  %v940_v49 = vadd.f32 %v3787_v16, %v939_v48  ;;  %v2954_v50 = vpop.f32.mrb[18].mxu1  ;;  %v1088_v40 = vshrl.u32 %v1087_v39, 7 }
 0x118   : > { %v951_v51 = vadd.f32 %v2954_v50, %v3787_v16  ;;  %v942_v52 = vpop.f32.mrb[19].mxu1 }
 0x119   : > { %v943_v54 = vadd.f32 %v3787_v16, %v942_v52  ;;  %v1089_v41 = vsub.s32 0, %v1088_v40 }
 0x11a   : > { %v975_v55 = vpack.c.bf16 %v951_v51, %v948_v47 }
 0x11b   : > { %v3839_v57 = vld [vmem:[#allocation3 + $0x18] sm:$0xff]  ;;  %v974_v58 = vpack.c.bf16 %v943_v54, %v940_v49  ;;  %v3927_v45 = vrot.slane %v1082_v28, %v1089_v41  ;;  %v3929_v47 = vrot.slane %v1084_v44, %v1089_v41 }
 0x11c   : > { %1312 = vrot.lane.b32.xlu1 %v3839_v57, %s3548_s19  ;;  %983 = vst.msk [vmem:[#allocation3 + $0x28] sm:$0xff] %vm761_vm4, %v975_v55  ;;  %v3851_v0 = vld [vmem:[#allocation3 + $0x10] sm:$0xff]  ;;  %v1201_v15 = vsel %vm1092_vm5, %v3839_v57, 0 }
 0x11d   : > { %2974 = vmatpush3.bf16.xpose.msra.mxu1 %v1106_v53  ;;  %982 = vst.msk [vmem:[#allocation3 + $0x20] sm:$0xff] %vm761_vm4, %v974_v58  ;;  %v2957_v60 = vpop.f32.mrb[20].mxu1  ;;  %v1198_v9 = vsel %vm1092_vm5, %v3851_v0, 0 }
 0x11e   : > { %2975 = vmatprep.subr.bf16.mxu1 %v3545_v6  ;;  %2990 = vmatpush3.bf16.xpose.msra.mxu0 %v1195_v56  ;;  %v964_v61 = vadd.f32 %v2957_v60, %v3787_v16  ;;  %v955_v62 = vpop.f32.mrb[21].mxu1  ;;  %v1083_v56 = vld [vmem:[%s545_s30] sm:$0x1]  ;;  %s507_s30 = sand.u32 1, %s3527_s22  }
 0x11f   : > { %2991 = vmatprep.subr.bf16.mxu0 %v3545_v6  ;;  %v956_v2 = vadd.f32 %v3787_v16, %v955_v62  ;;  %v2958_v3 = vpop.f32.mrb[22].mxu1  ;;  %v1085_v58 = vmin.f32 %v1083_v56, -10000.0  ;;  %v3951_v60 = vrot.slane %v1083_v56, %v1089_v41 }
 0x120   : > { %1310 = vrot.lane.b32.xlu1 %v3851_v0, %s3548_s19  ;;  %v967_v4 = vadd.f32 %v2958_v3, %v3787_v16  ;;  %v958_v5 = vpop.f32.mrb[23].mxu1 }
 0x121   : > { %v959_v7 = vadd.f32 %v3787_v16, %v958_v5  ;;  %v3879_v16 = vld [vmem:[#allocation2 + $0x30] sm:$0xff] }
 0x122   : > { %v977_v8 = vpack.c.bf16 %v967_v4, %v964_v61  ;;  %v1115_v17 = vsel %vm1092_vm5, %v3879_v16, 0  ;;  %v3953_v61 = vrot.slane %v1085_v58, %v1089_v41 }
 0x123   : > { %v976_v10 = vpack.c.bf16 %v959_v7, %v956_v2  ;;  %v3861_v11 = vld [vmem:[#allocation3 + $0x28] sm:$0xff] }
 0x124   : > { %v3865_v13 = vld [vmem:[#allocation3 + $0x20] sm:$0xff]  ;;  %985 = vst.msk [vmem:[#allocation3 + $0x38] sm:$0xff] %vm761_vm4, %v977_v8  ;;  %1316 = vrot.lane.b32.xlu1 %v3861_v11, %s3548_s19  ;;  %v1207_v23 = vsel %vm1092_vm5, %v3861_v11, 0 }
 0x125   : > { %2976 = vmatpush3.bf16.xpose.msra.mxu1 %v1109_v63  ;;  %984 = vst.msk [vmem:[#allocation3 + $0x30] sm:$0xff] %vm761_vm4, %v976_v10  ;;  %1314 = vrot.lane.b32.xlu0 %v3865_v13, %s3548_s19  ;;  %v1204_v20 = vsel %vm1092_vm5, %v3865_v13, 0 }
 0x126   : > { %2977 = vmatprep.subr.bf16.mxu1 %v3545_v6  ;;  %2992 = vmatpush3.bf16.xpose.msra.mxu0 %v1198_v9 }
 0x127   : > { %2993 = vmatprep.subr.bf16.mxu0 %v3545_v6 }
 0x12b   : > { %v3905_v26 = vld [vmem:[#allocation3 + $0x38] sm:$0xff] }
 0x12c   : > { %v3896_v24 = vld [vmem:[#allocation3 + $0x30] sm:$0xff]  ;;  %v1213_v27 = vsel %vm1092_vm5, %v3905_v26, 0 }
 0x12d   : > { %2978 = vmatpush3.bf16.xpose.msra.mxu1 %v1112_v14  ;;  %v1210_v25 = vsel %vm1092_vm5, %v3896_v24, 0 }
 0x12e   : > { %2979 = vmatprep.subr.bf16.mxu1 %v3545_v6  ;;  %2994 = vmatpush3.bf16.xpose.msra.mxu0 %v1201_v15 }
 0x12f   : > { %2995 = vmatprep.subr.bf16.mxu0 %v3545_v6 }
 0x135   : > { %2980 = vmatpush3.bf16.xpose.msra.mxu1 %v1115_v17 }
 0x136   : > { %2981 = vmatprep.subr.bf16.mxu1 %v3545_v6  ;;  %2996 = vmatpush3.bf16.xpose.msra.mxu0 %v1204_v20 }
 0x137   : > { %2997 = vmatprep.subr.bf16.mxu0 %v3545_v6 }
 0x13d   : > { %2982 = vmatpush3.bf16.xpose.msra.mxu1 %v1118_v22 }
 0x13e   : > { %3007 = vmatprep.subr.bf16.mxu1 %v3545_v6  ;;  %2998 = vmatpush3.bf16.xpose.msra.mxu0 %v1207_v23 }
 0x13f   : > { %2999 = vmatprep.subr.bf16.mxu0 %v3545_v6 }
 0x144   : > { %2984 = vmatmul.mubr.msk.bf16.vlgmr.msra.gmra.mrb[24].mxu1 %vm1092_vm5, %v3790_v18 }
 0x145   : > { %3023 = vmatprep.mubr.msk.bf16.mxu1 %vm3546_vm1, %v3545_v6 }
 0x146   : > { %3000 = vmatpush3.bf16.xpose.msra.mxu0 %v1210_v25 }
 0x147   : > { %3001 = vmatprep.subr.bf16.mxu0 %v3545_v6 }
 0x14e   : > { %3002 = vmatpush3.bf16.xpose.msra.mxu0 %v1213_v27 }
 0x14f   : > { %3047 = vmatprep.subr.bf16.mxu0 %v3545_v6 }
 0x17d   : > { %v1187_v29 = vpop.permute.xlu0 %1186 }
 0x17e   : > { %3004 = vmatmul.mubr.msk.bf16.vlgmr.msra.gmra.mrb[12].mxu0 %vm1092_vm5, %v1187_v29 }
 0x17f   : > { %3063 = vmatprep.mubr.msk.bf16.mxu0 %vm3546_vm1, %v3545_v6 }
 0x187   : > { %v1307_v31 = vpop.permute.xlu1 %1306 }
 0x188   : > { %3008 = vmatpush3.bf16.msra.mxu1 %v1307_v31 }
 0x189   : > { %3009 = vmatprep.subr.bf16.mxu1 %v3545_v6 }
 0x18e   : > { %v3916_v33 = vpop.permute.xlu0 %1164  ;;  %v1313_v34 = vpop.permute.xlu1 %1312 }
 0x18f   : > { %vm1169_vm6 = vcmp.eq.s32.totalorder %v3916_v33, 1 }
 0x192   : > { %v1309_v35 = vpop.permute.xlu0 %1308  ;;  %v1311_v36 = vpop.permute.xlu1 %1310 }
 0x193   : > { %3010 = vmatpush3.bf16.msra.mxu1 %v1309_v35 }
 0x194   : > { %3011 = vmatprep.subr.bf16.mxu1 %v3545_v6 }
 0x196   : > { %v1317_v38 = vpop.permute.xlu1 %1316 }
 0x197   : > { %3012 = vmatpush3.bf16.msra.mxu1 %v1311_v36  ;;  %v1315_v37 = vpop.permute.xlu0 %1314 }
 0x198   : > { %3013 = vmatprep.subr.bf16.mxu1 %v3545_v6 }
 0x19b   : > { %3014 = vmatpush3.bf16.msra.mxu1 %v1313_v34 }
 0x19c   : > { %3015 = vmatprep.subr.bf16.mxu1 %v3545_v6 }
 0x19f   : > { %3016 = vmatpush3.bf16.msra.mxu1 %v1315_v37 }
 0x1a0   : > { %3017 = vmatprep.subr.bf16.mxu1 %v3545_v6 }
 0x1a3   : > { %3018 = vmatpush3.bf16.msra.mxu1 %v1317_v38 }
 0x1a4   : > { %3019 = vmatprep.subr.bf16.mxu1 %v3545_v6 }
 0x217   : > { %v1154_v48 = vpop.f32.mrb[24].mxu1 }
 0x218   : > { %v1155_v49 = vadd.f32 %v1154_v48, %v3927_v45  ;;  %v2985_v50 = vpop.f32.mrb[25].mxu1 }
 0x219   : > { %v1157_v51 = vpop.f32.mrb[26].mxu1 }
 0x21a   : > { %v1158_v52 = vadd.f32 %v1157_v51, %v3927_v45  ;;  %v2986_v53 = vpop.f32.mrb[27].mxu1  ;;  %v3938_v54 = vsel %vm1169_vm6, %v1155_v49, %v3929_v47 }
 0x21b   : > { %1264 = vmax.xlane.f32.xlu1 %v3938_v54 }
 0x21c   : > { %v3944_v55 = vsel %vm1170_vm7, %v1158_v52, %v3929_v47 }
 0x21d   : > { %1266 = vmax.xlane.f32.xlu0 %v3944_v55 }
 0x251   : > { %v1249_v62 = vpop.f32.mrb[12].mxu0 }
 0x252   : > { %v1250_v63 = vadd.f32 %v1249_v62, %v3951_v60  ;;  %v3005_v2 = vpop.f32.mrb[13].mxu0 }
 0x253   : > { %v1252_v3 = vpop.f32.mrb[14].mxu0 }
 0x254   : > { %v1253_v4 = vadd.f32 %v1252_v3, %v3951_v60  ;;  %v3006_v5 = vpop.f32.mrb[15].mxu0  ;;  %v1262_v7 = vsel %vm1169_vm6, %v1250_v63, %v3953_v61 }
 0x255   : > { %1268 = vmax.xlane.f32.xlu1 %v1262_v7 }
 0x256   : > { %v1263_v8 = vsel %vm1170_vm7, %v1253_v4, %v3953_v61 }
 0x257   : > { %1270 = vmax.xlane.f32.xlu0 %v1263_v8 }
 0x266   : > { %1320 = vrot.lane.b32.xlu1 %v3905_v26, %s3548_s19 }
 0x26a   : > { %1381 = vrot.lane.b32.xlu1 %v3792_v19, %s3548_s19 }
 0x26d   : > { %1318 = vrot.lane.b32.xlu0 %v3896_v24, %s3548_s19 }
 0x26e   : > { %1385 = vrot.lane.b32.xlu1 %v3827_v46, %s3548_s19 }
 0x271   : > { %1379 = vrot.lane.b32.xlu0 %v3774_v1, %s3548_s19 }
 0x272   : > { %1389 = vrot.lane.b32.xlu1 %v3863_v12, %s3548_s19 }
 0x275   : > { %1383 = vrot.lane.b32.xlu0 %v3806_v32, %s3548_s19 }
 0x276   : > { %1393 = vrot.lane.b32.xlu1 %v3887_v21, %s3548_s19 }
 0x279   : > { %1387 = vrot.lane.b32.xlu0 %v3841_v59, %s3548_s19 }
 0x27a   : > { %1540 = vrot.lane.b32.xlu1 %v3817_v43, %s3549_s27 }
 0x27d   : > { %1391 = vrot.lane.b32.xlu0 %v3879_v16, %s3548_s19  ;;  %s3552_s19 = smov 80  }
 0x27e   : > { %1542 = vrot.lane.b32.xlu1 %v3815_v42, %s3549_s27 }
 0x281   : > { %1452 = vrot.lane.b32.xlu0 %v3774_v1, %s3549_s27 }
 0x282   : > { %1544 = vrot.lane.b32.xlu1 %v3851_v0, %s3549_s27 }
 0x285   : > { %1454 = vrot.lane.b32.xlu0 %v3792_v19, %s3549_s27 }
 0x286   : > { %1546 = vrot.lane.b32.xlu1 %v3839_v57, %s3549_s27 }
 0x289   : > { %1456 = vrot.lane.b32.xlu0 %v3806_v32, %s3549_s27 }
 0x28a   : > { %1548 = vrot.lane.b32.xlu1 %v3865_v13, %s3549_s27 }
 0x28d   : > { %1458 = vrot.lane.b32.xlu0 %v3827_v46, %s3549_s27 }
 0x28e   : > { %1550 = vrot.lane.b32.xlu1 %v3861_v11, %s3549_s27 }
 0x291   : > { %1460 = vrot.lane.b32.xlu0 %v3841_v59, %s3549_s27 }
 0x292   : > { %1552 = vrot.lane.b32.xlu1 %v3896_v24, %s3549_s27 }
 0x295   : > { %1462 = vrot.lane.b32.xlu0 %v3863_v12, %s3549_s27 }
 0x296   : > { %1554 = vrot.lane.b32.xlu1 %v3905_v26, %s3549_s27 }
 0x299   : > { %1464 = vrot.lane.b32.xlu0 %v3879_v16, %s3549_s27 }
 0x29a   : > { %1538 = vrot.lane.b32.xlu1 %v3790_v18, %s3550_s17 }
 0x29d   : > { %1466 = vrot.lane.b32.xlu0 %v3887_v21, %s3549_s27 }
 0x29e   : > { %1660 = vrot.lane.b32.xlu1 %v3817_v43, %s3550_s17 }
 0x2a1   : > { %1450 = vrot.lane.b32.xlu0 %v3790_v18, %s3549_s27  ;;  %s2682_s27 = sshll.u32 %s507_s30, 4 }
 0x2a2   : > { %1664 = vrot.lane.b32.xlu1 %v3851_v0, %s3550_s17 }
 0x2a5   : > { %1662 = vrot.lane.b32.xlu0 %v3815_v42, %s3550_s17 }
 0x2a6   : > { %1666 = vrot.lane.b32.xlu1 %v3839_v57, %s3550_s17 }
 0x2a8   : > { %v1265_v9 = vpop.xlane.xlu1 %1264 }
 0x2a9   : > { %1668 = vrot.lane.b32.xlu0 %v3865_v13, %s3550_s17 }
 0x2aa   : > { %1670 = vrot.lane.b32.xlu1 %v3861_v11, %s3550_s17  ;;  %v1267_v10 = vpop.xlane.xlu0 %1266 }
 0x2e2   : > { %v1269_v14 = vpop.xlane.xlu1 %1268 }
 0x2e3   : > { %v1272_v15 = vmax.f32 %v1265_v9, %v1269_v14 }
 0x2e4   : > { %v1271_v17 = vpop.xlane.xlu0 %1270 }
 0x2e5   : > { %v1280_v20 = vsub.f32 %v1262_v7, %v1272_v15  ;;  %v1273_v22 = vmax.f32 %v1267_v10, %v1271_v17  ;;  %v1274_v53 = vsub.f32 %v3938_v54, %v1272_v15 }
 0x2e6   : > { %v1321_v31 = vpop.permute.xlu1 %1320 }
 0x2e7   : > { %v1282_v23 = vmul.f32 1.442695, %v1280_v20  ;;  %v1281_v25 = vsub.f32 %v1263_v8, %v1273_v22  ;;  %v1275_v51 = vsub.f32 %v3944_v55, %v1273_v22  ;;  %v1276_v63 = vmul.f32 1.442695, %v1274_v53 }
 0x2e8   : > { %v1319_v27 = vpop.permute.xlu0 %1318 }
 0x2e9   : > { %v1284_v29 = vmul.f32 1.442695, %v1281_v25  ;;  %3020 = vmatpush3.bf16.msra.mxu1 %v1319_v27  ;;  %3401 = vpow2.f32 %v1282_v23  ;;  %v1278_v58 = vmul.f32 1.442695, %v1275_v51 }
 0x2ea   : > { %3021 = vmatprep.subr.bf16.mxu1 %v3545_v6  ;;  %v1382_v35 = vpop.permute.xlu1 %1381 }
 0x2eb   : > { %3403 = vpow2.f32 %v1284_v29 }
 0x2ec   : > { %v1380_v34 = vpop.permute.xlu0 %1379  ;;  %3405 = vpow2.f32 %v1278_v58 }
 0x2ed   : > { %3022 = vmatpush3.bf16.msra.mxu1 %v1321_v31  ;;  %3407 = vpow2.f32 %v1276_v63 }
 0x2ee   : > { %3027 = vmatprep.subr.bf16.mxu1 %v3545_v6  ;;  %v1386_v39 = vpop.permute.xlu1 %1385 }
 0x2f0   : > { %v1384_v36 = vpop.permute.xlu0 %1383 }
 0x2f2   : > { %v1390_v44 = vpop.permute.xlu1 %1389 }
 0x2f3   : > { %v4016_v38 = vpop.eup %3401 }
 0x2f4   : > { %v1388_v37 = vpop.permute.xlu0 %1387 }
 0x2f5   : > { %v4018_v40 = vpop.eup %3403 }
 0x2f6   : > { %v1297_v28 = vpack.c.bf16 %v4018_v40, %v4016_v38  ;;  %v1394_v50 = vpop.permute.xlu1 %1393  ;;  %v4039_v5 = vpop.eup %3405 }
 0x2f7   : > { %v4042_v8 = vpop.eup %3407 }
 0x2f8   : > { %v1392_v41 = vpop.permute.xlu0 %1391  ;;  %3024 = vmatmul.mubr.bf16.vlgmr.msra.gmra.mrb[28].mxu1 %v1297_v28  ;;  %v1296_v9 = vpack.c.bf16 %v4039_v5, %v4042_v8 }
 0x2f9   : > { %3028 = vmatpush3.bf16.msra.mxu1 %v1380_v34  ;;  %3043 = vmatprep.mubr.msk.bf16.mxu1 %vm3546_vm1, %v3545_v6 }
 0x2fa   : > { %3029 = vmatprep.subr.bf16.mxu1 %v3545_v6  ;;  %v1541_v62 = vpop.permute.xlu1 %1540 }
 0x2fb   : > { %v1560_v17 = vsel %vm1092_vm5, %v1541_v62, 0 }
 0x2fc   : > { %v1453_v48 = vpop.permute.xlu0 %1452 }
 0x2fd   : > { %v1472_v49 = vsel %vm1092_vm5, %v1453_v48, 0  ;;  %3030 = vmatpush3.bf16.msra.mxu1 %v1382_v35 }
 0x2fe   : > { %3048 = vmatpush3.bf16.xpose.msra.mxu0 %v1472_v49  ;;  %3031 = vmatprep.subr.bf16.mxu1 %v3545_v6  ;;  %v1543_v55 = vpop.permute.xlu1 %1542 }
 0x2ff   : > { %3049 = vmatprep.subr.bf16.mxu0 %v3545_v6  ;;  %v1563_v27 = vsel %vm1092_vm5, %v1543_v55, 0 }
 0x300   : > { %v1455_v52 = vpop.permute.xlu0 %1454 }
 0x301   : > { %3032 = vmatpush3.bf16.msra.mxu1 %v1384_v36  ;;  %v1475_v56 = vsel %vm1092_vm5, %v1455_v52, 0 }
 0x302   : > { %3033 = vmatprep.subr.bf16.mxu1 %v3545_v6  ;;  %v1545_v4 = vpop.permute.xlu1 %1544 }
 0x303   : > { %v1566_v35 = vsel %vm1092_vm5, %v1545_v4, 0 }
 0x304   : > { %v1457_v2 = vpop.permute.xlu0 %1456 }
 0x305   : > { %3034 = vmatpush3.bf16.msra.mxu1 %v1386_v39  ;;  %v1478_v54 = vsel %vm1092_vm5, %v1457_v2, 0 }
 0x306   : > { %3050 = vmatpush3.bf16.xpose.msra.mxu0 %v1475_v56  ;;  %3035 = vmatprep.subr.bf16.mxu1 %v3545_v6  ;;  %v1547_v10 = vpop.permute.xlu1 %1546 }
 0x307   : > { %3051 = vmatprep.subr.bf16.mxu0 %v3545_v6  ;;  %v1569_v28 = vsel %vm1092_vm5, %v1547_v10, 0 }
 0x308   : > { %v1459_v3 = vpop.permute.xlu0 %1458 }
 0x309   : > { %3036 = vmatpush3.bf16.msra.mxu1 %v1388_v37  ;;  %v1481_v7 = vsel %vm1092_vm5, %v1459_v3, 0 }
 0x30a   : > { %3037 = vmatprep.subr.bf16.mxu1 %v3545_v6  ;;  %v1549_v20 = vpop.permute.xlu1 %1548 }
 0x30b   : > { %v1572_v49 = vsel %vm1092_vm5, %v1549_v20, 0 }
 0x30c   : > { %v1461_v14 = vpop.permute.xlu0 %1460 }
 0x30d   : > { %3038 = vmatpush3.bf16.msra.mxu1 %v1390_v44  ;;  %v1484_v15 = vsel %vm1092_vm5, %v1461_v14, 0 }
 0x30e   : > { %3052 = vmatpush3.bf16.xpose.msra.mxu0 %v1478_v54  ;;  %3039 = vmatprep.subr.bf16.mxu1 %v3545_v6  ;;  %v1551_v23 = vpop.permute.xlu1 %1550 }
 0x30f   : > { %3053 = vmatprep.subr.bf16.mxu0 %v3545_v6  ;;  %v1575_v52 = vsel %vm1092_vm5, %v1551_v23, 0 }
 0x310   : > { %v1463_v22 = vpop.permute.xlu0 %1462 }
 0x311   : > { %3040 = vmatpush3.bf16.msra.mxu1 %v1392_v41  ;;  %v1487_v25 = vsel %vm1092_vm5, %v1463_v22, 0 }
 0x312   : > { %3041 = vmatprep.subr.bf16.mxu1 %v3545_v6  ;;  %v1553_v31 = vpop.permute.xlu1 %1552 }
 0x313   : > { %v1578_v58 = vsel %vm1092_vm5, %v1553_v31, 0 }
 0x314   : > { %v1465_v29 = vpop.permute.xlu0 %1464 }
 0x315   : > { %3042 = vmatpush3.bf16.msra.mxu1 %v1394_v50  ;;  %v1490_v34 = vsel %vm1092_vm5, %v1465_v29, 0 }
 0x316   : > { %3054 = vmatpush3.bf16.xpose.msra.mxu0 %v1481_v7  ;;  %3067 = vmatprep.subr.bf16.mxu1 %v3545_v6  ;;  %v1555_v36 = vpop.permute.xlu1 %1554 }
 0x317   : > { %3055 = vmatprep.subr.bf16.mxu0 %v3545_v6  ;;  %v1581_v63 = vsel %vm1092_vm5, %v1555_v36, 0 }
 0x318   : > { %3044 = vmatmul.mubr.bf16.vlgmr.msra.gmra.mrb[28].mxu1 %v1296_v9  ;;  %v1467_v37 = vpop.permute.xlu0 %1466 }
 0x319   : > { %3083 = vmatprep.mubr.msk.bf16.mxu1 %vm3546_vm1, %v3545_v6  ;;  %v1493_v39 = vsel %vm1092_vm5, %v1467_v37, 0 }
 0x31a   : > { %v1539_v41 = vpop.permute.xlu1 %1538 }
 0x31c   : > { %v1451_v44 = vpop.permute.xlu0 %1450 }
 0x31e   : > { %3056 = vmatpush3.bf16.xpose.msra.mxu0 %v1484_v15  ;;  %3068 = vmatpush3.bf16.xpose.msra.mxu1 %v1560_v17  ;;  %v1661_v48 = vpop.permute.xlu1 %1660 }
 0x31f   : > { %3057 = vmatprep.subr.bf16.mxu0 %v3545_v6  ;;  %3069 = vmatprep.subr.bf16.mxu1 %v3545_v6 }
 0x320   : > { %v1663_v50 = vpop.permute.xlu0 %1662 }
 0x322   : > { %v1665_v51 = vpop.permute.xlu1 %1664 }
 0x324   : > { %v1669_v56 = vpop.permute.xlu0 %1668 }
 0x326   : > { %3058 = vmatpush3.bf16.xpose.msra.mxu0 %v1487_v25  ;;  %3070 = vmatpush3.bf16.xpose.msra.mxu1 %v1563_v27  ;;  %v1667_v53 = vpop.permute.xlu1 %1666 }
 0x327   : > { %3059 = vmatprep.subr.bf16.mxu0 %v3545_v6  ;;  %3071 = vmatprep.subr.bf16.mxu1 %v3545_v6 }
 0x32a   : > { %v1671_v62 = vpop.permute.xlu1 %1670 }
 0x32e   : > { %3060 = vmatpush3.bf16.xpose.msra.mxu0 %v1490_v34  ;;  %3072 = vmatpush3.bf16.xpose.msra.mxu1 %v1566_v35 }
 0x32f   : > { %3061 = vmatprep.subr.bf16.mxu0 %v3545_v6  ;;  %3073 = vmatprep.subr.bf16.mxu1 %v3545_v6 }
 0x336   : > { %3062 = vmatpush3.bf16.xpose.msra.mxu0 %v1493_v39  ;;  %3074 = vmatpush3.bf16.xpose.msra.mxu1 %v1569_v28 }
 0x337   : > { %3087 = vmatprep.subr.bf16.mxu0 %v3545_v6  ;;  %3075 = vmatprep.subr.bf16.mxu1 %v3545_v6 }
 0x33d   : > { %3064 = vmatmul.mubr.msk.bf16.vlgmr.msra.gmra.mrb[16].mxu0 %vm1092_vm5, %v1451_v44 }
 0x33e   : > { %3088 = vmatpush3.bf16.msra.mxu0 %v1661_v48  ;;  %3103 = vmatprep.mubr.msk.bf16.mxu0 %vm3546_vm1, %v3545_v6 }
 0x33f   : > { %3076 = vmatpush3.bf16.xpose.msra.mxu1 %v1572_v49  ;;  %3089 = vmatprep.subr.bf16.mxu0 %v3545_v6 }
 0x340   : > { %3077 = vmatprep.subr.bf16.mxu1 %v3545_v6 }
 0x342   : > { %3090 = vmatpush3.bf16.msra.mxu0 %v1663_v50 }
 0x343   : > { %3091 = vmatprep.subr.bf16.mxu0 %v3545_v6 }
 0x346   : > { %3092 = vmatpush3.bf16.msra.mxu0 %v1665_v51 }
 0x347   : > { %3078 = vmatpush3.bf16.xpose.msra.mxu1 %v1575_v52  ;;  %3093 = vmatprep.subr.bf16.mxu0 %v3545_v6 }
 0x348   : > { %3079 = vmatprep.subr.bf16.mxu1 %v3545_v6 }
 0x34a   : > { %3094 = vmatpush3.bf16.msra.mxu0 %v1667_v53 }
 0x34b   : > { %3095 = vmatprep.subr.bf16.mxu0 %v3545_v6 }
 0x34e   : > { %3096 = vmatpush3.bf16.msra.mxu0 %v1669_v56 }
 0x34f   : > { %3080 = vmatpush3.bf16.xpose.msra.mxu1 %v1578_v58  ;;  %3097 = vmatprep.subr.bf16.mxu0 %v3545_v6 }
 0x350   : > { %3081 = vmatprep.subr.bf16.mxu1 %v3545_v6 }
 0x352   : > { %3098 = vmatpush3.bf16.msra.mxu0 %v1671_v62 }
 0x353   : > { %3099 = vmatprep.subr.bf16.mxu0 %v3545_v6 }
 0x357   : > { %3082 = vmatpush3.bf16.xpose.msra.mxu1 %v1581_v63 }
 0x358   : > { %3127 = vmatprep.subr.bf16.mxu1 %v3545_v6 }
 0x35e   : > { %3084 = vmatmul.mubr.msk.bf16.vlgmr.msra.gmra.mrb[32].mxu1 %vm1092_vm5, %v1539_v41 }
 0x35f   : > { %3143 = vmatprep.mubr.msk.bf16.mxu1 %vm3546_vm1, %v3545_v6 }
 0x3eb   : > { %v4086_v2 = vpop.f32.mrb[28].mxu1 }
 0x3ec   : > { %v3045_v55 = vpop.f32.mrb[29].mxu1 }
 0x3ed   : > { %v4088_v54 = vpop.f32.mrb[30].mxu1 }
 0x3ee   : > { %v3046_v3 = vpop.f32.mrb[31].mxu1 }
 0x410   : > { %v1529_v4 = vpop.f32.mrb[16].mxu0 }
 0x411   : > { %v1530_v7 = vadd.f32 %v1529_v4, %v3927_v45  ;;  %v3065_v9 = vpop.f32.mrb[17].mxu0 }
 0x412   : > { %v1532_v10 = vpop.f32.mrb[18].mxu0 }
 0x413   : > { %v1533_v14 = vadd.f32 %v1532_v10, %v3927_v45  ;;  %v3066_v15 = vpop.f32.mrb[19].mxu0  ;;  %v4095_v17 = vsel %vm1169_vm6, %v1530_v7, %v3929_v47 }
 0x414   : > { %1626 = vmax.xlane.f32.xlu0 %v4095_v17 }
 0x415   : > { %v4101_v20 = vsel %vm1170_vm7, %v1533_v14, %v3929_v47 }
 0x416   : > { %1628 = vmax.xlane.f32.xlu1 %v4101_v20 }
 0x427   : > { %1674 = vrot.lane.b32.xlu1 %v3905_v26, %s3550_s17 }
 0x42b   : > { %1727 = vrot.lane.b32.xlu1 %v3792_v19, %s3550_s17 }
 0x42f   : > { %1731 = vrot.lane.b32.xlu1 %v3827_v46, %s3550_s17 }
 0x431   : > { %v1617_v22 = vpop.f32.mrb[32].mxu1 }
 0x432   : > { %v1618_v23 = vadd.f32 %v1617_v22, %v3951_v60  ;;  %v3085_v25 = vpop.f32.mrb[33].mxu1 }
 0x433   : > { %v1620_v27 = vpop.f32.mrb[34].mxu1  ;;  %1735 = vrot.lane.b32.xlu1 %v3863_v12, %s3550_s17 }
 0x434   : > { %v1621_v29 = vadd.f32 %v1620_v27, %v3951_v60  ;;  %v3086_v31 = vpop.f32.mrb[35].mxu1  ;;  %v1624_v34 = vsel %vm1169_vm6, %v1618_v23, %v3953_v61 }
 0x435   : > { %1630 = vmax.xlane.f32.xlu0 %v1624_v34 }
 0x436   : > { %v1625_v35 = vsel %vm1170_vm7, %v1621_v29, %v3953_v61 }
 0x437   : > { %1739 = vrot.lane.b32.xlu1 %v3887_v21, %s3550_s17 }
 0x439   : > { %1632 = vmax.xlane.f32.xlu0 %v1625_v35 }
 0x43b   : > { %1886 = vrot.lane.b32.xlu1 %v3817_v43, %s3551_s28 }
 0x43f   : > { %1888 = vrot.lane.b32.xlu1 %v3815_v42, %s3551_s28 }
 0x443   : > { %1890 = vrot.lane.b32.xlu1 %v3851_v0, %s3551_s28 }
 0x447   : > { %1892 = vrot.lane.b32.xlu1 %v3839_v57, %s3551_s28 }
 0x44b   : > { %1894 = vrot.lane.b32.xlu1 %v3865_v13, %s3551_s28 }
 0x44f   : > { %1672 = vrot.lane.b32.xlu0 %v3896_v24, %s3550_s17  ;;  %1896 = vrot.lane.b32.xlu1 %v3861_v11, %s3551_s28 }
 0x453   : > { %1725 = vrot.lane.b32.xlu0 %v3774_v1, %s3550_s17  ;;  %1898 = vrot.lane.b32.xlu1 %v3896_v24, %s3551_s28 }
 0x457   : > { %1729 = vrot.lane.b32.xlu0 %v3806_v32, %s3550_s17  ;;  %1900 = vrot.lane.b32.xlu1 %v3905_v26, %s3551_s28 }
 0x45b   : > { %1733 = vrot.lane.b32.xlu0 %v3841_v59, %s3550_s17  ;;  %1884 = vrot.lane.b32.xlu1 %v3790_v18, %s3552_s19 }
 0x45f   : > { %1737 = vrot.lane.b32.xlu0 %v3879_v16, %s3550_s17  ;;  %2006 = vrot.lane.b32.xlu1 %v3817_v43, %s3552_s19  ;;  %s509_s17 = scalar_lea.vmem [#allocation4], %s2682_s27  ;;  %s3558_s27 = smov [#allocation4]  }
 0x463   : > { %1798 = vrot.lane.b32.xlu0 %v3774_v1, %s3551_s28  ;;  %2010 = vrot.lane.b32.xlu1 %v3851_v0, %s3552_s19 }
 0x467   : > { %1800 = vrot.lane.b32.xlu0 %v3792_v19, %s3551_s28  ;;  %2012 = vrot.lane.b32.xlu1 %v3839_v57, %s3552_s19 }
 0x46b   : > { %1802 = vrot.lane.b32.xlu0 %v3806_v32, %s3551_s28  ;;  %2016 = vrot.lane.b32.xlu1 %v3861_v11, %s3552_s19 }
 0x46f   : > { %1804 = vrot.lane.b32.xlu0 %v3827_v46, %s3551_s28 }
 0x473   : > { %1806 = vrot.lane.b32.xlu0 %v3841_v59, %s3551_s28 }
 0x477   : > { %1808 = vrot.lane.b32.xlu0 %v3863_v12, %s3551_s28 }
 0x47b   : > { %1810 = vrot.lane.b32.xlu0 %v3879_v16, %s3551_s28 }
 0x47f   : > { %1812 = vrot.lane.b32.xlu0 %v3887_v21, %s3551_s28 }
 0x483   : > { %1796 = vrot.lane.b32.xlu0 %v3790_v18, %s3551_s28  ;;  %s2538_s28 = sshll.u32 %s509_s17, 4  ;;  %s4475_s28 = int_to_ptr.vmem [resolvable:$true] %s2538_s28 }
 0x487   : > { %2008 = vrot.lane.b32.xlu0 %v3815_v42, %s3552_s19 }
 0x48b   : > { %2014 = vrot.lane.b32.xlu0 %v3865_v13, %s3552_s19 }
 0x4a1   : > { %v1627_v1 = vpop.xlane.xlu0 %1626 }
 0x4a3   : > { %v1629_v43 = vpop.xlane.xlu1 %1628 }
 0x4a7   : > { %v1675_v36 = vpop.permute.xlu1 %1674 }
 0x4ab   : > { %v1728_v13 = vpop.permute.xlu1 %1727 }
 0x4af   : > { %v1732_v44 = vpop.permute.xlu1 %1731 }
 0x4b3   : > { %v1736_v51 = vpop.permute.xlu1 %1735 }
 0x4b7   : > { %v1740_v56 = vpop.permute.xlu1 %1739 }
 0x4bb   : > { %v1887_v4 = vpop.permute.xlu1 %1886 }
 0x4bf   : > { %v1889_v10 = vpop.permute.xlu1 %1888 }
 0x4c2   : > { %v1631_v19 = vpop.xlane.xlu0 %1630 }
 0x4c3   : > { %v1634_v32 = vmax.f32 %v1627_v1, %v1631_v19 }
 0x4c5   : > { %v1642_v46 = vsub.f32 %v1624_v34, %v1634_v32  ;;  %v1636_v63 = vsub.f32 %v4095_v17, %v1634_v32  ;;  %v1891_v17 = vpop.permute.xlu1 %1890  ;;  %v1906_v34 = vsel %vm1092_vm5, %v1887_v4, 0 }
 0x4c6   : > { %v1633_v57 = vpop.xlane.xlu0 %1632 }
 0x4c7   : > { %v1635_v59 = vmax.f32 %v1629_v43, %v1633_v57  ;;  %v1644_v0 = vmul.f32 1.442695, %v1642_v46  ;;  %v1638_v7 = vmul.f32 1.442695, %v1636_v63  ;;  %v1909_v43 = vsel %vm1092_vm5, %v1889_v10, 0 }
 0x4c9   : > { %v1643_v11 = vsub.f32 %v1625_v35, %v1635_v59  ;;  %3409 = vpow2.f32 %v1644_v0  ;;  %v1637_v58 = vsub.f32 %v4101_v20, %v1635_v59  ;;  %v1893_v27 = vpop.permute.xlu1 %1892  ;;  %v1912_v0 = vsel %vm1092_vm5, %v1891_v17, 0 }
 0x4ca   : > { %v1673_v16 = vpop.permute.xlu0 %1672 }
 0x4cb   : > { %v1646_v37 = vmul.f32 1.442695, %v1643_v11  ;;  %3100 = vmatpush3.bf16.msra.mxu0 %v1673_v16  ;;  %v1640_v3 = vmul.f32 1.442695, %v1637_v58 }
 0x4cc   : > { %3101 = vmatprep.subr.bf16.mxu0 %v3545_v6 }
 0x4cd   : > { %3411 = vpow2.f32 %v1646_v37  ;;  %v1895_v35 = vpop.permute.xlu1 %1894  ;;  %v1915_v37 = vsel %vm1092_vm5, %v1893_v27, 0  ;;  %v4259_v27 = vld [vmem:[#allocation2 + $0x18] sm:$0xff] }
 0x4ce   : > { %v1726_v42 = vpop.permute.xlu0 %1725  ;;  %3413 = vpow2.f32 %v1640_v3 }
 0x4cf   : > { %3102 = vmatpush3.bf16.msra.mxu0 %v1675_v36  ;;  %3415 = vpow2.f32 %v1638_v7 }
 0x4d0   : > { %3107 = vmatprep.subr.bf16.mxu0 %v3545_v6 }
 0x4d1   : > { %v1897_v19 = vpop.permute.xlu1 %1896 }
 0x4d2   : > { %v1730_v39 = vpop.permute.xlu0 %1729 }
 0x4d3   : > { %v4165_v41 = vpop.eup %3409 }
 0x4d5   : > { %v1899_v57 = vpop.permute.xlu1 %1898 }
 0x4d6   : > { %v1734_v28 = vpop.permute.xlu0 %1733 }
 0x4d7   : > { %v4167_v48 = vpop.eup %3411 }
 0x4d8   : > { %v1659_v49 = vpack.c.bf16 %v4167_v48, %v4165_v41  ;;  %v4188_v20 = vpop.eup %3413 }
 0x4d9   : > { %v4191_v23 = vpop.eup %3415  ;;  %v1901_v11 = vpop.permute.xlu1 %1900 }
 0x4da   : > { %v1738_v50 = vpop.permute.xlu0 %1737  ;;  %3104 = vmatmul.mubr.bf16.vlgmr.msra.gmra.mrb[20].mxu0 %v1659_v49  ;;  %v1658_v25 = vpack.c.bf16 %v4188_v20, %v4191_v23  ;;  %v1927_v58 = vsel %vm1092_vm5, %v1901_v11, 0  ;;  %v4283_v11 = vld [vmem:[#allocation2] sm:$0xff] }
 0x4db   : > { %3108 = vmatpush3.bf16.msra.mxu0 %v1726_v42  ;;  %3123 = vmatprep.mubr.msk.bf16.mxu0 %vm3546_vm1, %v3545_v6 }
 0x4dc   : > { %3109 = vmatprep.subr.bf16.mxu0 %v3545_v6 }
 0x4dd   : > { %v1885_v42 = vpop.permute.xlu1 %1884 }
 0x4de   : > { %v1799_v52 = vpop.permute.xlu0 %1798 }
 0x4df   : > { %v1818_v53 = vsel %vm1092_vm5, %v1799_v52, 0  ;;  %3110 = vmatpush3.bf16.msra.mxu0 %v1728_v13 }
 0x4e0   : > { %3128 = vmatpush3.bf16.xpose.msra.mxu1 %v1818_v53  ;;  %3111 = vmatprep.subr.bf16.mxu0 %v3545_v6  ;;  %v1924_v53 = vsel %vm1092_vm5, %v1899_v57, 0  ;;  %v3453_v57 = vld [vmem:[#allocation3 + $0x10] sm:$0xff] }
 0x4e1   : > { %3129 = vmatprep.subr.bf16.mxu1 %v3545_v6 }
 0x4e2   : > { %v1801_v62 = vpop.permute.xlu0 %1800 }
 0x4e3   : > { %3112 = vmatpush3.bf16.msra.mxu0 %v1730_v39  ;;  %v1821_v55 = vsel %vm1092_vm5, %v1801_v62, 0  ;;  %v2007_v39 = vpop.permute.xlu1 %2006 }
 0x4e4   : > { %3113 = vmatprep.subr.bf16.mxu0 %v3545_v6 }
 0x4e6   : > { %v1803_v9 = vpop.permute.xlu0 %1802 }
 0x4e7   : > { %3114 = vmatpush3.bf16.msra.mxu0 %v1732_v44  ;;  %v1824_v14 = vsel %vm1092_vm5, %v1803_v9, 0  ;;  %v2011_v49 = vpop.permute.xlu1 %2010 }
 0x4e8   : > { %3130 = vmatpush3.bf16.xpose.msra.mxu1 %v1821_v55  ;;  %3115 = vmatprep.subr.bf16.mxu0 %v3545_v6 }
 0x4e9   : > { %3131 = vmatprep.subr.bf16.mxu1 %v3545_v6 }
 0x4ea   : > { %v1805_v15 = vpop.permute.xlu0 %1804 }
 0x4eb   : > { %3116 = vmatpush3.bf16.msra.mxu0 %v1734_v28  ;;  %v1827_v22 = vsel %vm1092_vm5, %v1805_v15, 0  ;;  %v1918_v28 = vsel %vm1092_vm5, %v1895_v35, 0 }
 0x4ec   : > { %3117 = vmatprep.subr.bf16.mxu0 %v3545_v6 }
 0x4ee   : > { %v1807_v29 = vpop.permute.xlu0 %1806 }
 0x4ef   : > { %3118 = vmatpush3.bf16.msra.mxu0 %v1736_v51  ;;  %v1830_v31 = vsel %vm1092_vm5, %v1807_v29, 0  ;;  %v2013_v51 = vpop.permute.xlu1 %2012 }
 0x4f0   : > { %3132 = vmatpush3.bf16.xpose.msra.mxu1 %v1824_v14  ;;  %3119 = vmatprep.subr.bf16.mxu0 %v3545_v6 }
 0x4f1   : > { %3133 = vmatprep.subr.bf16.mxu1 %v3545_v6 }
 0x4f2   : > { %v1809_v1 = vpop.permute.xlu0 %1808 }
 0x4f3   : > { %3120 = vmatpush3.bf16.msra.mxu0 %v1738_v50  ;;  %v1833_v32 = vsel %vm1092_vm5, %v1809_v1, 0  ;;  %v1921_v50 = vsel %vm1092_vm5, %v1897_v19, 0 }
 0x4f4   : > { %3121 = vmatprep.subr.bf16.mxu0 %v3545_v6 }
 0x4f6   : > { %v1811_v46 = vpop.permute.xlu0 %1810 }
 0x4f7   : > { %3122 = vmatpush3.bf16.msra.mxu0 %v1740_v56  ;;  %v1836_v59 = vsel %vm1092_vm5, %v1811_v46, 0  ;;  %v2017_v56 = vpop.permute.xlu1 %2016  ;;  %v3451_v46 = vld [vmem:[#allocation3] sm:$0xff] }
 0x4f8   : > { %3134 = vmatpush3.bf16.xpose.msra.mxu1 %v1827_v22  ;;  %3147 = vmatprep.subr.bf16.mxu0 %v3545_v6 }
 0x4f9   : > { %3135 = vmatprep.subr.bf16.mxu1 %v3545_v6 }
 0x4fa   : > { %3124 = vmatmul.mubr.bf16.vlgmr.msra.gmra.mrb[20].mxu0 %v1658_v25  ;;  %v1813_v16 = vpop.permute.xlu0 %1812  ;;  %v4255_v25 = vld [vmem:[#allocation2 + $0x8] sm:$0xff] }
 0x4fb   : > { %3163 = vmatprep.mubr.msk.bf16.mxu0 %vm3546_vm1, %v3545_v6  ;;  %v1839_v36 = vsel %vm1092_vm5, %v1813_v16, 0  ;;  %v4289_v16 = vld [vmem:[#allocation2 + $0x10] sm:$0xff] }
 0x4fe   : > { %v1797_v13 = vpop.permute.xlu0 %1796 }
 0x500   : > { %3136 = vmatpush3.bf16.xpose.msra.mxu1 %v1830_v31  ;;  %3148 = vmatpush3.bf16.xpose.msra.mxu0 %v1906_v34 }
 0x501   : > { %3137 = vmatprep.subr.bf16.mxu1 %v3545_v6  ;;  %3149 = vmatprep.subr.bf16.mxu0 %v3545_v6 }
 0x502   : > { %v2009_v44 = vpop.permute.xlu0 %2008 }
 0x506   : > { %v2015_v52 = vpop.permute.xlu0 %2014 }
 0x508   : > { %3138 = vmatpush3.bf16.xpose.msra.mxu1 %v1833_v32  ;;  %3150 = vmatpush3.bf16.xpose.msra.mxu0 %v1909_v43 }
 0x509   : > { %3139 = vmatprep.subr.bf16.mxu1 %v3545_v6  ;;  %3151 = vmatprep.subr.bf16.mxu0 %v3545_v6 }
 0x510   : > { %3140 = vmatpush3.bf16.xpose.msra.mxu1 %v1836_v59  ;;  %3152 = vmatpush3.bf16.xpose.msra.mxu0 %v1912_v0  ;;  %v3454_v59 = vld [vmem:[#allocation3 + $0x18] sm:$0xff]  ;;  %v3455_v0 = vld [vmem:[#allocation3 + $0x20] sm:$0xff] }
 0x511   : > { %3141 = vmatprep.subr.bf16.mxu1 %v3545_v6  ;;  %3153 = vmatprep.subr.bf16.mxu0 %v3545_v6 }
 0x518   : > { %3142 = vmatpush3.bf16.xpose.msra.mxu1 %v1839_v36  ;;  %3154 = vmatpush3.bf16.xpose.msra.mxu0 %v1915_v37  ;;  %v4295_v36 = vld [vmem:[#allocation2 + $0x20] sm:$0xff]  ;;  %v4301_v37 = vld [vmem:[#allocation2 + $0x30] sm:$0xff] }
 0x519   : > { %3167 = vmatprep.subr.bf16.mxu1 %v3545_v6  ;;  %3155 = vmatprep.subr.bf16.mxu0 %v3545_v6 }
 0x51f   : > { %3144 = vmatmul.mubr.msk.bf16.vlgmr.msra.gmra.mrb[36].mxu1 %vm1092_vm5, %v1797_v13 }
 0x520   : > { %3168 = vmatpush3.bf16.msra.mxu1 %v2007_v39  ;;  %3183 = vmatprep.mubr.msk.bf16.mxu1 %vm3546_vm1, %v3545_v6 }
 0x521   : > { %3156 = vmatpush3.bf16.xpose.msra.mxu0 %v1918_v28  ;;  %3169 = vmatprep.subr.bf16.mxu1 %v3545_v6 }
 0x522   : > { %3157 = vmatprep.subr.bf16.mxu0 %v3545_v6 }
 0x524   : > { %3170 = vmatpush3.bf16.msra.mxu1 %v2009_v44 }
 0x525   : > { %3171 = vmatprep.subr.bf16.mxu1 %v3545_v6 }
 0x528   : > { %3172 = vmatpush3.bf16.msra.mxu1 %v2011_v49 }
 0x529   : > { %3158 = vmatpush3.bf16.xpose.msra.mxu0 %v1921_v50  ;;  %3173 = vmatprep.subr.bf16.mxu1 %v3545_v6 }
 0x52a   : > { %3159 = vmatprep.subr.bf16.mxu0 %v3545_v6 }
 0x52c   : > { %3174 = vmatpush3.bf16.msra.mxu1 %v2013_v51 }
 0x52d   : > { %3175 = vmatprep.subr.bf16.mxu1 %v3545_v6 }
 0x530   : > { %3176 = vmatpush3.bf16.msra.mxu1 %v2015_v52 }
 0x531   : > { %3160 = vmatpush3.bf16.xpose.msra.mxu0 %v1924_v53  ;;  %3177 = vmatprep.subr.bf16.mxu1 %v3545_v6 }
 0x532   : > { %3161 = vmatprep.subr.bf16.mxu0 %v3545_v6 }
 0x534   : > { %3178 = vmatpush3.bf16.msra.mxu1 %v2017_v56 }
 0x535   : > { %3179 = vmatprep.subr.bf16.mxu1 %v3545_v6 }
 0x539   : > { %3162 = vmatpush3.bf16.xpose.msra.mxu0 %v1927_v58 }
 0x53a   : > { %3207 = vmatprep.subr.bf16.mxu0 %v3545_v6 }
 0x540   : > { %3164 = vmatmul.mubr.msk.bf16.vlgmr.msra.gmra.mrb[24].mxu0 %vm1092_vm5, %v1885_v42 }
 0x541   : > { %3223 = vmatprep.mubr.msk.bf16.mxu0 %vm3546_vm1, %v3545_v6 }
 0x5cd   : > { %v4235_v62 = vpop.f32.mrb[20].mxu0 }
 0x5ce   : > { %v3125_v63 = vpop.f32.mrb[21].mxu0 }
 0x5cf   : > { %v4237_v55 = vpop.f32.mrb[22].mxu0 }
 0x5d0   : > { %v3126_v3 = vpop.f32.mrb[23].mxu0 }
 0x5f2   : > { %v1875_v4 = vpop.f32.mrb[36].mxu1 }
 0x5f3   : > { %v1876_v7 = vadd.f32 %v1875_v4, %v3927_v45  ;;  %v3145_v9 = vpop.f32.mrb[37].mxu1 }
 0x5f4   : > { %v1878_v10 = vpop.f32.mrb[38].mxu1 }
 0x5f5   : > { %v1879_v14 = vadd.f32 %v1878_v10, %v3927_v45  ;;  %v3146_v15 = vpop.f32.mrb[39].mxu1  ;;  %v4244_v17 = vsel %vm1169_vm6, %v1876_v7, %v3929_v47 }
 0x5f6   : > { %1972 = vmax.xlane.f32.xlu0 %v4244_v17 }
 0x5f7   : > { %v4250_v22 = vsel %vm1170_vm7, %v1879_v14, %v3929_v47 }
 0x5f8   : > { %1974 = vmax.xlane.f32.xlu1 %v4250_v22 }
 0x609   : > { %2020 = vrot.lane.b32.xlu1 %v3905_v26, %s3552_s19 }
 0x60d   : > { %2073 = vrot.lane.b32.xlu1 %v4255_v25, %s3552_s19 }
 0x611   : > { %2077 = vrot.lane.b32.xlu1 %v4259_v27, %s3552_s19 }
 0x613   : > { %v1963_v29 = vpop.f32.mrb[24].mxu0 }
 0x614   : > { %v1964_v31 = vadd.f32 %v1963_v29, %v3951_v60  ;;  %v3165_v34 = vpop.f32.mrb[25].mxu0 }
 0x615   : > { %v1966_v35 = vpop.f32.mrb[26].mxu0  ;;  %2081 = vrot.lane.b32.xlu1 %v3863_v12, %s3552_s19  ;;  %v3452_v12 = vld [vmem:[#allocation3 + $0x8] sm:$0xff] }
 0x616   : > { %v1967_v1 = vadd.f32 %v1966_v35, %v3951_v60  ;;  %v3166_v19 = vpop.f32.mrb[27].mxu0  ;;  %v1970_v32 = vsel %vm1169_vm6, %v1964_v31, %v3953_v61 }
 0x617   : > { %1976 = vmax.xlane.f32.xlu0 %v1970_v32 }
 0x618   : > { %v1971_v43 = vsel %vm1170_vm7, %v1967_v1, %v3953_v61 }
 0x619   : > { %2085 = vrot.lane.b32.xlu1 %v3887_v21, %s3552_s19  ;;  %v3456_v21 = vld [vmem:[#allocation3 + $0x28] sm:$0xff] }
 0x61b   : > { %1978 = vmax.xlane.f32.xlu0 %v1971_v43 }
 0x61d   : > { %2232 = vrot.lane.b32.xlu1 %v3451_v46, %s3553_s14 }
 0x621   : > { %2234 = vrot.lane.b32.xlu1 %v3452_v12, %s3553_s14 }
 0x625   : > { %2236 = vrot.lane.b32.xlu1 %v3453_v57, %s3553_s14 }
 0x629   : > { %2238 = vrot.lane.b32.xlu1 %v3454_v59, %s3553_s14 }
 0x62d   : > { %2240 = vrot.lane.b32.xlu1 %v3455_v0, %s3553_s14 }
 0x631   : > { %2018 = vrot.lane.b32.xlu0 %v3896_v24, %s3552_s19  ;;  %2242 = vrot.lane.b32.xlu1 %v3456_v21, %s3553_s14 }
 0x635   : > { %2071 = vrot.lane.b32.xlu0 %v4283_v11, %s3552_s19  ;;  %2244 = vrot.lane.b32.xlu1 %v3896_v24, %s3553_s14  ;;  %v4319_v24 = vld [vmem:[#allocation2 + $0x28] sm:$0xff] }
 0x639   : > { %2075 = vrot.lane.b32.xlu0 %v4289_v16, %s3552_s19  ;;  %2246 = vrot.lane.b32.xlu1 %v3905_v26, %s3553_s14  ;;  %v4325_v26 = vld [vmem:[#allocation2 + $0x38] sm:$0xff] }
 0x63d   : > { %2079 = vrot.lane.b32.xlu0 %v4295_v36, %s3552_s19  ;;  %2230 = vrot.lane.b32.xlu1 %v3790_v18, %s3554_s18 }
 0x641   : > { %2083 = vrot.lane.b32.xlu0 %v4301_v37, %s3552_s19  ;;  %2352 = vrot.lane.b32.xlu1 %v3451_v46, %s3554_s18  ;;  %s2751_s19 = sshll.u32 %s3535_s24, 8  ;;  %s4484_s24 = scalar_lea.sflag [#allocation5], %s507_s30 }
 0x645   : > { %2144 = vrot.lane.b32.xlu0 %v4283_v11, %s3553_s14  ;;  %2356 = vrot.lane.b32.xlu1 %v3453_v57, %s3554_s18 }
 0x649   : > { %2146 = vrot.lane.b32.xlu0 %v4255_v25, %s3553_s14  ;;  %2358 = vrot.lane.b32.xlu1 %v3454_v59, %s3554_s18 }
 0x64d   : > { %2148 = vrot.lane.b32.xlu0 %v4289_v16, %s3553_s14  ;;  %2362 = vrot.lane.b32.xlu1 %v3456_v21, %s3554_s18 }
 0x651   : > { %2150 = vrot.lane.b32.xlu0 %v4259_v27, %s3553_s14 }
 0x655   : > { %2152 = vrot.lane.b32.xlu0 %v4295_v36, %s3553_s14 }
 0x659   : > { %2154 = vrot.lane.b32.xlu0 %v4319_v24, %s3553_s14 }
 0x65d   : > { %2156 = vrot.lane.b32.xlu0 %v4301_v37, %s3553_s14 }
 0x661   : > { %2158 = vrot.lane.b32.xlu0 %v4325_v26, %s3553_s14 }
 0x665   : > { %2142 = vrot.lane.b32.xlu0 %v3790_v18, %s3553_s14 }
 0x669   : > { %2354 = vrot.lane.b32.xlu0 %v3452_v12, %s3554_s18 }
 0x66d   : > { %2360 = vrot.lane.b32.xlu0 %v3455_v0, %s3554_s18 }
 0x683   : > { %v1973_v42 = vpop.xlane.xlu0 %1972 }
 0x685   : > { %v1975_v28 = vpop.xlane.xlu1 %1974 }
 0x689   : > { %v2021_v56 = vpop.permute.xlu1 %2020 }
 0x68d   : > { %v2074_v63 = vpop.permute.xlu1 %2073 }
 0x691   : > { %v2078_v9 = vpop.permute.xlu1 %2077 }
 0x695   : > { %v2082_v29 = vpop.permute.xlu1 %2081 }
 0x699   : > { %v2086_v35 = vpop.permute.xlu1 %2085 }
 0x69d   : > { %v2233_v12 = vpop.permute.xlu1 %2232 }
 0x6a4   : > { %v1977_v13 = vpop.xlane.xlu0 %1976 }
 0x6a5   : > { %v1980_v39 = vmax.f32 %v1973_v42, %v1977_v13 }
 0x6a7   : > { %v1988_v44 = vsub.f32 %v1970_v32, %v1980_v39  ;;  %v1982_v32 = vsub.f32 %v4244_v17, %v1980_v39 }
 0x6a8   : > { %v1979_v49 = vpop.xlane.xlu0 %1978 }
 0x6a9   : > { %v1981_v50 = vmax.f32 %v1975_v28, %v1979_v49  ;;  %v1990_v51 = vmul.f32 1.442695, %v1988_v44  ;;  %v1984_v57 = vmul.f32 1.442695, %v1982_v32 }
 0x6ab   : > { %v1989_v52 = vsub.f32 %v1971_v43, %v1981_v50  ;;  %3417 = vpow2.f32 %v1990_v51  ;;  %v1983_v1 = vsub.f32 %v4250_v22, %v1981_v50  ;;  %v2235_v22 = vpop.permute.xlu1 %2234  ;;  %v2252_v51 = vsel %vm1092_vm5, %v2233_v12, 0 }
 0x6ac   : > { %v2019_v53 = vpop.permute.xlu0 %2018 }
 0x6ad   : > { %v1992_v58 = vmul.f32 1.442695, %v1989_v52  ;;  %3180 = vmatpush3.bf16.msra.mxu1 %v2019_v53  ;;  %v1986_v46 = vmul.f32 1.442695, %v1983_v1 }
 0x6ae   : > { %3181 = vmatprep.subr.bf16.mxu1 %v3545_v6 }
 0x6af   : > { %3419 = vpow2.f32 %v1992_v58  ;;  %v2237_v21 = vpop.permute.xlu1 %2236 }
 0x6b0   : > { %v2072_v18 = vpop.permute.xlu0 %2071  ;;  %3421 = vpow2.f32 %v1986_v46 }
 0x6b1   : > { %3182 = vmatpush3.bf16.msra.mxu1 %v2021_v56  ;;  %3423 = vpow2.f32 %v1984_v57 }
 0x6b2   : > { %3187 = vmatprep.subr.bf16.mxu1 %v3545_v6 }
 0x6b3   : > { %v2239_v44 = vpop.permute.xlu1 %2238 }
 0x6b4   : > { %v2076_v3 = vpop.permute.xlu0 %2075 }
 0x6b5   : > { %v4335_v7 = vpop.eup %3417 }
 0x6b7   : > { %v2241_v52 = vpop.permute.xlu1 %2240 }
 0x6b8   : > { %v2080_v4 = vpop.permute.xlu0 %2079 }
 0x6b9   : > { %v4337_v10 = vpop.eup %3419 }
 0x6ba   : > { %v2005_v14 = vpack.c.bf16 %v4337_v10, %v4335_v7  ;;  %v4358_v42 = vpop.eup %3421 }
 0x6bb   : > { %v4361_v39 = vpop.eup %3423  ;;  %v2243_v56 = vpop.permute.xlu1 %2242 }
 0x6bc   : > { %v2084_v15 = vpop.permute.xlu0 %2083  ;;  %3184 = vmatmul.mubr.bf16.vlgmr.msra.gmra.mrb[40].mxu1 %v2005_v14  ;;  %v2004_v28 = vpack.c.bf16 %v4358_v42, %v4361_v39  ;;  %v2267_v46 = vsel %vm1092_vm5, %v2243_v56, 0 }
 0x6bd   : > { %3188 = vmatpush3.bf16.msra.mxu1 %v2072_v18  ;;  %3203 = vmatprep.mubr.msk.bf16.mxu1 %vm3546_vm1, %v3545_v6  ;;  %v2255_v18 = vsel %vm1092_vm5, %v2235_v22, 0 }
 0x6be   : > { %3189 = vmatprep.subr.bf16.mxu1 %v3545_v6 }
 0x6c0   : > { %v2145_v31 = vpop.permute.xlu0 %2144 }
 0x6c1   : > { %v2164_v34 = vsel %vm1092_vm5, %v2145_v31, 0  ;;  %3190 = vmatpush3.bf16.msra.mxu1 %v2074_v63  ;;  %v2261_v31 = vsel %vm1092_vm5, %v2239_v44, 0 }
 0x6c2   : > { %3208 = vmatpush3.bf16.xpose.msra.mxu0 %v2164_v34  ;;  %3191 = vmatprep.subr.bf16.mxu1 %v3545_v6 }
 0x6c3   : > { %3209 = vmatprep.subr.bf16.mxu0 %v3545_v6 }
 0x6c4   : > { %v2147_v19 = vpop.permute.xlu0 %2146 }
 0x6c5   : > { %3192 = vmatpush3.bf16.msra.mxu1 %v2076_v3  ;;  %v2167_v43 = vsel %vm1092_vm5, %v2147_v19, 0  ;;  %v2245_v3 = vpop.permute.xlu1 %2244  ;;  %v2264_v19 = vsel %vm1092_vm5, %v2241_v52, 0 }
 0x6c6   : > { %3193 = vmatprep.subr.bf16.mxu1 %v3545_v6 }
 0x6c8   : > { %v2149_v59 = vpop.permute.xlu0 %2148 }
 0x6c9   : > { %3194 = vmatpush3.bf16.msra.mxu1 %v2078_v9  ;;  %v2170_v17 = vsel %vm1092_vm5, %v2149_v59, 0  ;;  %v2258_v9 = vsel %vm1092_vm5, %v2237_v21, 0  ;;  %v2247_v14 = vpop.permute.xlu1 %2246  ;;  %v2270_v59 = vsel %vm1092_vm5, %v2245_v3, 0 }
 0x6ca   : > { %3210 = vmatpush3.bf16.xpose.msra.mxu0 %v2167_v43  ;;  %3195 = vmatprep.subr.bf16.mxu1 %v3545_v6 }
 0x6cb   : > { %3211 = vmatprep.subr.bf16.mxu0 %v3545_v6 }
 0x6cc   : > { %v2151_v0 = vpop.permute.xlu0 %2150 }
 0x6cd   : > { %3196 = vmatpush3.bf16.msra.mxu1 %v2080_v4  ;;  %v2173_v13 = vsel %vm1092_vm5, %v2151_v0, 0  ;;  %v2231_v34 = vpop.permute.xlu1 %2230 }
 0x6ce   : > { %3197 = vmatprep.subr.bf16.mxu1 %v3545_v6 }
 0x6d0   : > { %v2153_v49 = vpop.permute.xlu0 %2152 }
 0x6d1   : > { %3198 = vmatpush3.bf16.msra.mxu1 %v2082_v29  ;;  %v2176_v50 = vsel %vm1092_vm5, %v2153_v49, 0  ;;  %v2353_v1 = vpop.permute.xlu1 %2352 }
 0x6d2   : > { %3212 = vmatpush3.bf16.xpose.msra.mxu0 %v2170_v17  ;;  %3199 = vmatprep.subr.bf16.mxu1 %v3545_v6  ;;  %v2273_v17 = vsel %vm1092_vm5, %v2247_v14, 0 }
 0x6d3   : > { %3213 = vmatprep.subr.bf16.mxu0 %v3545_v6 }
 0x6d4   : > { %v2155_v53 = vpop.permute.xlu0 %2154 }
 0x6d5   : > { %3200 = vmatpush3.bf16.msra.mxu1 %v2084_v15  ;;  %v2179_v58 = vsel %vm1092_vm5, %v2155_v53, 0  ;;  %v2357_v43 = vpop.permute.xlu1 %2356 }
 0x6d6   : > { %3201 = vmatprep.subr.bf16.mxu1 %v3545_v6 }
 0x6d8   : > { %v2157_v63 = vpop.permute.xlu0 %2156 }
 0x6d9   : > { %3202 = vmatpush3.bf16.msra.mxu1 %v2086_v35  ;;  %v2182_v4 = vsel %vm1092_vm5, %v2157_v63, 0  ;;  %v2359_v12 = vpop.permute.xlu1 %2358 }
 0x6da   : > { %3214 = vmatpush3.bf16.xpose.msra.mxu0 %v2173_v13  ;;  %3227 = vmatprep.subr.bf16.mxu1 %v3545_v6 }
 0x6db   : > { %3215 = vmatprep.subr.bf16.mxu0 %v3545_v6 }
 0x6dc   : > { %3204 = vmatmul.mubr.bf16.vlgmr.msra.gmra.mrb[40].mxu1 %v2004_v28  ;;  %v2159_v15 = vpop.permute.xlu0 %2158 }
 0x6dd   : > { %3243 = vmatprep.mubr.msk.bf16.mxu1 %vm3546_vm1, %v3545_v6  ;;  %v2185_v29 = vsel %vm1092_vm5, %v2159_v15, 0  ;;  %v2363_v22 = vpop.permute.xlu1 %2362 }
 0x6e0   : > { %v2143_v35 = vpop.permute.xlu0 %2142 }
 0x6e2   : > { %3216 = vmatpush3.bf16.xpose.msra.mxu0 %v2176_v50  ;;  %3228 = vmatpush3.bf16.xpose.msra.mxu1 %v2252_v51 }
 0x6e3   : > { %3217 = vmatprep.subr.bf16.mxu0 %v3545_v6  ;;  %3229 = vmatprep.subr.bf16.mxu1 %v3545_v6 }
 0x6e4   : > { %v2355_v32 = vpop.permute.xlu0 %2354 }
 0x6e8   : > { %v2361_v57 = vpop.permute.xlu0 %2360 }
 0x6ea   : > { %3218 = vmatpush3.bf16.xpose.msra.mxu0 %v2179_v58  ;;  %3230 = vmatpush3.bf16.xpose.msra.mxu1 %v2255_v18  ;;  %v3463_v18 = vld [vmem:[#allocation3 + $0x38] sm:$0xff] }
 0x6eb   : > { %3219 = vmatprep.subr.bf16.mxu0 %v3545_v6  ;;  %3231 = vmatprep.subr.bf16.mxu1 %v3545_v6 }
 0x6f2   : > { %3220 = vmatpush3.bf16.xpose.msra.mxu0 %v2182_v4  ;;  %3232 = vmatpush3.bf16.xpose.msra.mxu1 %v2258_v9 }
 0x6f3   : > { %3221 = vmatprep.subr.bf16.mxu0 %v3545_v6  ;;  %3233 = vmatprep.subr.bf16.mxu1 %v3545_v6 }
 0x6fa   : > { %3222 = vmatpush3.bf16.xpose.msra.mxu0 %v2185_v29  ;;  %3234 = vmatpush3.bf16.xpose.msra.mxu1 %v2261_v31 }
 0x6fb   : > { %3247 = vmatprep.subr.bf16.mxu0 %v3545_v6  ;;  %3235 = vmatprep.subr.bf16.mxu1 %v3545_v6 }
 0x701   : > { %3224 = vmatmul.mubr.msk.bf16.vlgmr.msra.gmra.mrb[28].mxu0 %vm1092_vm5, %v2143_v35 }
 0x702   : > { %3248 = vmatpush3.bf16.msra.mxu0 %v2353_v1  ;;  %3263 = vmatprep.mubr.msk.bf16.mxu0 %vm3546_vm1, %v3545_v6 }
 0x703   : > { %3236 = vmatpush3.bf16.xpose.msra.mxu1 %v2264_v19  ;;  %3249 = vmatprep.subr.bf16.mxu0 %v3545_v6 }
 0x704   : > { %3237 = vmatprep.subr.bf16.mxu1 %v3545_v6 }
 0x706   : > { %3250 = vmatpush3.bf16.msra.mxu0 %v2355_v32 }
 0x707   : > { %3251 = vmatprep.subr.bf16.mxu0 %v3545_v6 }
 0x70a   : > { %3252 = vmatpush3.bf16.msra.mxu0 %v2357_v43 }
 0x70b   : > { %3238 = vmatpush3.bf16.xpose.msra.mxu1 %v2267_v46  ;;  %3253 = vmatprep.subr.bf16.mxu0 %v3545_v6 }
 0x70c   : > { %3239 = vmatprep.subr.bf16.mxu1 %v3545_v6 }
 0x70e   : > { %3254 = vmatpush3.bf16.msra.mxu0 %v2359_v12 }
 0x70f   : > { %3255 = vmatprep.subr.bf16.mxu0 %v3545_v6 }
 0x712   : > { %3256 = vmatpush3.bf16.msra.mxu0 %v2361_v57 }
 0x713   : > { %3240 = vmatpush3.bf16.xpose.msra.mxu1 %v2270_v59  ;;  %3257 = vmatprep.subr.bf16.mxu0 %v3545_v6 }
 0x714   : > { %3241 = vmatprep.subr.bf16.mxu1 %v3545_v6 }
 0x716   : > { %3258 = vmatpush3.bf16.msra.mxu0 %v2363_v22 }
 0x717   : > { %3259 = vmatprep.subr.bf16.mxu0 %v3545_v6 }
 0x71b   : > { %3242 = vmatpush3.bf16.xpose.msra.mxu1 %v2273_v17 }
 0x722   : > { %3244 = vmatmul.mubr.msk.bf16.vlgmr.msra.gmra.mrb[44].mxu1 %vm1092_vm5, %v2231_v34 }
 0x7af   : > { %v4402_v0 = vpop.f32.mrb[40].mxu1 }
 0x7b0   : > { %v3205_v21 = vpop.f32.mrb[41].mxu1 }
 0x7b1   : > { %v4404_v13 = vpop.f32.mrb[42].mxu1 }
 0x7b2   : > { %v3206_v28 = vpop.f32.mrb[43].mxu1 }
 0x7d4   : > { %v2221_v44 = vpop.f32.mrb[28].mxu0 }
 0x7d5   : > { %v2222_v49 = vadd.f32 %v2221_v44, %v3927_v45  ;;  %v3225_v50 = vpop.f32.mrb[29].mxu0 }
 0x7d6   : > { %v2224_v51 = vpop.f32.mrb[30].mxu0 }
 0x7d7   : > { %v2225_v52 = vadd.f32 %v2224_v51, %v3927_v45  ;;  %v3226_v53 = vpop.f32.mrb[31].mxu0  ;;  %v2228_v56 = vsel %vm1169_vm6, %v2222_v49, %v3929_v47 }
 0x7d8   : > { %2318 = vmax.xlane.f32.xlu0 %v2228_v56 }
 0x7d9   : > { %v2229_v58 = vsel %vm1170_vm7, %v2225_v52, %v3929_v47 }
 0x7da   : > { %2320 = vmax.xlane.f32.xlu1 %v2229_v58 }
 0x7eb   : > { %2366 = vrot.lane.b32.xlu1 %v3463_v18, %s3554_s18 }
 0x7ef   : > { %2419 = vrot.lane.b32.xlu1 %v4255_v25, %s3554_s18 }
 0x7f3   : > { %2423 = vrot.lane.b32.xlu1 %v4259_v27, %s3554_s18  ;;  %v3464_v27 = vld [vmem:[#allocation3 + $0x30] sm:$0xff] }
 0x7f5   : > { %v2309_v45 = vpop.f32.mrb[44].mxu1 }
 0x7f6   : > { %v2310_v63 = vadd.f32 %v2309_v45, %v3951_v60  ;;  %v3245_v3 = vpop.f32.mrb[45].mxu1 }
 0x7f7   : > { %v2312_v4 = vpop.f32.mrb[46].mxu1  ;;  %2427 = vrot.lane.b32.xlu1 %v4319_v24, %s3554_s18 }
 0x7f8   : > { %v2313_v47 = vadd.f32 %v2312_v4, %v3951_v60  ;;  %v3246_v9 = vpop.f32.mrb[47].mxu1  ;;  %v2316_v14 = vsel %vm1169_vm6, %v2310_v63, %v3953_v61 }
 0x7f9   : > { %2322 = vmax.xlane.f32.xlu0 %v2316_v14 }
 0x7fa   : > { %v2317_v25 = vsel %vm1170_vm7, %v2313_v47, %v3953_v61 }
 0x7fb   : > { %2431 = vrot.lane.b32.xlu1 %v4325_v26, %s3554_s18 }
 0x7fd   : > { %2324 = vmax.xlane.f32.xlu0 %v2317_v25 }
 0x813   : > { %2364 = vrot.lane.b32.xlu0 %v3464_v27, %s3554_s18 }
 0x817   : > { %2417 = vrot.lane.b32.xlu0 %v4283_v11, %s3554_s18 }
 0x81b   : > { %2421 = vrot.lane.b32.xlu0 %v4289_v16, %s3554_s18 }
 0x81f   : > { %2425 = vrot.lane.b32.xlu0 %v4295_v36, %s3554_s18  ;;  %1650 = vadd.xlane.f32.xlu1 %v4188_v20 }
 0x823   : > { %2429 = vrot.lane.b32.xlu0 %v4301_v37, %s3554_s18  ;;  %1994 = vadd.xlane.f32.xlu1 %v4361_v39 }
 0x827   : > { %1998 = vadd.xlane.f32.xlu1 %v4335_v7 }
 0x842   : > { %1648 = vadd.xlane.f32.xlu0 %v4191_v23 }
 0x846   : > { %1652 = vadd.xlane.f32.xlu0 %v4165_v41 }
 0x84a   : > { %1654 = vadd.xlane.f32.xlu0 %v4167_v48 }
 0x84e   : > { %1996 = vadd.xlane.f32.xlu0 %v4358_v42 }
 0x852   : > { %2000 = vadd.xlane.f32.xlu0 %v4337_v10 }
 0x865   : > { %v2319_v30 = vpop.xlane.xlu0 %2318 }
 0x867   : > { %v2321_v11 = vpop.xlane.xlu1 %2320 }
 0x86b   : > { %v2367_v10 = vpop.permute.xlu1 %2366 }
 0x86f   : > { %v2420_v35 = vpop.permute.xlu1 %2419 }
 0x886   : > { %v2323_v33 = vpop.xlane.xlu0 %2322 }
 0x887   : > { %v2326_v60 = vmax.f32 %v2319_v30, %v2323_v33 }
 0x889   : > { %v2328_v61 = vsub.f32 %v2228_v56, %v2326_v60  ;;  %v2334_v20 = vsub.f32 %v2316_v14, %v2326_v60 }
 0x88a   : > { %v2325_v16 = vpop.xlane.xlu0 %2324 }
 0x88b   : > { %v2330_v36 = vmul.f32 1.442695, %v2328_v61  ;;  %v2327_v37 = vmax.f32 %v2321_v11, %v2325_v16  ;;  %v2336_v24 = vmul.f32 1.442695, %v2334_v20 }
 0x88d   : > { %3425 = vpow2.f32 %v2330_v36  ;;  %v2329_v23 = vsub.f32 %v2229_v58, %v2327_v37  ;;  %v2335_v26 = vsub.f32 %v2317_v25, %v2327_v37 }
 0x88e   : > { %v2365_v41 = vpop.permute.xlu0 %2364  ;;  %3427 = vpow2.f32 %v2336_v24 }
 0x88f   : > { %v2332_v7 = vmul.f32 1.442695, %v2329_v23  ;;  %v2338_v48 = vmul.f32 1.442695, %v2335_v26  ;;  %3260 = vmatpush3.bf16.msra.mxu0 %v2365_v41 }
 0x890   : > { %3261 = vmatprep.subr.bf16.mxu0 %v3545_v6 }
 0x891   : > { %3429 = vpow2.f32 %v2332_v7 }
 0x892   : > { %3431 = vpow2.f32 %v2338_v48  ;;  %v2418_v34 = vpop.permute.xlu0 %2417 }
 0x893   : > { %3262 = vmatpush3.bf16.msra.mxu0 %v2367_v10 }
 0x894   : > { %3267 = vmatprep.subr.bf16.mxu0 %v3545_v6 }
 0x896   : > { %v2422_v1 = vpop.permute.xlu0 %2421 }
 0x897   : > { %v3426_v42 = vpop.eup %3425 }
 0x898   : > { %2340 = vadd.xlane.f32.xlu1 %v3426_v42  ;;  %v3428_v39 = vpop.eup %3427 }
 0x89a   : > { %v2426_v19 = vpop.permute.xlu0 %2425 }
 0x89b   : > { %v3430_v15 = vpop.eup %3429 }
 0x89c   : > { %v3432_v29 = vpop.eup %3431  ;;  %2344 = vadd.xlane.f32.xlu1 %v3428_v39  ;;  %2342 = vadd.xlane.f32.xlu0 %v3430_v15 }
 0x89d   : > { %v2351_v31 = vpack.c.bf16 %v3432_v29, %v3428_v39 }
 0x89f   : > { %3264 = vmatmul.mubr.bf16.vlgmr.msra.gmra.mrb[32].mxu0 %v2351_v31 }
 0x8a0   : > { %3268 = vmatpush3.bf16.msra.mxu0 %v2418_v34  ;;  %1286 = vadd.xlane.f32.xlu1 %v4042_v8  ;;  %v2424_v8 = vpop.permute.xlu1 %2423 }
 0x8a1   : > { %2346 = vadd.xlane.f32.xlu0 %v3432_v29  ;;  %3269 = vmatprep.subr.bf16.mxu0 %v3545_v6 }
 0x8a2   : > { %3283 = vmatprep.mubr.msk.bf16.mxu0 %vm3546_vm1, %v3545_v6 }
 0x8a4   : > { %3270 = vmatpush3.bf16.msra.mxu0 %v2420_v35  ;;  %1290 = vadd.xlane.f32.xlu1 %v4016_v38  ;;  %v2428_v32 = vpop.permute.xlu1 %2427  ;;  %v2430_v38 = vpop.permute.xlu0 %2429 }
 0x8a5   : > { %1288 = vadd.xlane.f32.xlu0 %v4039_v5  ;;  %3271 = vmatprep.subr.bf16.mxu0 %v3545_v6 }
 0x8a8   : > { %3272 = vmatpush3.bf16.msra.mxu0 %v2422_v1  ;;  %v2432_v5 = vpop.permute.xlu1 %2431 }
 0x8a9   : > { %1292 = vadd.xlane.f32.xlu0 %v4018_v40  ;;  %3273 = vmatprep.subr.bf16.mxu0 %v3545_v6  ;;  %v2350_v40 = vpack.c.bf16 %v3430_v15, %v3426_v42 }
 0x8ac   : > { %3274 = vmatpush3.bf16.msra.mxu0 %v2424_v8  ;;  %v1651_v43 = vpop.xlane.xlu1 %1650 }
 0x8ad   : > { %3275 = vmatprep.subr.bf16.mxu0 %v3545_v6 }
 0x8b0   : > { %3276 = vmatpush3.bf16.msra.mxu0 %v2426_v19  ;;  %v1995_v46 = vpop.xlane.xlu1 %1994 }
 0x8b1   : > { %3277 = vmatprep.subr.bf16.mxu0 %v3545_v6 }
 0x8b4   : > { %3278 = vmatpush3.bf16.msra.mxu0 %v2428_v32  ;;  %v1999_v12 = vpop.xlane.xlu1 %1998 }
 0x8b5   : > { %3279 = vmatprep.subr.bf16.mxu0 %v3545_v6  ;;  %v2002_v59 = vadd.f32 %v1999_v12, %v1995_v46 }
 0x8b7   : > { %3433 = vrcp.f32 %v2002_v59 }
 0x8b8   : > { %3280 = vmatpush3.bf16.msra.mxu0 %v2430_v38 }
 0x8b9   : > { %3281 = vmatprep.subr.bf16.mxu0 %v3545_v6 }
 0x8bc   : > { %3282 = vmatpush3.bf16.msra.mxu0 %v2432_v5 }
 0x8bf   : > { %3284 = vmatmul.mubr.bf16.vlgmr.msra.gmra.mrb[32].mxu0 %v2350_v40 }
 0x8c1   : > { %v3434_v49 = vpop.eup %3433 }
 0x8c2   : > { %v2138_v53 = vmul.f32 0.35355338, %v3434_v49 }
 0x8c4   : > { %v2140_v45 = vmul.f32 %v2138_v53, %v4402_v0 }
 0x8cf   : > { %v1649_v57 = vpop.xlane.xlu0 %1648 }
 0x8d3   : > { %v1653_v22 = vpop.xlane.xlu0 %1652 }
 0x8d4   : > { %v1656_v17 = vadd.f32 %v1653_v22, %v1649_v57 }
 0x8d6   : > { %3435 = vrcp.f32 %v1656_v17 }
 0x8d7   : > { %v1655_v21 = vpop.xlane.xlu0 %1654 }
 0x8d8   : > { %v1657_v28 = vadd.f32 %v1655_v21, %v1651_v43 }
 0x8da   : > { %3437 = vrcp.f32 %v1657_v28 }
 0x8db   : > { %v1997_v44 = vpop.xlane.xlu0 %1996 }
 0x8df   : > { %v2001_v50 = vpop.xlane.xlu0 %2000 }
 0x8e0   : > { %v3436_v6 = vpop.eup %3435  ;;  %v2003_v51 = vadd.f32 %v2001_v50, %v1997_v44 }
 0x8e1   : > { %v1792_v52 = vmul.f32 0.35355338, %v3436_v6 }
 0x8e2   : > { %3439 = vrcp.f32 %v2003_v51 }
 0x8e3   : > { %v1794_v56 = vmul.f32 %v1792_v52, %v4235_v62 }
 0x8e4   : > { %v3438_v58 = vpop.eup %3437 }
 0x8e5   : > { %v1793_v18 = vmul.f32 0.35355338, %v3438_v58  ;;  %2490 = vrot.lane.b32.xlu1 %v1794_v56, %s4545_s20 }
 0x8e7   : > { %v1795_v63 = vmul.f32 %v1793_v18, %v4237_v55 }
 0x8e9   : > { %2492 = vrot.lane.b32.xlu0 %v1795_v63, %s4545_s20  ;;  %2498 = vrot.lane.b32.xlu1 %v2140_v45, %s3556_s29  ;;  %s3469_s20 = sshll.u32 %s3558_s27, 4  ;;  %s3470_s20 = int_to_ptr.vmem [resolvable:$false] %s3469_s20 }
 0x8ea   : > { %s3471_s0 = scalar_lea.vmem %s3470_s20, 512  ;;  %p3472_p1 = scmp.lt.s32.totalorder %s4475_s28, %s3470_s20 }
 0x8ec   : > { %v3440_v3 = vpop.eup %3439 }
 0x8ed   : > { %v2139_v4 = vmul.f32 0.35355338, %v3440_v3 }
 0x8ef   : > { %v2141_v47 = vmul.f32 %v2139_v4, %v4404_v13 }
 0x8f1   : > { %2500 = vrot.lane.b32.xlu1 %v2141_v47, %s3556_s29  ;;  %s4481_s29 = scalar_lea.hbm %s4543_s12, %s2751_s19 }
 0x925   : > { %v2341_v9 = vpop.xlane.xlu1 %2340 }
 0x929   : > { %v2343_v62 = vpop.xlane.xlu0 %2342  ;;  %v2345_v14 = vpop.xlane.xlu1 %2344 }
 0x92a   : > { %v2348_v27 = vadd.f32 %v2345_v14, %v2341_v9 }
 0x92c   : > { %3441 = vrcp.f32 %v2348_v27 }
 0x92d   : > { %v1287_v37 = vpop.xlane.xlu1 %1286 }
 0x92e   : > { %v2347_v25 = vpop.xlane.xlu0 %2346 }
 0x92f   : > { %v2349_v30 = vadd.f32 %v2347_v25, %v2343_v62 }
 0x931   : > { %3443 = vrcp.f32 %v2349_v30  ;;  %v1291_v23 = vpop.xlane.xlu1 %1290 }
 0x932   : > { %v1289_v24 = vpop.xlane.xlu0 %1288  ;;  %v1294_v41 = vadd.f32 %v1291_v23, %v1287_v37 }
 0x934   : > { %3445 = vrcp.f32 %v1294_v41 }
 0x936   : > { %v3442_v0 = vpop.eup %3441  ;;  %v1293_v26 = vpop.xlane.xlu0 %1292 }
 0x937   : > { %v2484_v55 = vmul.f32 0.35355338, %v3442_v0  ;;  %v1295_v7 = vadd.f32 %v1293_v26, %v1289_v24 }
 0x939   : > { %3447 = vrcp.f32 %v1295_v7 }
 0x93b   : > { %v3444_v33 = vpop.eup %3443 }
 0x93c   : > { %v2485_v11 = vmul.f32 0.35355338, %v3444_v33 }
 0x93e   : > { %v3446_v10 = vpop.eup %3445 }
 0x93f   : > { %v1446_v39 = vmul.f32 0.35355338, %v3446_v10 }
 0x941   : > { %v1448_v34 = vmul.f32 %v1446_v39, %v4086_v2 }
 0x943   : > { %v3448_v42 = vpop.eup %3447 }
 0x944   : > { %v1447_v29 = vmul.f32 0.35355338, %v3448_v42 }
 0x946   : > { %v1449_v1 = vmul.f32 %v1447_v29, %v4088_v54 }
 0x957   : > { %v2491_v48 = vpop.permute.xlu1 %2490 }
 0x958   : > { %v2512_v8 = vsel %vm1092_vm5, %v1448_v34, %v2491_v48 }
 0x95b   : > { %v2499_v15 = vpop.permute.xlu1 %2498  ;;  %v2493_v31 = vpop.permute.xlu0 %2492 }
 0x95c   : > { %v2515_v19 = vsel %vm2514_vm8, %v2512_v8, %v2499_v15  ;;  %v2513_v38 = vsel %vm1092_vm5, %v1449_v1, %v2493_v31 }
 0x963   : > { %v2501_v35 = vpop.permute.xlu1 %2500 }
 0x964   : > { %v2516_v2 = vsel %vm2514_vm8, %v2513_v38, %v2501_v35 }
 0x992   : > { %v2475_v60 = vpop.f32.mrb[32].mxu0 }
 0x993   : > { %v2486_v61 = vmul.f32 %v2484_v55, %v2475_v60  ;;  %v3285_v20 = vpop.f32.mrb[33].mxu0 }
 0x994   : > { %v2478_v16 = vpop.f32.mrb[34].mxu0 }
 0x995   : > { %v2487_v36 = vmul.f32 %v2485_v11, %v2478_v16  ;;  %2506 = vrot.lane.b32.xlu0 %v2486_v61, %s3557_s8  ;;  %v3286_v13 = vpop.f32.mrb[35].mxu0 }
 0x997   : > { %2508 = vrot.lane.b32.xlu1 %v2487_v36, %s3557_s8  ;;  %s3465_s8 = scalar_lea.vmem %s4475_s28, 256 }
 0x998   : > { %p3466_p12 = scmp.ne.s32.totalorder %s4475_s28, %s3465_s8  ;;  %p3473_p2 = scmp.lt.s32.totalorder %s3471_s0, %s3465_s8 }
 0x99a   : > { %p3467_p13 = pnand %p3466_p12, %p3665_p4  ;;  %p3474_p3 = por %p3473_p2, %p3472_p1 }
 0x99c   : > { %p3468_p0 = pneg %p3467_p13 }
 0x99e   : > { %p3475_p5 = pnand %p3474_p3, %p3468_p0 }
 0xa07   : > { %v2507_v32 = vpop.permute.xlu0 %2506 }
 0xa08   : > { %v2518_v5 = vsel %vm2517_vm9, %v2515_v19, %v2507_v32 }
 0xa09   : > { %2520 = vst.msk [vmem:[%s509_s17] sm:$0xff] %vm631_vm0, %v2518_v5  ;;  %v2509_v40 = vpop.permute.xlu1 %2508 }
 0xa0a   : > { %v2519_v54 = vsel %vm2517_vm9, %v2516_v2, %v2509_v40 }
 0xa0b   : > { %2521 = vst.msk [vmem:[%s509_s17 + $0x8] sm:$0xff] %vm631_vm0, %v2519_v54 }
 0xa0c   : > { %3478 = shalt.err (!%p3475_p5)
}
 0xa0d   : > { %s3479_s30 = scalar_lea.hbm %s4481_s29, 256  ;;  %s3483_s14 = scalar_lea.hbm %s4543_s12, 512 }
 0xa0e   : > { %p3480_p6 = scmp.ne.s32.totalorder %s4481_s29, %s3479_s30  ;;  %p3484_p10 = scmp.lt.u32.totalorder %s4481_s29, %s4543_s12 }
 0xa0f   : > { %p3485_p11 = scmp.lt.u32.totalorder %s3483_s14, %s3479_s30  ;;  %p3487_p13 = scmp.lt.u32.totalorder %s3479_s30, %s4481_s29 }
 0xa10   : > { %p3481_p7 = pnand %p3480_p6, %p3665_p4 }
 0xa11   : > { %p3486_p12 = por %p3485_p11, %p3484_p10 }
 0xa12   : > { %p3482_p9 = pneg %p3481_p7 }
 0xa13   : > { %p3488_p0 = por %p3487_p13, %p3486_p12 }
 0xa15   : > { %p3489_p1 = pnand %p3488_p0, %p3482_p9 }
 0xa17   : > { %3492 = shalt.err (!%p3489_p1)
}
 0xa18   : > { %s3559_s0 = smov 128   ;;  %s4553_s8 = smov 8  }
 0xa19   : > { %3307 = dma.vmem_to_hbm [thread:$0]  (%p3665_p4), %s4475_s28, 256, %s4481_s29, %s4484_s24, %s3559_s0, %s3559_s0, %s4553_s8  }
 0xa1a PF: > { %p3313_p2 = scmp.ge.s32.totalorder %s3543_s26, 2  ;;  %s2553_s27 = sand.u32 1, %s3523_s21  }
 0xa1b   : > { %s2554_s30 = scalar_lea.sflag [#allocation5], %s2553_s27 }
 0xa1c   : > { %p3310_p3 = pnand %p3313_p2, %p3672_p8 }
 0xa1e   : > { %3518 = dma.done.wait (!%p3310_p3), %s2554_s30, 256  }
 0xa1f   : > { %3520 = vsyncadd (!%p3310_p3), %s2554_s30, 4294967040  ;;  %s25_s26 = sadd.s32 1, %s3543_s26   ;;  %s4554_s13 = sld [smem:[#allocation7_spill]] }
 0xa20   : > { %p22_p5 = scmp.ge.s32.totalorder %s25_s26, 4   ;;  %s4555_s21 = smov %s3527_s22 }
 0xa21   : > { %s4556_s22 = smov %s3531_s23  ;;  %s4557_s23 = smov %s3678_s16 }
 0xa22   : > { %s4558_s24 = smov %s3539_s25  ;;  %24 = sbr.rel (!%p22_p5) target bundleno = 7 (0x7), region = 122 }
 0xa25   : > { %s4559_s25 = smov %s4554_s13 }
 0xa29   :  { %2559 = vsyncpa [#allocation5], 1 }
 0xa2a   :  { %2561 = vsyncpa [#allocation5 + $0x1], 1 }

</bundles_post_ra>
